<compile_context>
chip_gen: v7x
topology: tpu7x:2x2x1
jax: 0.10.0
libtpu: 0.0.40
codegen_flags: <defaults>
</compile_context>

<pallas_src>
import math
from functools import partial

import jax
import jax.numpy as jnp
from jax.experimental import pallas as pl
from jax.experimental.pallas import tpu as pltpu


# ---------------------------------------------------------------------------
# in-kernel helpers (pure jnp, trace into the Pallas bodies)
# ---------------------------------------------------------------------------
def _gelu_tanh(x):
    # nn.GELU(approximate='tanh')
    c = math.sqrt(2.0 / math.pi)
    return 0.5 * x * (1.0 + jnp.tanh(c * (x + 0.044715 * x * x * x)))


def _silu(x):
    return x * (1.0 / (1.0 + jnp.exp(-x)))


def _rms_scale(x, g, dim):
    # matches: F.normalize(x, dim=-1) * dim**0.5 * g     (L2 norm clamped at 1e-12)
    ssq = jnp.sum(x * x, axis=-1, keepdims=True)
    inv = jax.lax.rsqrt(jnp.maximum(ssq, 1e-24))        # == 1 / max(||x||, 1e-12)
    return x * (inv * (dim ** 0.5) * g)


# ---------------------------------------------------------------------------
# kernel A: RMSNorm1 + adaLN modulate + qkv projection + per-head qk-RMSNorm
#           (outputs head-major q/k/v so the flash loop is pure matmul work)
# ---------------------------------------------------------------------------
def qkv_proj_kernel(g1_ref, gq_ref, gk_ref, x_ref, sc_ref, sh_ref, w_ref, b_ref,
                    q_ref, k_ref, v_ref, *, dim, num_heads, head_dim):
    x = x_ref[0].astype(jnp.float32)                    # (TQ, D)
    xn = _rms_scale(x, g1_ref[0], dim)
    xm = xn * (1.0 + sc_ref[0]) + sh_ref[0]             # modulate, (1, D) broadcast
    qkv = jnp.dot(xm.astype(w_ref.dtype), w_ref[...],   # bf16 x bf16 -> f32 acc
                  preferred_element_type=jnp.float32)
    qkv = qkv + b_ref[...].astype(jnp.float32)          # (TQ, 3D)

    # split heads (static lane slices), apply qk-norm once here (gq already
    # includes the 1/sqrt(head_dim) attention scale), store head-major.
    for h in range(num_heads):
        lo = h * head_dim
        q_h = _rms_scale(qkv[:, lo:lo + head_dim], gq_ref[0], head_dim)
        k_h = _rms_scale(qkv[:, dim + lo:dim + lo + head_dim], gk_ref[0], head_dim)
        v_h = qkv[:, 2 * dim + lo:2 * dim + lo + head_dim]
        q_ref[0, h] = q_h.astype(q_ref.dtype)
        k_ref[0, h] = k_h.astype(k_ref.dtype)
        v_ref[0, h] = v_h.astype(v_ref.dtype)


# ---------------------------------------------------------------------------
# kernel B: flash attention (online softmax over KV tiles); q/k pre-normalized
# ---------------------------------------------------------------------------
def flash_attn_kernel(q_ref, k_ref, v_ref, o_ref, m_sc, l_sc, acc_sc):
    ki = pl.program_id(3)

    @pl.when(ki == 0)
    def _():
        m_sc[...] = jnp.full(m_sc.shape, -jnp.inf, jnp.float32)
        l_sc[...] = jnp.zeros(l_sc.shape, jnp.float32)
        acc_sc[...] = jnp.zeros(acc_sc.shape, jnp.float32)

    q = q_ref[0, 0]                                     # (TQ, hd) bf16, pre-scaled
    k = k_ref[0, 0]                                     # (TK, hd) bf16
    # scores: contract last dims directly (no k.T -> no XLU transpose expected;
    # verified layout choice — k is stored hd-minor / head-major by kernel A).
    s = jax.lax.dot_general(q, k, (((1,), (1,)), ((), ())),
                            preferred_element_type=jnp.float32)   # (TQ, TK)

    m_prev = m_sc[...]
    m_new = jnp.maximum(m_prev, jnp.max(s, axis=-1, keepdims=True))
    alpha = jnp.exp(m_prev - m_new)
    p = jnp.exp(s - m_new)
    l_sc[...] = alpha * l_sc[...] + jnp.sum(p, axis=-1, keepdims=True)
    acc_sc[...] = alpha * acc_sc[...] + jnp.dot(
        p.astype(v_ref.dtype), v_ref[0, 0], preferred_element_type=jnp.float32)
    m_sc[...] = m_new

    @pl.when(ki == pl.num_programs(3) - 1)
    def _():
        o_ref[0, 0] = (acc_sc[...] * pl.reciprocal(l_sc[...], approx=True)
                       ).astype(o_ref.dtype)


# ---------------------------------------------------------------------------
# kernel C: attn projection (fold heads) + gated residual + RMSNorm2 + modulate
#           + mlp_dim-tiled MLP (tanh GELU) + gated residual
# ---------------------------------------------------------------------------
def post_attn_mlp_kernel(g2_ref, x_ref, a_ref, gmsa_ref, scmlp_ref, shmlp_ref,
                         gmlp_ref, wp_ref, bp_ref, w1_ref, b1_ref, w2_ref, b2_ref,
                         o_ref, res_sc, xm_sc, acc_sc, *, dim, num_heads, head_dim):
    f = pl.program_id(2)

    @pl.when(f == 0)
    def _():
        x = x_ref[0].astype(jnp.float32)                # (TQ, D)
        # attention output projection: sum_h a[h] @ W_proj[h*hd:(h+1)*hd, :]
        # (equivalent to concatenating heads, without an in-kernel relayout)
        proj = jnp.zeros((x.shape[0], dim), jnp.float32)
        for h in range(num_heads):
            wp_h = wp_ref[h * head_dim:(h + 1) * head_dim, :]
            proj = proj + jnp.dot(a_ref[0, h], wp_h,
                                  preferred_element_type=jnp.float32)
        proj = proj + bp_ref[...].astype(jnp.float32)
        res = x + gmsa_ref[0] * proj                    # gated residual (attn branch)
        res_sc[...] = res

        xn = _rms_scale(res, g2_ref[0], dim)
        xm = xn * (1.0 + scmlp_ref[0]) + shmlp_ref[0]
        xm_sc[...] = xm.astype(xm_sc.dtype)             # bf16 MLP input, reused per chunk
        acc_sc[...] = jnp.zeros(acc_sc.shape, jnp.float32)

    # mlp_dim-tiled reduction: h_chunk = gelu(xm @ W1[:, f]) ; acc += h_chunk @ W2[f, :]
    h1 = jnp.dot(xm_sc[...], w1_ref[...], preferred_element_type=jnp.float32)
    h1 = _gelu_tanh(h1 + b1_ref[...].astype(jnp.float32))
    acc_sc[...] += jnp.dot(h1.astype(w2_ref.dtype), w2_ref[...],
                           preferred_element_type=jnp.float32)

    @pl.when(f == pl.num_programs(2) - 1)
    def _():
        y = acc_sc[...] + b2_ref[...].astype(jnp.float32)
        o_ref[0] = (res_sc[...] + gmlp_ref[0] * y).astype(o_ref.dtype)


# ---------------------------------------------------------------------------
# wrapper
# ---------------------------------------------------------------------------
def dit_block(x, c, params, *, num_heads, tile_q=None, tile_k=None, tile_ff=None,
              matmul_dtype=jnp.bfloat16):
    B, N, D = x.shape
    H = num_heads
    assert D % H == 0
    hd = D // H
    assert hd % 8 == 0, "head_dim must be a multiple of 8 (sublane granularity)"
    mlp_dim = params["w_fc1"].shape[1]

    f32 = jnp.float32
    cdt = matmul_dtype
    itemsize = jnp.dtype(cdt).itemsize

    # ---- per-generation attention tile default (256-wide MXU on v6e/v7x) ----
    try:
        kind = jax.devices()[0].device_kind.lower()
    except Exception:
        kind = ""
    attn_tile_default = 128 if ("v5 lite" in kind or "v5e" in kind) else 256
    if tile_q is None:
        tile_q = attn_tile_default
    if tile_k is None:
        tile_k = attn_tile_default
    if tile_ff is None:
        tile_ff = 512
    tile_q = min(tile_q, N)
    tile_k = min(tile_k, N)
    tile_ff = min(tile_ff, mlp_dim)
    assert N % tile_q == 0 and N % tile_k == 0 and mlp_dim % tile_ff == 0
    nq, nk, nf = N // tile_q, N // tile_k, mlp_dim // tile_ff

    # ---- VMEM budget: ~75% of physical, capped at 100 MiB -------------------
    try:
        vmem_cap = int(pltpu.get_tpu_info().vmem_capacity_bytes)
    except Exception:
        vmem_cap = 64 * 1024 * 1024                     # conservative (v7x per-core)
    vmem_limit = min(int(vmem_cap * 3 // 4), 100 * 1024 * 1024)

    # ---- bf16 weights (MXU path); biases stay f32 and add into f32 acc ------
    w_qkv = params["w_qkv"].astype(cdt)
    w_proj = params["w_proj"].astype(cdt)
    w_fc1 = params["w_fc1"].astype(cdt)
    w_fc2 = params["w_fc2"].astype(cdt)

    # ---- stage 0: adaLN modulation hoisted out of the Pallas kernels --------
    mod = (jax.nn.silu(c.astype(f32)) @ params["w_ada"].astype(f32)
           + params["b_ada"].astype(f32))               # (B, 6D)
    mod = mod.reshape(B, 6, 1, D)
    shift_msa, scale_msa, gate_msa = mod[:, 0], mod[:, 1], mod[:, 2]
    shift_mlp, scale_mlp, gate_mlp = mod[:, 3], mod[:, 4], mod[:, 5]   # each (B, 1, D)

    smem = pl.BlockSpec(memory_space=pltpu.SMEM)        # scalar RMSNorm gains
    sm_scale = hd ** -0.5
    gq_eff = params["gq"].astype(f32) * sm_scale        # fold 1/sqrt(hd) into gq

    # ---- stage 1: norm1 + modulate + qkv + per-head qk-norm -> head-major ---
    vec_a = pl.BlockSpec((1, 1, D), lambda b, i: (b, 0, 0))
    head_out_spec = pl.BlockSpec((1, H, tile_q, hd), lambda b, i: (b, 0, i, 0))
    q_hm, k_hm, v_hm = pl.pallas_call(
        partial(qkv_proj_kernel, dim=D, num_heads=H, head_dim=hd),
        out_shape=[jax.ShapeDtypeStruct((B, H, N, hd), cdt)] * 3,
        grid=(B, nq),
        in_specs=[
            smem, smem, smem,                                         # g1, gq*scale, gk
            pl.BlockSpec((1, tile_q, D), lambda b, i: (b, i, 0)),     # x
            vec_a,                                                    # scale_msa
            vec_a,                                                    # shift_msa
            pl.BlockSpec((D, 3 * D), lambda b, i: (0, 0)),            # w_qkv (bf16)
            pl.BlockSpec((1, 3 * D), lambda b, i: (0, 0)),            # b_qkv
        ],
        out_specs=[head_out_spec, head_out_spec, head_out_spec],
        compiler_params=pltpu.CompilerParams(
            dimension_semantics=("parallel", "parallel"),
            vmem_limit_bytes=vmem_limit),
        cost_estimate=pl.CostEstimate(
            flops=2 * B * N * D * 3 * D,
            transcendentals=B * N,
            bytes_accessed=itemsize * (4 * B * N * D + 3 * D * D)),
    )(params["g1"], gq_eff, params["gk"], x, scale_msa, shift_msa,
      w_qkv, params["b_qkv"])

    # ---- stage 2: flash attention over (batch, head, q-tile, kv-tile) -------
    attn = pl.pallas_call(
        flash_attn_kernel,
        out_shape=jax.ShapeDtypeStruct((B, H, N, hd), cdt),
        grid=(B, H, nq, nk),
        in_specs=[
            pl.BlockSpec((1, 1, tile_q, hd), lambda b, h, qi, ki: (b, h, qi, 0)),  # q
            pl.BlockSpec((1, 1, tile_k, hd), lambda b, h, qi, ki: (b, h, ki, 0)),  # k
            pl.BlockSpec((1, 1, tile_k, hd), lambda b, h, qi, ki: (b, h, ki, 0)),  # v
        ],
        out_specs=pl.BlockSpec((1, 1, tile_q, hd), lambda b, h, qi, ki: (b, h, qi, 0)),
        scratch_shapes=[
            pltpu.VMEM((tile_q, 1), jnp.float32),     # running max
            pltpu.VMEM((tile_q, 1), jnp.float32),     # running sum
            pltpu.VMEM((tile_q, hd), jnp.float32),    # output accumulator
        ],
        compiler_params=pltpu.CompilerParams(
            dimension_semantics=("parallel", "parallel", "parallel", "arbitrary"),
            vmem_limit_bytes=vmem_limit),
        cost_estimate=pl.CostEstimate(
            flops=4 * B * H * N * N * hd,
            transcendentals=B * H * N * N,
            bytes_accessed=itemsize * (B * N * D * (1 + 2 * nq) + B * N * D)),
    )(q_hm, k_hm, v_hm)

    # ---- stage 3: proj + residual + norm2 + modulate + tiled MLP + residual -
    vec_c = pl.BlockSpec((1, 1, D), lambda b, i, f: (b, 0, 0))
    out = pl.pallas_call(
        partial(post_attn_mlp_kernel, dim=D, num_heads=H, head_dim=hd),
        out_shape=jax.ShapeDtypeStruct((B, N, D), x.dtype),
        grid=(B, nq, nf),
        in_specs=[
            smem,                                                        # g2
            pl.BlockSpec((1, tile_q, D), lambda b, i, f: (b, i, 0)),     # x
            pl.BlockSpec((1, H, tile_q, hd), lambda b, i, f: (b, 0, i, 0)),  # attn (head-major)
            vec_c,                                                       # gate_msa
            vec_c,                                                       # scale_mlp
            vec_c,                                                       # shift_mlp
            vec_c,                                                       # gate_mlp
            pl.BlockSpec((D, D), lambda b, i, f: (0, 0)),                # w_proj
            pl.BlockSpec((1, D), lambda b, i, f: (0, 0)),                # b_proj
            pl.BlockSpec((D, tile_ff), lambda b, i, f: (0, f)),          # w_fc1 slice
            pl.BlockSpec((1, tile_ff), lambda b, i, f: (0, f)),          # b_fc1 slice
            pl.BlockSpec((tile_ff, D), lambda b, i, f: (f, 0)),          # w_fc2 slice
            pl.BlockSpec((1, D), lambda b, i, f: (0, 0)),                # b_fc2
        ],
        out_specs=pl.BlockSpec((1, tile_q, D), lambda b, i, f: (b, i, 0)),
        scratch_shapes=[
            pltpu.VMEM((tile_q, D), jnp.float32),   # post-attn residual
            pltpu.VMEM((tile_q, D), cdt),           # modulated norm2 output (MLP input)
            pltpu.VMEM((tile_q, D), jnp.float32),   # fc2 accumulator
        ],
        compiler_params=pltpu.CompilerParams(
            dimension_semantics=("parallel", "parallel", "arbitrary"),
            vmem_limit_bytes=vmem_limit),
        cost_estimate=pl.CostEstimate(
            flops=2 * B * N * (D * D + 2 * D * mlp_dim),
            transcendentals=B * N * (mlp_dim + 1),
            bytes_accessed=itemsize * (3 * B * N * D + D * D + 2 * D * mlp_dim)),
    )(params["g2"], x, attn, gate_msa, scale_mlp, shift_mlp, gate_mlp,
      w_proj, params["b_proj"], w_fc1, params["b_fc1"], w_fc2, params["b_fc2"])
    return out


# ---------------------------------------------------------------------------
# pure-JAX f32 reference (mirrors the PyTorch forward) for a correctness check
# ---------------------------------------------------------------------------
def dit_block_ref(x, c, p, *, num_heads):
    B, N, D = x.shape
    H, hd = num_heads, D // num_heads
    ada = _silu(c) @ p["w_ada"] + p["b_ada"][0]
    sh_m, sc_m, g_m, sh_l, sc_l, g_l = jnp.split(ada, 6, axis=-1)

    def rms(v, g, d):
        n = jnp.maximum(jnp.sqrt(jnp.sum(v * v, -1, keepdims=True)), 1e-12)
        return v / n * (d ** 0.5) * g

    xm = rms(x, p["g1"][0], D) * (1 + sc_m[:, None, :]) + sh_m[:, None, :]
    qkv = xm @ p["w_qkv"] + p["b_qkv"][0]
    qkv = qkv.reshape(B, N, 3, H, hd).transpose(2, 0, 3, 1, 4)
    q, k, v = qkv[0], qkv[1], qkv[2]
    q = rms(q, p["gq"][0], hd) * (hd ** -0.5)
    k = rms(k, p["gk"][0], hd)
    attn = jax.nn.softmax(jnp.einsum("bhqd,bhkd->bhqk", q, k), axis=-1)
    o = jnp.einsum("bhqk,bhkd->bhqd", attn, v).transpose(0, 2, 1, 3).reshape(B, N, D)
    o = o @ p["w_proj"] + p["b_proj"][0]
    x = x + g_m[:, None, :] * o

    xm2 = rms(x, p["g2"][0], D) * (1 + sc_l[:, None, :]) + sh_l[:, None, :]
    h = _gelu_tanh(xm2 @ p["w_fc1"] + p["b_fc1"][0])
    y = h @ p["w_fc2"] + p["b_fc2"][0]
    return x + g_l[:, None, :] * y


# ---------------------------------------------------------------------------
if __name__ == "__main__":
    B, N, D = 2, 256, 256
    num_heads = 4            # head_dim = 64 (no hd % 128 restriction anymore)
    mlp_ratio = 4.0
    mlp_dim = int(D * mlp_ratio)

    key = jax.random.PRNGKey(0)
    ks = jax.random.split(key, 12)

    def w(k, shape, scale=0.02):
        return (scale * jax.random.normal(k, shape)).astype(jnp.float32)

    params = {
        "g1": jnp.ones((1,), jnp.float32),
        "w_qkv": w(ks[0], (D, 3 * D)),
        "b_qkv": w(ks[1], (1, 3 * D)),
        "gq": jnp.ones((1,), jnp.float32),
        "gk": jnp.ones((1,), jnp.float32),
        "w_proj": w(ks[2], (D, D)),
        "b_proj": w(ks[3], (1, D)),
        "g2": jnp.ones((1,), jnp.float32),
        "w_fc1": w(ks[4], (D, mlp_dim)),
        "b_fc1": w(ks[5], (1, mlp_dim)),
        "w_fc2": w(ks[6], (mlp_dim, D)),
        "b_fc2": w(ks[7], (1, D)),
        "w_ada": w(ks[8], (D, 6 * D)),
        "b_ada": w(ks[9], (1, 6 * D)),
    }

    x = jax.random.normal(ks[10], (B, N, D), jnp.float32)
    c = jax.random.normal(ks[11], (B, D), jnp.float32)

    # small tiles so the demo exercises multi-tile online softmax and the
    # mlp_dim-tiled reduction (nq=nk=2, nf=2); real sizes use the 256 defaults.
    out = dit_block(x, c, params, num_heads=num_heads,
                    tile_q=128, tile_k=128, tile_ff=512)
    out = jax.block_until_ready(out)

    ref = dit_block_ref(x, c, params, num_heads=num_heads)
    err = float(jnp.max(jnp.abs(out - ref)))
    assert out.shape == (B, N, D)
    assert err < 3e-2, err   # bf16 matmul path vs. f32 reference

    print("KERNEL_OK")
</pallas_src>

<mosaic_0001>
module attributes {stable_mosaic.version = 11 : i64} {
  func.func @qkv_proj_kernel(%arg0: i32, %arg1: i32, %arg2: memref<1xf32, #tpu.memory_space<smem>>, %arg3: memref<1xf32, #tpu.memory_space<smem>>, %arg4: memref<1xf32, #tpu.memory_space<smem>>, %arg5: memref<1x128x256xf32, #tpu.memory_space<vmem>>, %arg6: memref<1x1x256xf32, #tpu.memory_space<vmem>>, %arg7: memref<1x1x256xf32, #tpu.memory_space<vmem>>, %arg8: memref<256x768xbf16, #tpu.memory_space<vmem>>, %arg9: memref<1x768xf32, #tpu.memory_space<vmem>>, %arg10: memref<1x4x128x64xbf16, #tpu.memory_space<vmem>>, %arg11: memref<1x4x128x64xbf16, #tpu.memory_space<vmem>>, %arg12: memref<1x4x128x64xbf16, #tpu.memory_space<vmem>>) attributes {dimension_semantics = [#tpu.dimension_semantics<parallel>, #tpu.dimension_semantics<parallel>], iteration_bounds = array<i64: 2, 2>, scalar_prefetch = 0 : i64, scratch_operands = 0 : i64, tpu.core_type = #tpu.core_type<tc>, window_params = [{transform_indices = @transform_0, window_bounds = array<i64: 1>}, {transform_indices = @transform_1, window_bounds = array<i64: 1>}, {transform_indices = @transform_2, window_bounds = array<i64: 1>}, {transform_indices = @transform_3, window_bounds = array<i64: 1, 128, 256>}, {transform_indices = @transform_4, window_bounds = array<i64: 1, 1, 256>}, {transform_indices = @transform_5, window_bounds = array<i64: 1, 1, 256>}, {pipeline_mode = #tpu.pipeline_mode<synchronous>, transform_indices = @transform_6, window_bounds = array<i64: 256, 768>}, {pipeline_mode = #tpu.pipeline_mode<synchronous>, transform_indices = @transform_7, window_bounds = array<i64: 1, 768>}, {transform_indices = @transform_8, window_bounds = array<i64: 1, 4, 128, 64>}, {transform_indices = @transform_9, window_bounds = array<i64: 1, 4, 128, 64>}, {transform_indices = @transform_10, window_bounds = array<i64: 1, 4, 128, 64>}]} {
    %c0 = arith.constant 0 : index
    %c0_0 = arith.constant 0 : index
    %c0_1 = arith.constant 0 : index
    %0 = vector.load %arg5[%c0, %c0_0, %c0_1] : memref<1x128x256xf32, #tpu.memory_space<vmem>>, vector<1x128x256xf32>
    %1 = vector.shape_cast %0 : vector<1x128x256xf32> to vector<128x256xf32>
    %c0_2 = arith.constant 0 : index
    %2 = memref.load %arg2[%c0_2] : memref<1xf32, #tpu.memory_space<smem>>
    %3 = arith.mulf %1, %1 : vector<128x256xf32>
    %cst = arith.constant dense<0.000000e+00> : vector<128xf32>
    %4 = vector.multi_reduction <add>, %3, %cst [1] : vector<128x256xf32> to vector<128xf32>
    %5 = vector.shape_cast %4 : vector<128xf32> to vector<128x1xf32>
    %cst_3 = arith.constant 1.000000e-24 : f32
    %6 = vector.broadcast %cst_3 : f32 to vector<128x1xf32>
    %7 = arith.maximumf %5, %6 : vector<128x1xf32>
    %8 = math.rsqrt %7 : vector<128x1xf32>
    %cst_4 = arith.constant 1.600000e+01 : f32
    %9 = vector.broadcast %cst_4 : f32 to vector<128x1xf32>
    %10 = arith.mulf %8, %9 : vector<128x1xf32>
    %11 = vector.broadcast %2 : f32 to vector<128x1xf32>
    %12 = arith.mulf %10, %11 : vector<128x1xf32>
    %13 = vector.broadcast %12 : vector<128x1xf32> to vector<128x256xf32>
    %14 = arith.mulf %1, %13 : vector<128x256xf32>
    %c0_5 = arith.constant 0 : index
    %c0_6 = arith.constant 0 : index
    %c0_7 = arith.constant 0 : index
    %15 = vector.load %arg6[%c0_5, %c0_6, %c0_7] : memref<1x1x256xf32, #tpu.memory_space<vmem>>, vector<1x1x256xf32>
    %16 = vector.shape_cast %15 : vector<1x1x256xf32> to vector<1x256xf32>
    %cst_8 = arith.constant 1.000000e+00 : f32
    %17 = vector.broadcast %cst_8 : f32 to vector<1x256xf32>
    %18 = arith.addf %17, %16 : vector<1x256xf32>
    %19 = vector.broadcast %18 : vector<1x256xf32> to vector<128x256xf32>
    %20 = arith.mulf %14, %19 : vector<128x256xf32>
    %c0_9 = arith.constant 0 : index
    %c0_10 = arith.constant 0 : index
    %c0_11 = arith.constant 0 : index
    %21 = vector.load %arg7[%c0_9, %c0_10, %c0_11] : memref<1x1x256xf32, #tpu.memory_space<vmem>>, vector<1x1x256xf32>
    %22 = vector.shape_cast %21 : vector<1x1x256xf32> to vector<1x256xf32>
    %23 = vector.broadcast %22 : vector<1x256xf32> to vector<128x256xf32>
    %24 = arith.addf %20, %23 : vector<128x256xf32>
    %25 = arith.truncf %24 : vector<128x256xf32> to vector<128x256xbf16>
    %c0_12 = arith.constant 0 : index
    %c0_13 = arith.constant 0 : index
    %26 = vector.load %arg8[%c0_12, %c0_13] : memref<256x768xbf16, #tpu.memory_space<vmem>>, vector<256x768xbf16>
    %cst_14 = arith.constant dense<0.000000e+00> : vector<128x768xf32>
    %27 = tpu.matmul %25, %26, %cst_14 {dimension_numbers = #tpu.dot_dimension_numbers<[1], [0], [0], [1], [0, 0, 1, 1], [], []>} : vector<128x256xbf16>, vector<256x768xbf16>, vector<128x768xf32> -> vector<128x768xf32>
    %c0_15 = arith.constant 0 : index
    %c0_16 = arith.constant 0 : index
    %28 = vector.load %arg9[%c0_15, %c0_16] : memref<1x768xf32, #tpu.memory_space<vmem>>, vector<1x768xf32>
    %29 = vector.broadcast %28 : vector<1x768xf32> to vector<128x768xf32>
    %30 = arith.addf %27, %29 : vector<128x768xf32>
    %31 = vector.extract_strided_slice %30 {offsets = [0, 0], sizes = [128, 64], strides = [1, 1]} : vector<128x768xf32> to vector<128x64xf32>
    %c0_17 = arith.constant 0 : index
    %32 = memref.load %arg3[%c0_17] : memref<1xf32, #tpu.memory_space<smem>>
    %33 = arith.mulf %31, %31 : vector<128x64xf32>
    %cst_18 = arith.constant dense<0.000000e+00> : vector<128xf32>
    %34 = vector.multi_reduction <add>, %33, %cst_18 [1] : vector<128x64xf32> to vector<128xf32>
    %35 = vector.shape_cast %34 : vector<128xf32> to vector<128x1xf32>
    %cst_19 = arith.constant 1.000000e-24 : f32
    %36 = vector.broadcast %cst_19 : f32 to vector<128x1xf32>
    %37 = arith.maximumf %35, %36 : vector<128x1xf32>
    %38 = math.rsqrt %37 : vector<128x1xf32>
    %cst_20 = arith.constant 8.000000e+00 : f32
    %39 = vector.broadcast %cst_20 : f32 to vector<128x1xf32>
    %40 = arith.mulf %38, %39 : vector<128x1xf32>
    %41 = vector.broadcast %32 : f32 to vector<128x1xf32>
    %42 = arith.mulf %40, %41 : vector<128x1xf32>
    %43 = vector.broadcast %42 : vector<128x1xf32> to vector<128x64xf32>
    %44 = arith.mulf %31, %43 : vector<128x64xf32>
    %45 = vector.extract_strided_slice %30 {offsets = [0, 256], sizes = [128, 64], strides = [1, 1]} : vector<128x768xf32> to vector<128x64xf32>
    %c0_21 = arith.constant 0 : index
    %46 = memref.load %arg4[%c0_21] : memref<1xf32, #tpu.memory_space<smem>>
    %47 = arith.mulf %45, %45 : vector<128x64xf32>
    %cst_22 = arith.constant dense<0.000000e+00> : vector<128xf32>
    %48 = vector.multi_reduction <add>, %47, %cst_22 [1] : vector<128x64xf32> to vector<128xf32>
    %49 = vector.shape_cast %48 : vector<128xf32> to vector<128x1xf32>
    %cst_23 = arith.constant 1.000000e-24 : f32
    %50 = vector.broadcast %cst_23 : f32 to vector<128x1xf32>
    %51 = arith.maximumf %49, %50 : vector<128x1xf32>
    %52 = math.rsqrt %51 : vector<128x1xf32>
    %cst_24 = arith.constant 8.000000e+00 : f32
    %53 = vector.broadcast %cst_24 : f32 to vector<128x1xf32>
    %54 = arith.mulf %52, %53 : vector<128x1xf32>
    %55 = vector.broadcast %46 : f32 to vector<128x1xf32>
    %56 = arith.mulf %54, %55 : vector<128x1xf32>
    %57 = vector.broadcast %56 : vector<128x1xf32> to vector<128x64xf32>
    %58 = arith.mulf %45, %57 : vector<128x64xf32>
    %59 = vector.extract_strided_slice %30 {offsets = [0, 512], sizes = [128, 64], strides = [1, 1]} : vector<128x768xf32> to vector<128x64xf32>
    %60 = arith.truncf %44 : vector<128x64xf32> to vector<128x64xbf16>
    %c0_25 = arith.constant 0 : index
    %c0_26 = arith.constant 0 : index
    %c0_27 = arith.constant 0 : index
    %c0_28 = arith.constant 0 : index
    %61 = vector.load %arg10[%c0_25, %c0_26, %c0_27, %c0_28] : memref<1x4x128x64xbf16, #tpu.memory_space<vmem>>, vector<1x1x128x64xbf16>
    %62 = vector.shape_cast %61 : vector<1x1x128x64xbf16> to vector<128x64xbf16>
    %63 = vector.shape_cast %60 : vector<128x64xbf16> to vector<1x1x128x64xbf16>
    tpu.vector_store %arg10[%c0_25, %c0_26, %c0_27, %c0_28], %63 {strides = array<i32>} : memref<1x4x128x64xbf16, #tpu.memory_space<vmem>>, vector<1x1x128x64xbf16>,
    %64 = arith.truncf %58 : vector<128x64xf32> to vector<128x64xbf16>
    %c0_29 = arith.constant 0 : index
    %c0_30 = arith.constant 0 : index
    %c0_31 = arith.constant 0 : index
    %c0_32 = arith.constant 0 : index
    %65 = vector.load %arg11[%c0_29, %c0_30, %c0_31, %c0_32] : memref<1x4x128x64xbf16, #tpu.memory_space<vmem>>, vector<1x1x128x64xbf16>
    %66 = vector.shape_cast %65 : vector<1x1x128x64xbf16> to vector<128x64xbf16>
    %67 = vector.shape_cast %64 : vector<128x64xbf16> to vector<1x1x128x64xbf16>
    tpu.vector_store %arg11[%c0_29, %c0_30, %c0_31, %c0_32], %67 {strides = array<i32>} : memref<1x4x128x64xbf16, #tpu.memory_space<vmem>>, vector<1x1x128x64xbf16>,
    %68 = arith.truncf %59 : vector<128x64xf32> to vector<128x64xbf16>
    %c0_33 = arith.constant 0 : index
    %c0_34 = arith.constant 0 : index
    %c0_35 = arith.constant 0 : index
    %c0_36 = arith.constant 0 : index
    %69 = vector.load %arg12[%c0_33, %c0_34, %c0_35, %c0_36] : memref<1x4x128x64xbf16, #tpu.memory_space<vmem>>, vector<1x1x128x64xbf16>
    %70 = vector.shape_cast %69 : vector<1x1x128x64xbf16> to vector<128x64xbf16>
    %71 = vector.shape_cast %68 : vector<128x64xbf16> to vector<1x1x128x64xbf16>
    tpu.vector_store %arg12[%c0_33, %c0_34, %c0_35, %c0_36], %71 {strides = array<i32>} : memref<1x4x128x64xbf16, #tpu.memory_space<vmem>>, vector<1x1x128x64xbf16>,
    %72 = vector.extract_strided_slice %30 {offsets = [0, 64], sizes = [128, 64], strides = [1, 1]} : vector<128x768xf32> to vector<128x64xf32>
    %c0_37 = arith.constant 0 : index
    %73 = memref.load %arg3[%c0_37] : memref<1xf32, #tpu.memory_space<smem>>
    %74 = arith.mulf %72, %72 : vector<128x64xf32>
    %cst_38 = arith.constant dense<0.000000e+00> : vector<128xf32>
    %75 = vector.multi_reduction <add>, %74, %cst_38 [1] : vector<128x64xf32> to vector<128xf32>
    %76 = vector.shape_cast %75 : vector<128xf32> to vector<128x1xf32>
    %cst_39 = arith.constant 1.000000e-24 : f32
    %77 = vector.broadcast %cst_39 : f32 to vector<128x1xf32>
    %78 = arith.maximumf %76, %77 : vector<128x1xf32>
    %79 = math.rsqrt %78 : vector<128x1xf32>
    %cst_40 = arith.constant 8.000000e+00 : f32
    %80 = vector.broadcast %cst_40 : f32 to vector<128x1xf32>
    %81 = arith.mulf %79, %80 : vector<128x1xf32>
    %82 = vector.broadcast %73 : f32 to vector<128x1xf32>
    %83 = arith.mulf %81, %82 : vector<128x1xf32>
    %84 = vector.broadcast %83 : vector<128x1xf32> to vector<128x64xf32>
    %85 = arith.mulf %72, %84 : vector<128x64xf32>
    %86 = vector.extract_strided_slice %30 {offsets = [0, 320], sizes = [128, 64], strides = [1, 1]} : vector<128x768xf32> to vector<128x64xf32>
    %c0_41 = arith.constant 0 : index
    %87 = memref.load %arg4[%c0_41] : memref<1xf32, #tpu.memory_space<smem>>
    %88 = arith.mulf %86, %86 : vector<128x64xf32>
    %cst_42 = arith.constant dense<0.000000e+00> : vector<128xf32>
    %89 = vector.multi_reduction <add>, %88, %cst_42 [1] : vector<128x64xf32> to vector<128xf32>
    %90 = vector.shape_cast %89 : vector<128xf32> to vector<128x1xf32>
    %cst_43 = arith.constant 1.000000e-24 : f32
    %91 = vector.broadcast %cst_43 : f32 to vector<128x1xf32>
    %92 = arith.maximumf %90, %91 : vector<128x1xf32>
    %93 = math.rsqrt %92 : vector<128x1xf32>
    %cst_44 = arith.constant 8.000000e+00 : f32
    %94 = vector.broadcast %cst_44 : f32 to vector<128x1xf32>
    %95 = arith.mulf %93, %94 : vector<128x1xf32>
    %96 = vector.broadcast %87 : f32 to vector<128x1xf32>
    %97 = arith.mulf %95, %96 : vector<128x1xf32>
    %98 = vector.broadcast %97 : vector<128x1xf32> to vector<128x64xf32>
    %99 = arith.mulf %86, %98 : vector<128x64xf32>
    %100 = vector.extract_strided_slice %30 {offsets = [0, 576], sizes = [128, 64], strides = [1, 1]} : vector<128x768xf32> to vector<128x64xf32>
    %101 = arith.truncf %85 : vector<128x64xf32> to vector<128x64xbf16>
    %c0_45 = arith.constant 0 : index
    %c1 = arith.constant 1 : index
    %c0_46 = arith.constant 0 : index
    %c0_47 = arith.constant 0 : index
    %102 = vector.load %arg10[%c0_45, %c1, %c0_46, %c0_47] : memref<1x4x128x64xbf16, #tpu.memory_space<vmem>>, vector<1x1x128x64xbf16>
    %103 = vector.shape_cast %102 : vector<1x1x128x64xbf16> to vector<128x64xbf16>
    %104 = vector.shape_cast %101 : vector<128x64xbf16> to vector<1x1x128x64xbf16>
    tpu.vector_store %arg10[%c0_45, %c1, %c0_46, %c0_47], %104 {strides = array<i32>} : memref<1x4x128x64xbf16, #tpu.memory_space<vmem>>, vector<1x1x128x64xbf16>,
    %105 = arith.truncf %99 : vector<128x64xf32> to vector<128x64xbf16>
    %c0_48 = arith.constant 0 : index
    %c1_49 = arith.constant 1 : index
    %c0_50 = arith.constant 0 : index
    %c0_51 = arith.constant 0 : index
    %106 = vector.load %arg11[%c0_48, %c1_49, %c0_50, %c0_51] : memref<1x4x128x64xbf16, #tpu.memory_space<vmem>>, vector<1x1x128x64xbf16>
    %107 = vector.shape_cast %106 : vector<1x1x128x64xbf16> to vector<128x64xbf16>
    %108 = vector.shape_cast %105 : vector<128x64xbf16> to vector<1x1x128x64xbf16>
    tpu.vector_store %arg11[%c0_48, %c1_49, %c0_50, %c0_51], %108 {strides = array<i32>} : memref<1x4x128x64xbf16, #tpu.memory_space<vmem>>, vector<1x1x128x64xbf16>,
    %109 = arith.truncf %100 : vector<128x64xf32> to vector<128x64xbf16>
    %c0_52 = arith.constant 0 : index
    %c1_53 = arith.constant 1 : index
    %c0_54 = arith.constant 0 : index
    %c0_55 = arith.constant 0 : index
    %110 = vector.load %arg12[%c0_52, %c1_53, %c0_54, %c0_55] : memref<1x4x128x64xbf16, #tpu.memory_space<vmem>>, vector<1x1x128x64xbf16>
    %111 = vector.shape_cast %110 : vector<1x1x128x64xbf16> to vector<128x64xbf16>
    %112 = vector.shape_cast %109 : vector<128x64xbf16> to vector<1x1x128x64xbf16>
    tpu.vector_store %arg12[%c0_52, %c1_53, %c0_54, %c0_55], %112 {strides = array<i32>} : memref<1x4x128x64xbf16, #tpu.memory_space<vmem>>, vector<1x1x128x64xbf16>,
    %113 = vector.extract_strided_slice %30 {offsets = [0, 128], sizes = [128, 64], strides = [1, 1]} : vector<128x768xf32> to vector<128x64xf32>
    %c0_56 = arith.constant 0 : index
    %114 = memref.load %arg3[%c0_56] : memref<1xf32, #tpu.memory_space<smem>>
    %115 = arith.mulf %113, %113 : vector<128x64xf32>
    %cst_57 = arith.constant dense<0.000000e+00> : vector<128xf32>
    %116 = vector.multi_reduction <add>, %115, %cst_57 [1] : vector<128x64xf32> to vector<128xf32>
    %117 = vector.shape_cast %116 : vector<128xf32> to vector<128x1xf32>
    %cst_58 = arith.constant 1.000000e-24 : f32
    %118 = vector.broadcast %cst_58 : f32 to vector<128x1xf32>
    %119 = arith.maximumf %117, %118 : vector<128x1xf32>
    %120 = math.rsqrt %119 : vector<128x1xf32>
    %cst_59 = arith.constant 8.000000e+00 : f32
    %121 = vector.broadcast %cst_59 : f32 to vector<128x1xf32>
    %122 = arith.mulf %120, %121 : vector<128x1xf32>
    %123 = vector.broadcast %114 : f32 to vector<128x1xf32>
    %124 = arith.mulf %122, %123 : vector<128x1xf32>
    %125 = vector.broadcast %124 : vector<128x1xf32> to vector<128x64xf32>
    %126 = arith.mulf %113, %125 : vector<128x64xf32>
    %127 = vector.extract_strided_slice %30 {offsets = [0, 384], sizes = [128, 64], strides = [1, 1]} : vector<128x768xf32> to vector<128x64xf32>
    %c0_60 = arith.constant 0 : index
    %128 = memref.load %arg4[%c0_60] : memref<1xf32, #tpu.memory_space<smem>>
    %129 = arith.mulf %127, %127 : vector<128x64xf32>
    %cst_61 = arith.constant dense<0.000000e+00> : vector<128xf32>
    %130 = vector.multi_reduction <add>, %129, %cst_61 [1] : vector<128x64xf32> to vector<128xf32>
    %131 = vector.shape_cast %130 : vector<128xf32> to vector<128x1xf32>
    %cst_62 = arith.constant 1.000000e-24 : f32
    %132 = vector.broadcast %cst_62 : f32 to vector<128x1xf32>
    %133 = arith.maximumf %131, %132 : vector<128x1xf32>
    %134 = math.rsqrt %133 : vector<128x1xf32>
    %cst_63 = arith.constant 8.000000e+00 : f32
    %135 = vector.broadcast %cst_63 : f32 to vector<128x1xf32>
    %136 = arith.mulf %134, %135 : vector<128x1xf32>
    %137 = vector.broadcast %128 : f32 to vector<128x1xf32>
    %138 = arith.mulf %136, %137 : vector<128x1xf32>
    %139 = vector.broadcast %138 : vector<128x1xf32> to vector<128x64xf32>
    %140 = arith.mulf %127, %139 : vector<128x64xf32>
    %141 = vector.extract_strided_slice %30 {offsets = [0, 640], sizes = [128, 64], strides = [1, 1]} : vector<128x768xf32> to vector<128x64xf32>
    %142 = arith.truncf %126 : vector<128x64xf32> to vector<128x64xbf16>
    %c0_64 = arith.constant 0 : index
    %c2 = arith.constant 2 : index
    %c0_65 = arith.constant 0 : index
    %c0_66 = arith.constant 0 : index
    %143 = vector.load %arg10[%c0_64, %c2, %c0_65, %c0_66] : memref<1x4x128x64xbf16, #tpu.memory_space<vmem>>, vector<1x1x128x64xbf16>
    %144 = vector.shape_cast %143 : vector<1x1x128x64xbf16> to vector<128x64xbf16>
    %145 = vector.shape_cast %142 : vector<128x64xbf16> to vector<1x1x128x64xbf16>
    tpu.vector_store %arg10[%c0_64, %c2, %c0_65, %c0_66], %145 {strides = array<i32>} : memref<1x4x128x64xbf16, #tpu.memory_space<vmem>>, vector<1x1x128x64xbf16>,
    %146 = arith.truncf %140 : vector<128x64xf32> to vector<128x64xbf16>
    %c0_67 = arith.constant 0 : index
    %c2_68 = arith.constant 2 : index
    %c0_69 = arith.constant 0 : index
    %c0_70 = arith.constant 0 : index
    %147 = vector.load %arg11[%c0_67, %c2_68, %c0_69, %c0_70] : memref<1x4x128x64xbf16, #tpu.memory_space<vmem>>, vector<1x1x128x64xbf16>
    %148 = vector.shape_cast %147 : vector<1x1x128x64xbf16> to vector<128x64xbf16>
    %149 = vector.shape_cast %146 : vector<128x64xbf16> to vector<1x1x128x64xbf16>
    tpu.vector_store %arg11[%c0_67, %c2_68, %c0_69, %c0_70], %149 {strides = array<i32>} : memref<1x4x128x64xbf16, #tpu.memory_space<vmem>>, vector<1x1x128x64xbf16>,
    %150 = arith.truncf %141 : vector<128x64xf32> to vector<128x64xbf16>
    %c0_71 = arith.constant 0 : index
    %c2_72 = arith.constant 2 : index
    %c0_73 = arith.constant 0 : index
    %c0_74 = arith.constant 0 : index
    %151 = vector.load %arg12[%c0_71, %c2_72, %c0_73, %c0_74] : memref<1x4x128x64xbf16, #tpu.memory_space<vmem>>, vector<1x1x128x64xbf16>
    %152 = vector.shape_cast %151 : vector<1x1x128x64xbf16> to vector<128x64xbf16>
    %153 = vector.shape_cast %150 : vector<128x64xbf16> to vector<1x1x128x64xbf16>
    tpu.vector_store %arg12[%c0_71, %c2_72, %c0_73, %c0_74], %153 {strides = array<i32>} : memref<1x4x128x64xbf16, #tpu.memory_space<vmem>>, vector<1x1x128x64xbf16>,
    %154 = vector.extract_strided_slice %30 {offsets = [0, 192], sizes = [128, 64], strides = [1, 1]} : vector<128x768xf32> to vector<128x64xf32>
    %c0_75 = arith.constant 0 : index
    %155 = memref.load %arg3[%c0_75] : memref<1xf32, #tpu.memory_space<smem>>
    %156 = arith.mulf %154, %154 : vector<128x64xf32>
    %cst_76 = arith.constant dense<0.000000e+00> : vector<128xf32>
    %157 = vector.multi_reduction <add>, %156, %cst_76 [1] : vector<128x64xf32> to vector<128xf32>
    %158 = vector.shape_cast %157 : vector<128xf32> to vector<128x1xf32>
    %cst_77 = arith.constant 1.000000e-24 : f32
    %159 = vector.broadcast %cst_77 : f32 to vector<128x1xf32>
    %160 = arith.maximumf %158, %159 : vector<128x1xf32>
    %161 = math.rsqrt %160 : vector<128x1xf32>
    %cst_78 = arith.constant 8.000000e+00 : f32
    %162 = vector.broadcast %cst_78 : f32 to vector<128x1xf32>
    %163 = arith.mulf %161, %162 : vector<128x1xf32>
    %164 = vector.broadcast %155 : f32 to vector<128x1xf32>
    %165 = arith.mulf %163, %164 : vector<128x1xf32>
    %166 = vector.broadcast %165 : vector<128x1xf32> to vector<128x64xf32>
    %167 = arith.mulf %154, %166 : vector<128x64xf32>
    %168 = vector.extract_strided_slice %30 {offsets = [0, 448], sizes = [128, 64], strides = [1, 1]} : vector<128x768xf32> to vector<128x64xf32>
    %c0_79 = arith.constant 0 : index
    %169 = memref.load %arg4[%c0_79] : memref<1xf32, #tpu.memory_space<smem>>
    %170 = arith.mulf %168, %168 : vector<128x64xf32>
    %cst_80 = arith.constant dense<0.000000e+00> : vector<128xf32>
    %171 = vector.multi_reduction <add>, %170, %cst_80 [1] : vector<128x64xf32> to vector<128xf32>
    %172 = vector.shape_cast %171 : vector<128xf32> to vector<128x1xf32>
    %cst_81 = arith.constant 1.000000e-24 : f32
    %173 = vector.broadcast %cst_81 : f32 to vector<128x1xf32>
    %174 = arith.maximumf %172, %173 : vector<128x1xf32>
    %175 = math.rsqrt %174 : vector<128x1xf32>
    %cst_82 = arith.constant 8.000000e+00 : f32
    %176 = vector.broadcast %cst_82 : f32 to vector<128x1xf32>
    %177 = arith.mulf %175, %176 : vector<128x1xf32>
    %178 = vector.broadcast %169 : f32 to vector<128x1xf32>
    %179 = arith.mulf %177, %178 : vector<128x1xf32>
    %180 = vector.broadcast %179 : vector<128x1xf32> to vector<128x64xf32>
    %181 = arith.mulf %168, %180 : vector<128x64xf32>
    %182 = vector.extract_strided_slice %30 {offsets = [0, 704], sizes = [128, 64], strides = [1, 1]} : vector<128x768xf32> to vector<128x64xf32>
    %183 = arith.truncf %167 : vector<128x64xf32> to vector<128x64xbf16>
    %c0_83 = arith.constant 0 : index
    %c3 = arith.constant 3 : index
    %c0_84 = arith.constant 0 : index
    %c0_85 = arith.constant 0 : index
    %184 = vector.load %arg10[%c0_83, %c3, %c0_84, %c0_85] : memref<1x4x128x64xbf16, #tpu.memory_space<vmem>>, vector<1x1x128x64xbf16>
    %185 = vector.shape_cast %184 : vector<1x1x128x64xbf16> to vector<128x64xbf16>
    %186 = vector.shape_cast %183 : vector<128x64xbf16> to vector<1x1x128x64xbf16>
    tpu.vector_store %arg10[%c0_83, %c3, %c0_84, %c0_85], %186 {strides = array<i32>} : memref<1x4x128x64xbf16, #tpu.memory_space<vmem>>, vector<1x1x128x64xbf16>,
    %187 = arith.truncf %181 : vector<128x64xf32> to vector<128x64xbf16>
    %c0_86 = arith.constant 0 : index
    %c3_87 = arith.constant 3 : index
    %c0_88 = arith.constant 0 : index
    %c0_89 = arith.constant 0 : index
    %188 = vector.load %arg11[%c0_86, %c3_87, %c0_88, %c0_89] : memref<1x4x128x64xbf16, #tpu.memory_space<vmem>>, vector<1x1x128x64xbf16>
    %189 = vector.shape_cast %188 : vector<1x1x128x64xbf16> to vector<128x64xbf16>
    %190 = vector.shape_cast %187 : vector<128x64xbf16> to vector<1x1x128x64xbf16>
    tpu.vector_store %arg11[%c0_86, %c3_87, %c0_88, %c0_89], %190 {strides = array<i32>} : memref<1x4x128x64xbf16, #tpu.memory_space<vmem>>, vector<1x1x128x64xbf16>,
    %191 = arith.truncf %182 : vector<128x64xf32> to vector<128x64xbf16>
    %c0_90 = arith.constant 0 : index
    %c3_91 = arith.constant 3 : index
    %c0_92 = arith.constant 0 : index
    %c0_93 = arith.constant 0 : index
    %192 = vector.load %arg12[%c0_90, %c3_91, %c0_92, %c0_93] : memref<1x4x128x64xbf16, #tpu.memory_space<vmem>>, vector<1x1x128x64xbf16>
    %193 = vector.shape_cast %192 : vector<1x1x128x64xbf16> to vector<128x64xbf16>
    %194 = vector.shape_cast %191 : vector<128x64xbf16> to vector<1x1x128x64xbf16>
    tpu.vector_store %arg12[%c0_90, %c3_91, %c0_92, %c0_93], %194 {strides = array<i32>} : memref<1x4x128x64xbf16, #tpu.memory_space<vmem>>, vector<1x1x128x64xbf16>,
    return
  }
  func.func @transform_0(%arg0: i32, %arg1: i32) -> i32 {
    %c0_i32 = arith.constant 0 : i32
    %c0_i32_0 = arith.constant 0 : i32
    return %c0_i32 : i32
  }
  func.func @transform_1(%arg0: i32, %arg1: i32) -> i32 {
    %c0_i32 = arith.constant 0 : i32
    %c0_i32_0 = arith.constant 0 : i32
    return %c0_i32 : i32
  }
  func.func @transform_2(%arg0: i32, %arg1: i32) -> i32 {
    %c0_i32 = arith.constant 0 : i32
    %c0_i32_0 = arith.constant 0 : i32
    return %c0_i32 : i32
  }
  func.func @transform_3(%arg0: i32, %arg1: i32) -> (i32, i32, i32) {
    %c0_i32 = arith.constant 0 : i32
    %c0_i32_0 = arith.constant 0 : i32
    return %arg0, %arg1, %c0_i32 : i32, i32, i32
  }
  func.func @transform_4(%arg0: i32, %arg1: i32) -> (i32, i32, i32) {
    %c0_i32 = arith.constant 0 : i32
    %c0_i32_0 = arith.constant 0 : i32
    %c0_i32_1 = arith.constant 0 : i32
    return %arg0, %c0_i32, %c0_i32_0 : i32, i32, i32
  }
  func.func @transform_5(%arg0: i32, %arg1: i32) -> (i32, i32, i32) {
    %c0_i32 = arith.constant 0 : i32
    %c0_i32_0 = arith.constant 0 : i32
    %c0_i32_1 = arith.constant 0 : i32
    return %arg0, %c0_i32, %c0_i32_0 : i32, i32, i32
  }
  func.func @transform_6(%arg0: i32, %arg1: i32) -> (i32, i32) {
    %c0_i32 = arith.constant 0 : i32
    %c0_i32_0 = arith.constant 0 : i32
    %c0_i32_1 = arith.constant 0 : i32
    return %c0_i32, %c0_i32_0 : i32, i32
  }
  func.func @transform_7(%arg0: i32, %arg1: i32) -> (i32, i32) {
    %c0_i32 = arith.constant 0 : i32
    %c0_i32_0 = arith.constant 0 : i32
    %c0_i32_1 = arith.constant 0 : i32
    return %c0_i32, %c0_i32_0 : i32, i32
  }
  func.func @transform_8(%arg0: i32, %arg1: i32) -> (i32, i32, i32, i32) {
    %c0_i32 = arith.constant 0 : i32
    %c0_i32_0 = arith.constant 0 : i32
    %c0_i32_1 = arith.constant 0 : i32
    return %arg0, %c0_i32, %arg1, %c0_i32_0 : i32, i32, i32, i32
  }
  func.func @transform_9(%arg0: i32, %arg1: i32) -> (i32, i32, i32, i32) {
    %c0_i32 = arith.constant 0 : i32
    %c0_i32_0 = arith.constant 0 : i32
    %c0_i32_1 = arith.constant 0 : i32
    return %arg0, %c0_i32, %arg1, %c0_i32_0 : i32, i32, i32, i32
  }
  func.func @transform_10(%arg0: i32, %arg1: i32) -> (i32, i32, i32, i32) {
    %c0_i32 = arith.constant 0 : i32
    %c0_i32_0 = arith.constant 0 : i32
    %c0_i32_1 = arith.constant 0 : i32
    return %arg0, %c0_i32, %arg1, %c0_i32_0 : i32, i32, i32, i32
  }
}

</mosaic_0001>

<bundles_post_ra>
// kernel: tpu_custom_call.1
= control target key start
LH: loop header
LB: loop body
LE: loop exit
PB: predicated region body
PF: predicated region fallthrough
CT: control target
= control target key end

     0   :  { %s9258_s0 = inlined_call_operand.<no memory space> [shape: f32[1], index: 0, kind: input, shape index: {}]   ;;  %s9259_s1 = inlined_call_operand.<no memory space> [shape: f32[1], index: 1, kind: input, shape index: {}]   ;;  %s9260_s2 = inlined_call_operand.<no memory space> [shape: f32[1], index: 2, kind: input, shape index: {}]   ;;  %s9261_s3 = inlined_call_operand.hbm [shape: f32[2,256,256], index: 3, kind: input, shape index: {}]   ;;  %s9262_s4 = inlined_call_operand.vmem [shape: f32[2,1,256], index: 4, kind: input, shape index: {}]   ;;  %s9263_s5 = inlined_call_operand.vmem [shape: f32[2,1,256], index: 5, kind: input, shape index: {}]   ;;  %s9264_s6 = inlined_call_operand.hbm [shape: bf16[256,768], index: 6, kind: input, shape index: {}]   ;;  %s9265_s7 = inlined_call_operand.vmem [shape: f32[1,768], index: 7, kind: input, shape index: {}]   ;;  %s9266_s8 = inlined_call_operand.vmem [shape: bf16[2,4,256,64], index: 8, kind: output, shape index: {0}]   ;;  %s9267_s9 = inlined_call_operand.vmem [shape: bf16[2,4,256,64], index: 9, kind: output, shape index: {1}]   ;;  %s9268_s10 = inlined_call_operand.vmem [shape: bf16[2,4,256,64], index: 10, kind: output, shape index: {2}]  }
   0x1   :  { %9358 = sst [smem:[#allocation125_spill]] %s9264_s6 }
   0x2   :  { %9359 = sst [smem:[#allocation126_spill]] %s9266_s8 }
   0x3   :  { %9360 = sst [smem:[#allocation127_spill]] %s9267_s9 }
   0x4   :  { %9361 = sst [smem:[#allocation128_spill]] %s9268_s10 }
   0x5   :  { %16 = sst [smem:[#allocation2]] %s9258_s0 }
   0x6   :  { %17 = sst [smem:[#allocation3]] %s9259_s1 }
   0x7   :  { %18 = sst [smem:[#allocation4]] %s9260_s2 }
   0x8   :  { %19 = vsyncpa [#allocation6], 0 }
   0x9   :  { %21 = vsyncpa [#allocation6 + $0x1], 0 }
   0xa   :  { %22 = vsyncpa [#allocation8], 0  ;;  %s6584_s19 = smov 0   ;;  %s6586_s20 = smov 0  }
   0xb   :  { %s6588_s21 = smov 0   ;;  %s6590_s22 = smov 0  }
   0xc   :  { %s6592_s0 = smov 0   ;;  %s6594_s23 = smov 0  }
   0xd   :  { %s6596_s1 = smov 0   ;;  %s6598_s24 = smov 0  }
   0xe LB: > { %9362 = sst [smem:[#allocation14_spill]] %s6495_s22  ;;  %s5239_s2 = sadd.s32 4294967295, %s6511_s24   ;;  %s6511_s24 = sphi %s6598_s24, %s28_s24   ;;  %s6507_s1 = sphi %s6596_s1, %s9637_s1   ;;  %s6503_s23 = sphi %s6594_s23, %s9636_s23   ;;  %s6499_s0 = sphi %s6592_s0, %s9635_s0   ;;  %s6495_s22 = sphi %s6590_s22, %s9634_s22   ;;  %s6491_s21 = sphi %s6588_s21, %s9633_s21   ;;  %s6487_s20 = sphi %s6586_s20, %s9632_s20   ;;  %s6483_s19 = sphi %s6584_s19, %s9631_s19  }
   0xf   : > { %p125_p0 = scmp.ne.s32.totalorder %s6487_s20, %s6483_s19  ;;  %p6624_p1 = scmp.eq.s32.totalorder %s5239_s2, 0 }
  0x10   : > { %p6628_p2 = scmp.eq.s32.totalorder %s5239_s2, 3  ;;  %p5241_p3 = scmp.ge.s32.totalorder %s6511_s24, 1 }
  0x11   : > { %s9363_s25 = scalar_select %p6624_p1, 1, 0 }
  0x12   : > { %s9364_s26 = scalar_select %p6628_p2, 1, 0 }
  0x13   : > { %p314_p4 = scmp.lt.s32.totalorder %s6511_s24, 5  ;;  %p6636_p5 = por %p6624_p1, %p125_p0 }
  0x14   : > { %s6513_s29 = smov [#allocation7]   ;;  %s9368_s6 = sld [smem:[#allocation125_spill]] }
  0x15   : > { %s9365_s27 = scalar_select %p6636_p5, 1, 0 }
  0x16   : > { %p6640_p6 = pnand %p5241_p3, %p314_p4  ;;  %s335_s30 = sshll.u32 %s6513_s29, 4  ;;  %s336_s30 = int_to_ptr.vmem [resolvable:$true] %s335_s30 }
  0x18   : > { %s9366_s28 = scalar_select %p6640_p6, 1, 0 }
  0x19   : > { %p5870_p7 = pneg %p6640_p6 }
  0x1a   : > { %s6383_s14 = scalar_lea.hbm %s9368_s6, 12288 }
  0x1b   : > { %p6648_p8 = pnand %p5870_p7, %p6624_p1  ;;  %p6384_p9 = scmp.ne.s32.totalorder %s9368_s6, %s6383_s14 }
  0x1c   : > { %p6390_p13 = scmp.lt.u32.totalorder %s6383_s14, %s9368_s6 }
  0x1d   : > { %p6385_p10 = pneg %p6648_p8 }
  0x1f   : > { %p6386_p11 = pnand %p6385_p10, %p6384_p9 }
  0x21   : > { %p6387_p12 = pneg %p6386_p11 }
  0x23   : > { %p6392_p0 = pnand %p6390_p13, %p6387_p12 }
  0x25   : > { %6395 = shalt.err (!%p6392_p0)
}
  0x26   : > { %s6396_s19 = scalar_lea.vmem %s336_s30, 12288  ;;  %p6404_p1 = scmp.lt.s32.totalorder %s336_s30, %s336_s30 }
  0x27   : > { %p6397_p3 = scmp.ne.s32.totalorder %s336_s30, %s6396_s19  ;;  %p6405_p5 = scmp.lt.s32.totalorder %s6396_s19, %s6396_s19 }
  0x29   : > { %p6399_p4 = pnand %p6397_p3, %p6385_p10  ;;  %p6406_p6 = por %p6405_p5, %p6404_p1 }
  0x2b   : > { %p6400_p7 = pneg %p6399_p4 }
  0x2d   : > { %p6407_p2 = pnand %p6406_p6, %p6400_p7 }
  0x2f   : > { %6410 = shalt.err (!%p6407_p2)
}
  0x30   : > { %s6514_s2 = smov 384   ;;  %s6515_s29 = smov 24  }
  0x31   : > { %5873 = dma.hbm_to_vmem [thread:$0]  (!%p6648_p8), %s9368_s6, 12288, %s336_s30, [#allocation8], %s6514_s2, %s6514_s2, %s6515_s29  }
  0x32   : > { %s37_s14 = sadd.s32 1, %s6503_s23  ;;  %s40_s15 = sadd.s32 1, %s6507_s1 }
  0x33   : > { %p38_p1 = scmp.ge.s32.totalorder %s37_s14, 2  ;;  %s112_s16 = sadd.s32 1, %s6491_s21 }
  0x34   : > { %p119_p2 = scmp.ne.s32.totalorder %s6491_s21, %s6487_s20  ;;  %p120_p5 = scmp.eq.s32.totalorder %s6511_s24, 0 }
  0x35   : > { %s9639_s14 = smov (%p38_p1, %s37_s14), 0  ;;  %s9641_s15 = smov (!%p38_p1, %s40_s15), %s6507_s1 }
  0x36   : > { %9369 = sst [smem:[#allocation15_spill]] %s9639_s14  ;;  %s108_s17 = ssub.s32 %s6503_s23, %s9639_s14 }
  0x37   : > { %p6679_p6 = por %p120_p5, %p119_p2  ;;  %p42_p8 = scmp.ge.s32.totalorder %s9641_s15, 2 }
  0x38   : > { %p9371_p9 = scmp.ne.s32.totalorder %s9364_s26, 0  ;;  %p5879_p11 = scmp.lt.s32.totalorder %s6511_s24, 4 }
  0x39   : > { %s352_s18 = sand.u32 1, %s6491_s21   ;;  %s9643_s15 = smov (%p42_p8, %s9641_s15), 0 }
  0x3a   : > { %p6685_p10 = por %p9371_p9, %p119_p2  ;;  %s5244_s19 = sshll.u32 %s352_s18, 8 }
  0x3b   : > { %s107_s2 = ssub.s32 %s6507_s1, %s9643_s15  ;;  %s5671_s12 = sshll.u32 %s6503_s23, 5 }
  0x3c   : > { %s9372_s30 = scalar_select %p6685_p10, 1, 0 }
  0x3d   : > { %s109_s29 = sor.u32 %s108_s17, %s107_s2  ;;  %s5247_s13 = sshll.u32 %s6507_s1, 6 }
  0x3e   : > { %9373 = sst [smem:[#allocation16_spill]] %s9372_s30  ;;  %p110_p12 = scmp.eq.s32.totalorder %s109_s29, 0 }
  0x3f   : > { %s363_s6 = sadd.s32 %s5671_s12, %s5247_s13  ;;  %s356_s14 = scalar_lea.vmem [#allocation5], %s5244_s19 }
  0x40   : > { %s366_s26 = sshll.u32 %s356_s14, 4  ;;  %s5248_s9 = sshll.u32 %s363_s6, 7  ;;  %s6700_s26 = int_to_ptr.vmem [resolvable:$true] %s366_s26 }
  0x41   : > { %s6698_s10 = scalar_select %p110_p12, %s6491_s21, %s112_s16  }
  0x42   : > { %s6705_s30 = scalar_lea.hbm %s9261_s3, %s5248_s9  ;;  %p6711_p13 = pnand %p5879_p11, %p6679_p6 }
  0x43   : > { %s6715_s6 = scalar_lea.sflag [#allocation6], %s352_s18  ;;  %s6411_s14 = scalar_lea.hbm %s6705_s30, 4096 }
  0x44   : > { %p6412_p0 = scmp.ne.s32.totalorder %s6705_s30, %s6411_s14  ;;  %p6413_p3 = pneg %p6711_p13 }
  0x45   : > { %s6416_s22 = scalar_lea.hbm %s9261_s3, 16384  ;;  %p6417_p1 = scmp.lt.u32.totalorder %s6705_s30, %s9261_s3 }
  0x46   : > { %p6414_p4 = pnand %p6413_p3, %p6412_p0  ;;  %p6418_p2 = scmp.lt.u32.totalorder %s6416_s22, %s6411_s14 }
  0x47   : > { %p6420_p6 = scmp.lt.u32.totalorder %s6411_s14, %s6705_s30 }
  0x48   : > { %p6415_p7 = pneg %p6414_p4  ;;  %p6419_p5 = por %p6418_p2, %p6417_p1 }
  0x4a   : > { %p6421_p8 = por %p6420_p6, %p6419_p5 }
  0x4c   : > { %p6422_p9 = pnand %p6421_p8, %p6415_p7 }
  0x4e   : > { %6425 = shalt.err (!%p6422_p9)
}
  0x4f   : > { %s6426_s18 = scalar_lea.vmem %s6700_s26, 4096  ;;  %s6516_s19 = smov [#allocation5]  }
  0x50   : > { %p6427_p11 = scmp.ne.s32.totalorder %s6700_s26, %s6426_s18  ;;  %s6431_s2 = sshll.u32 %s6516_s19, 4  ;;  %s6432_s2 = int_to_ptr.vmem [resolvable:$false] %s6431_s2 }
  0x51   : > { %s6433_s29 = scalar_lea.vmem %s6432_s2, 8192  ;;  %p6434_p4 = scmp.lt.s32.totalorder %s6700_s26, %s6432_s2 }
  0x52   : > { %p6429_p12 = pnand %p6427_p11, %p6413_p3  ;;  %p6435_p1 = scmp.lt.s32.totalorder %s6433_s29, %s6426_s18 }
  0x54   : > { %p6430_p0 = pneg %p6429_p12  ;;  %p6436_p2 = por %p6435_p1, %p6434_p4 }
  0x56   : > { %p6437_p5 = pnand %p6436_p2, %p6430_p0 }
  0x58   : > { %6440 = shalt.err (!%p6437_p5)
}
  0x59   : > { %s6517_s12 = smov 256   ;;  %s6518_s13 = smov 16  }
  0x5a   : > { %5877 = dma.hbm_to_vmem [thread:$0]  (!%p6711_p13), %s6705_s30, 4096, %s6700_s26, %s6715_s6, %s6517_s12, %s6517_s12, %s6518_s13  }
  0x5b   : > { %p9375_p3 = scmp.ne.s32.totalorder %s9366_s28, 0 }
  0x5d   : > { %392 = sbr.rel (%p9375_p3) target bundleno = 2220 (0x8ac), region = 52 }
  0x64   : > { %s394_s14 = sand.u32 1, %s6487_s20   ;;  %p9376_p7 = scmp.ne.s32.totalorder %s9365_s27, 0 }
  0x65   : > { %s6746_s8 = sshll.u32 %s394_s14, 8  ;;  %s395_s9 = scalar_lea.sflag [#allocation6], %s394_s14 }
  0x66   : > { %s6749_s22 = scalar_lea.vmem [#allocation5], %s6746_s8 }
  0x67   : > { %6474 = dma.done.wait (%p9376_p7), %s395_s9, 4096  }
  0x68   : > { %6476 = vsyncadd (%p9376_p7), %s395_s9, 4294963200  ;;  %p9377_p6 = scmp.ne.s32.totalorder %s9363_s25, 0 }
  0x6a   : > { %6478 = dma.done.wait (%p9377_p6), [#allocation8], 12288  }
  0x6b   : > { %6480 = vsyncadd (%p9377_p6), [#allocation8], 4294955008  ;;  %v6760_v0 = vld [vmem:[%s6749_s22] sm:$0xff]  ;;  %v6763_v1 = vld [vmem:[%s6749_s22 + $0x8] sm:$0xff]  ;;  %p455_p13 = scmp.lt.s32.totalorder %s6499_s0, 1  ;;  %s498_s27 = sld [smem:[#allocation2]] }
  0x6c   : > { %v6766_v2 = vld [vmem:[%s6749_s22 + $0x10] sm:$0xff]  ;;  %v499_v3 = vmul.f32 %v6760_v0, %v6760_v0  ;;  %v500_v4 = vmul.f32 %v6763_v1, %v6763_v1  ;;  %v6773_v5 = vld [vmem:[%s6749_s22 + $0x18] sm:$0xff]  ;;  %v6778_v7 = vld [vmem:[%s6749_s22 + $0x20] sm:$0xff]  ;;  %s6519_s2 = smov 64   ;;  %vm1745_vm0 = vcmask 523264   ;;  %vm2085_vm1 = vcmask 519168  }
  0x6d   : > { %v501_v6 = vmul.f32 %v6766_v2, %v6766_v2  ;;  %v6781_v8 = vld [vmem:[%s6749_s22 + $0x28] sm:$0xff]  ;;  %v502_v9 = vmul.f32 %v6773_v5, %v6773_v5  ;;  %v503_v10 = vmul.f32 %v6778_v7, %v6778_v7  ;;  %v6790_v12 = vld [vmem:[%s6749_s22 + $0x30] sm:$0xff]  ;;  %v6793_v13 = vld [vmem:[%s6749_s22 + $0x38] sm:$0xff]  ;;  %s6921_s25 = scalar_select %p455_p13, %s6499_s0, 1 }
  0x6e   : > { %v504_v11 = vmul.f32 %v6781_v8, %v6781_v8  ;;  %v6796_v14 = vld [vmem:[%s6749_s22 + $0x50] sm:$0xff]  ;;  %v531_v15 = vadd.f32 %v500_v4, %v499_v3  ;;  %v505_v16 = vmul.f32 %v6790_v12, %v6790_v12  ;;  %v506_v17 = vmul.f32 %v6793_v13, %v6793_v13  ;;  %v6803_v18 = vld [vmem:[%s6749_s22 + $0x58] sm:$0xff]  ;;  %v6806_v19 = vld [vmem:[%s6749_s22 + $0x40] sm:$0xff]  ;;  %s7315_s29 = scalar_lea.vmem [#allocation11], %s6746_s8  ;;  %s1728_s12 = sld [smem:[#allocation3]] }
  0x6f   : > { %v6809_v20 = vld [vmem:[%s6749_s22 + $0x48] sm:$0xff]  ;;  %v534_v22 = vadd.f32 %v502_v9, %v501_v6  ;;  %v507_v23 = vmul.f32 %v6806_v19, %v6806_v19  ;;  %v509_v26 = vmul.f32 %v6796_v14, %v6796_v14  ;;  %v510_v27 = vmul.f32 %v6803_v18, %v6803_v18  ;;  %v6820_v28 = vld [vmem:[%s6749_s22 + $0x60] sm:$0xff]  ;;  %v6826_v30 = vld [vmem:[%s6749_s22 + $0x70] sm:$0xff]  ;;  %s5255_s28 = sshll.u32 %s6921_s25, 1  ;;  %s1875_s13 = sld [smem:[#allocation4]] }
  0x70   : > { %v537_v21 = vadd.f32 %v504_v11, %v503_v10  ;;  %532 = vadd.xlane.f32.xlu0 %v531_v15  ;;  %v508_v24 = vmul.f32 %v6809_v20, %v6809_v20  ;;  %v540_v25 = vadd.f32 %v506_v17, %v505_v16  ;;  %v6823_v29 = vld [vmem:[%s6749_s22 + $0x68] sm:$0xff]  ;;  %v6829_v31 = vld [vmem:[%s6749_s22 + $0x78] sm:$0xff]  ;;  %v511_v33 = vmul.f32 %v6820_v28, %v6820_v28  ;;  %v6836_v35 = vld [vmem:[%s6749_s22 + $0x90] sm:$0xff]  ;;  %s458_s17 = scalar_lea.vmem %s9262_s4, %s5255_s28  ;;  %s462_s11 = scalar_lea.vmem %s9263_s5, %s5255_s28 }
  0x71   : > { %v512_v34 = vmul.f32 %v6823_v29, %v6823_v29  ;;  %v6839_v36 = vld [vmem:[%s6749_s22 + $0x98] sm:$0xff]  ;;  %v546_v37 = vadd.f32 %v510_v27, %v509_v26  ;;  %v513_v38 = vmul.f32 %v6826_v30, %v6826_v30  ;;  %v514_v39 = vmul.f32 %v6829_v31, %v6829_v31  ;;  %v6846_v40 = vld [vmem:[%s6749_s22 + $0x80] sm:$0xff]  ;;  %v6849_v41 = vld [vmem:[%s6749_s22 + $0x88] sm:$0xff]  ;;  %s7481_s14 = scalar_lea.vmem [#allocation9], %s6746_s8  ;;  %s7490_s9 = scalar_lea.vmem [#allocation10], %s6746_s8 }
  0x72   : > { %538 = vadd.xlane.f32.xlu1 %v537_v21  ;;  %v543_v32 = vadd.f32 %v508_v24, %v507_v23  ;;  %v5951_v42 = vld [vmem:[#allocation7 + $0x4] ss:$24 sps:$4 sm:$0xff]   ;;  %v6855_v44 = vld [vmem:[%s6749_s22 + $0xa8] sm:$0xff]  ;;  %v5955_v46 = vld [vmem:[#allocation7] ss:$24 sps:$4 sm:$0xff]   ;;  %v515_v48 = vmul.f32 %v6846_v40, %v6846_v40  ;;  %v516_v49 = vmul.f32 %v6849_v41, %v6849_v41  ;;  %v517_v54 = vmul.f32 %v6836_v35, %v6836_v35  ;;  %s2262_s8 = sld [smem:[#allocation3]] }
  0x73   : > { %v6852_v43 = vld [vmem:[%s6749_s22 + $0xa0] sm:$0xff]  ;;  %v549_v47 = vadd.f32 %v512_v34, %v511_v33  ;;  %v6862_v50 = vld [vmem:[%s6749_s22 + $0xb0] sm:$0xff]  ;;  %v6865_v51 = vld [vmem:[%s6749_s22 + $0xb8] sm:$0xff]  ;;  %1389 = vmatprep.subr.bf16.mxu0 %v5951_v42  ;;  %v552_v53 = vadd.f32 %v514_v39, %v513_v38  ;;  %v518_v55 = vmul.f32 %v6839_v36, %v6839_v36  ;;  %v520_v3 = vmul.f32 %v6855_v44, %v6855_v44  ;;  %s5661_s30 = sshll.u32 (%p6685_p10), %s6499_s0, 7 }
  0x74   : > { %535 = vadd.xlane.f32.xlu0 %v534_v22  ;;  %v5953_v45 = vld [vmem:[#allocation7 + $0xc] ss:$24 sps:$4 sm:$0xff]   ;;  %v5956_v52 = vld [vmem:[#allocation7 + $0x8] ss:$24 sps:$4 sm:$0xff]   ;;  %1390 = vmatpush1.bf16.msra.mxu0 %v5955_v46  ;;  %v5959_v57 = vld [vmem:[#allocation7 + $0x3c] ss:$24 sps:$4 sm:$0xff]   ;;  %v555_v62 = vadd.f32 %v516_v49, %v515_v48  ;;  %v519_v63 = vmul.f32 %v6852_v43, %v6852_v43  ;;  %v521_v11 = vmul.f32 %v6862_v50, %v6862_v50 }
  0x75   : > { %1502 = vmatprep.subr.bf16.mxu1 %v5953_v45  ;;  %v5957_v56 = vld [vmem:[#allocation7 + $0x34] ss:$24 sps:$4 sm:$0xff]   ;;  %v5961_v58 = vld [vmem:[#allocation7 + $0x30] ss:$24 sps:$4 sm:$0xff]   ;;  %v6872_v60 = vld [vmem:[%s6749_s22 + $0xc0] sm:$0xff]  ;;  %v558_v10 = vadd.f32 %v518_v55, %v517_v54  ;;  %v522_v15 = vmul.f32 %v6865_v51, %v6865_v51 }
  0x76   : > { %541 = vadd.xlane.f32.xlu1 %v540_v25  ;;  %1503 = vmatpush1.bf16.msra.mxu1 %v5956_v52  ;;  %v5962_v59 = vld [vmem:[#allocation7 + $0x38] ss:$24 sps:$4 sm:$0xff]   ;;  %v5963_v61 = vld [vmem:[#allocation7 + $0x64] ss:$24 sps:$4 sm:$0xff]   ;;  %v6889_v16 = vld [vmem:[%s6749_s22 + $0xc8] sm:$0xff]  ;;  %v561_v24 = vadd.f32 %v520_v3, %v519_v63  ;;  %v523_v25 = vmul.f32 %v6872_v60, %v6872_v60 }
  0x77   : > { %1391 = vmatprep.subr.bf16.mxu0 %v5957_v56  ;;  %v6879_v4 = vld [vmem:[%s6749_s22 + $0xd0] sm:$0xff]  ;;  %v6882_v6 = vld [vmem:[%s6749_s22 + $0xd8] sm:$0xff]  ;;  %1504 = vmatprep.subr.bf16.mxu1 %v5959_v57  ;;  %v5965_v9 = vld [vmem:[#allocation7 + $0x6c] ss:$24 sps:$4 sm:$0xff]   ;;  %v524_v26 = vmul.f32 %v6889_v16, %v6889_v16  ;;  %v564_v34 = vadd.f32 %v522_v15, %v521_v11 }
  0x78   : > { %544 = vadd.xlane.f32.xlu0 %v543_v32  ;;  %v5967_v17 = vld [vmem:[#allocation7 + $0x60] ss:$24 sps:$4 sm:$0xff]   ;;  %1392 = vmatpush1.bf16.msra.mxu0 %v5961_v58  ;;  %v5969_v22 = vld [vmem:[#allocation7 + $0x94] ss:$24 sps:$4 sm:$0xff]   ;;  %v526_v38 = vmul.f32 %v6882_v6, %v6882_v6  ;;  %v5973_v42 = vld [vmem:[#allocation7 + $0x90] ss:$24 sps:$4 sm:$0xff]  }
  0x79   : > { %v5968_v21 = vld [vmem:[#allocation7 + $0x68] ss:$24 sps:$4 sm:$0xff]   ;;  %1393 = vmatprep.subr.bf16.mxu0 %v5963_v61  ;;  %v5971_v23 = vld [vmem:[#allocation7 + $0x9c] ss:$24 sps:$4 sm:$0xff]   ;;  %v5974_v45 = vld [vmem:[#allocation7 + $0x98] ss:$24 sps:$4 sm:$0xff]   ;;  %v567_v48 = vadd.f32 %v524_v26, %v523_v25 }
  0x7a   : > { %547 = vadd.xlane.f32.xlu1 %v546_v37  ;;  %1505 = vmatpush1.bf16.msra.mxu1 %v5962_v59  ;;  %v6896_v27 = vld [vmem:[%s6749_s22 + $0xf0] sm:$0xff]  ;;  %v6899_v32 = vld [vmem:[%s6749_s22 + $0xf8] sm:$0xff]  ;;  %v6902_v33 = vld [vmem:[%s6749_s22 + $0xe0] sm:$0xff]  ;;  %v525_v37 = vmul.f32 %v6879_v4, %v6879_v4 }
  0x7b   : > { %1506 = vmatprep.subr.bf16.mxu1 %v5965_v9  ;;  %v6909_v39 = vld [vmem:[%s6749_s22 + $0xe8] sm:$0xff]  ;;  %v5975_v46 = vld [vmem:[#allocation7 + $0xc4] ss:$24 sps:$4 sm:$0xff]   ;;  %v527_v49 = vmul.f32 %v6902_v33, %v6902_v33  ;;  %v529_v54 = vmul.f32 %v6896_v27, %v6896_v27  ;;  %v530_v55 = vmul.f32 %v6899_v32, %v6899_v32  ;;  %v5979_v56 = vld [vmem:[#allocation7 + $0xc0] ss:$24 sps:$4 sm:$0xff]   ;;  %s2456_s22 = sld [smem:[#allocation4]] }
  0x7c   : > { %550 = vadd.xlane.f32.xlu0 %v549_v47  ;;  %1394 = vmatpush1.bf16.msra.mxu0 %v5967_v17  ;;  %v5977_v47 = vld [vmem:[#allocation7 + $0xcc] ss:$24 sps:$4 sm:$0xff]   ;;  %v528_v52 = vmul.f32 %v6909_v39, %v6909_v39  ;;  %v5980_v57 = vld [vmem:[#allocation7 + $0xc8] ss:$24 sps:$4 sm:$0xff]   ;;  %v5983_v59 = vld [vmem:[#allocation7 + $0xfc] ss:$24 sps:$4 sm:$0xff]  }
  0x7d   : > { %1395 = vmatprep.subr.bf16.mxu0 %v5969_v22  ;;  %v5981_v58 = vld [vmem:[#allocation7 + $0xf4] ss:$24 sps:$4 sm:$0xff]   ;;  %v5985_v63 = vld [vmem:[#allocation7 + $0xf0] ss:$24 sps:$4 sm:$0xff]   ;;  %v5987_v9 = vld [vmem:[#allocation7 + $0x124] ss:$24 sps:$4 sm:$0xff]  }
  0x7e   : > { %553 = vadd.xlane.f32.xlu1 %v552_v53  ;;  %1507 = vmatpush1.bf16.msra.mxu1 %v5968_v21  ;;  %v570_v53 = vadd.f32 %v526_v38, %v525_v37  ;;  %v573_v61 = vadd.f32 %v528_v52, %v527_v49  ;;  %v5986_v3 = vld [vmem:[#allocation7 + $0xf8] ss:$24 sps:$4 sm:$0xff]   ;;  %v5992_v15 = vld [vmem:[#allocation7 + $0x128] ss:$24 sps:$4 sm:$0xff]   ;;  %v5993_v17 = vld [vmem:[#allocation7 + $0x154] ss:$24 sps:$4 sm:$0xff]  }
  0x7f   : > { %1508 = vmatprep.subr.bf16.mxu1 %v5971_v23  ;;  %v5991_v11 = vld [vmem:[#allocation7 + $0x120] ss:$24 sps:$4 sm:$0xff]   ;;  %v5995_v21 = vld [vmem:[#allocation7 + $0x15c] ss:$24 sps:$4 sm:$0xff]   ;;  %v5997_v22 = vld [vmem:[#allocation7 + $0x150] ss:$24 sps:$4 sm:$0xff]  }
  0x80   : > { %556 = vadd.xlane.f32.xlu0 %v555_v62  ;;  %1396 = vmatpush1.bf16.msra.mxu0 %v5973_v42  ;;  %v576_v62 = vadd.f32 %v530_v55, %v529_v54  ;;  %v5998_v23 = vld [vmem:[#allocation7 + $0x158] ss:$24 sps:$4 sm:$0xff]   ;;  %v6001_v25 = vld [vmem:[#allocation7 + $0x18c] ss:$24 sps:$4 sm:$0xff]   ;;  %v6007_v38 = vld [vmem:[#allocation7 + $0x1bc] ss:$24 sps:$4 sm:$0xff]  }
  0x81   : > { %1397 = vmatprep.subr.bf16.mxu0 %v5975_v46  ;;  %v6003_v26 = vld [vmem:[#allocation7 + $0x180] ss:$24 sps:$4 sm:$0xff]   ;;  %v6005_v37 = vld [vmem:[#allocation7 + $0x1b4] ss:$24 sps:$4 sm:$0xff]   ;;  %v6009_v42 = vld [vmem:[#allocation7 + $0x1b0] ss:$24 sps:$4 sm:$0xff]  }
  0x82   : > { %559 = vadd.xlane.f32.xlu1 %v558_v10  ;;  %1509 = vmatpush1.bf16.msra.mxu1 %v5974_v45  ;;  %v5989_v10 = vld [vmem:[#allocation7 + $0x12c] ss:$24 sps:$4 sm:$0xff]   ;;  %v6010_v45 = vld [vmem:[#allocation7 + $0x1b8] ss:$24 sps:$4 sm:$0xff]   ;;  %v6016_v49 = vld [vmem:[#allocation7 + $0x1e8] ss:$24 sps:$4 sm:$0xff]  }
  0x83   : > { %1510 = vmatprep.subr.bf16.mxu1 %v5977_v47  ;;  %v6011_v46 = vld [vmem:[#allocation7 + $0x1e4] ss:$24 sps:$4 sm:$0xff]   ;;  %v6017_v52 = vld [vmem:[#allocation7 + $0x214] ss:$24 sps:$4 sm:$0xff]   ;;  %v6021_v54 = vld [vmem:[#allocation7 + $0x210] ss:$24 sps:$4 sm:$0xff]  }
  0x84   : > { %562 = vadd.xlane.f32.xlu0 %v561_v24  ;;  %1398 = vmatpush1.bf16.msra.mxu0 %v5979_v56  ;;  %v5999_v24 = vld [vmem:[#allocation7 + $0x184] ss:$24 sps:$4 sm:$0xff]   ;;  %v6022_v55 = vld [vmem:[#allocation7 + $0x218] ss:$24 sps:$4 sm:$0xff]  }
  0x85   : > { %1399 = vmatprep.subr.bf16.mxu0 %v5981_v58  ;;  %v6013_v47 = vld [vmem:[#allocation7 + $0x1ec] ss:$24 sps:$4 sm:$0xff]   ;;  %v6027_v58 = vld [vmem:[#allocation7 + $0x240] ss:$24 sps:$4 sm:$0xff]  }
  0x86   : > { %565 = vadd.xlane.f32.xlu1 %v564_v34  ;;  %1511 = vmatpush1.bf16.msra.mxu1 %v5980_v57  ;;  %v6004_v34 = vld [vmem:[#allocation7 + $0x188] ss:$24 sps:$4 sm:$0xff]   ;;  %v6023_v56 = vld [vmem:[#allocation7 + $0x244] ss:$24 sps:$4 sm:$0xff]  }
  0x87   : > { %1512 = vmatprep.subr.bf16.mxu1 %v5983_v59  ;;  %v6025_v57 = vld [vmem:[#allocation7 + $0x24c] ss:$24 sps:$4 sm:$0xff]   ;;  %v6028_v59 = vld [vmem:[#allocation7 + $0x248] ss:$24 sps:$4 sm:$0xff]  }
  0x88   : > { %568 = vadd.xlane.f32.xlu0 %v567_v48  ;;  %1400 = vmatpush1.bf16.msra.mxu0 %v5985_v63  ;;  %v6015_v48 = vld [vmem:[#allocation7 + $0x1e0] ss:$24 sps:$4 sm:$0xff]   ;;  %v6033_v63 = vld [vmem:[#allocation7 + $0x270] ss:$24 sps:$4 sm:$0xff]  }
  0x89   : > { %1401 = vmatprep.subr.bf16.mxu0 %v5987_v9  ;;  %v6035_v9 = vld [vmem:[#allocation7 + $0x2a4] ss:$24 sps:$4 sm:$0xff]  }
  0x8a   : > { %571 = vadd.xlane.f32.xlu1 %v570_v53  ;;  %1513 = vmatpush1.bf16.msra.mxu1 %v5986_v3  ;;  %v6019_v53 = vld [vmem:[#allocation7 + $0x21c] ss:$24 sps:$4 sm:$0xff]   ;;  %v6034_v3 = vld [vmem:[#allocation7 + $0x278] ss:$24 sps:$4 sm:$0xff]  }
  0x8b   : > { %1514 = vmatprep.subr.bf16.mxu1 %v5989_v10  ;;  %v6037_v10 = vld [vmem:[#allocation7 + $0x2ac] ss:$24 sps:$4 sm:$0xff]  }
  0x8c   : > { %574 = vadd.xlane.f32.xlu0 %v573_v61  ;;  %1402 = vmatpush1.bf16.msra.mxu0 %v5991_v11  ;;  %v6029_v61 = vld [vmem:[#allocation7 + $0x274] ss:$24 sps:$4 sm:$0xff]   ;;  %v6039_v11 = vld [vmem:[#allocation7 + $0x2a0] ss:$24 sps:$4 sm:$0xff]  }
  0x8d   : > { %1403 = vmatprep.subr.bf16.mxu0 %v5993_v17  ;;  %v6041_v17 = vld [vmem:[#allocation7 + $0x2d4] ss:$24 sps:$4 sm:$0xff]  }
  0x8e   : > { %577 = vadd.xlane.f32.xlu1 %v576_v62  ;;  %1515 = vmatpush1.bf16.msra.mxu1 %v5992_v15  ;;  %v6031_v62 = vld [vmem:[#allocation7 + $0x27c] ss:$24 sps:$4 sm:$0xff]   ;;  %v6040_v15 = vld [vmem:[#allocation7 + $0x2a8] ss:$24 sps:$4 sm:$0xff]  }
  0x8f   : > { %1516 = vmatprep.subr.bf16.mxu1 %v5995_v21  ;;  %v6043_v21 = vld [vmem:[#allocation7 + $0x2dc] ss:$24 sps:$4 sm:$0xff]  }
  0x90   : > { %1404 = vmatpush1.bf16.msra.mxu0 %v5997_v22  ;;  %v6045_v22 = vld [vmem:[#allocation7 + $0x2d0] ss:$24 sps:$4 sm:$0xff]  }
  0x91   : > { %1405 = vmatprep.subr.bf16.mxu0 %v5999_v24  ;;  %v6049_v24 = vld [vmem:[#allocation7 + $0x14] ss:$24 sps:$4 sm:$0xff]  }
  0x92   : > { %1517 = vmatpush1.bf16.msra.mxu1 %v5998_v23  ;;  %v6046_v23 = vld [vmem:[#allocation7 + $0x2d8] ss:$24 sps:$4 sm:$0xff]  }
  0x93   : > { %1518 = vmatprep.subr.bf16.mxu1 %v6001_v25 }
  0x94   : > { %1406 = vmatpush1.bf16.msra.mxu0 %v6003_v26 }
  0x95   : > { %1407 = vmatprep.subr.bf16.mxu0 %v6005_v37 }
  0x96   : > { %1519 = vmatpush1.bf16.msra.mxu1 %v6004_v34 }
  0x97   : > { %1520 = vmatprep.subr.bf16.mxu1 %v6007_v38 }
  0x98   : > { %1408 = vmatpush1.bf16.msra.mxu0 %v6009_v42 }
  0x99   : > { %1409 = vmatprep.subr.bf16.mxu0 %v6011_v46  ;;  %v679_v46 = vlaneseq }
  0x9a   : > { %1521 = vmatpush1.bf16.msra.mxu1 %v6010_v45 }
  0x9b   : > { %1522 = vmatprep.subr.bf16.mxu1 %v6013_v47 }
  0x9c   : > { %1410 = vmatpush1.bf16.msra.mxu0 %v6015_v48 }
  0x9d   : > { %1411 = vmatprep.subr.bf16.mxu0 %v6017_v52 }
  0x9e   : > { %1523 = vmatpush1.bf16.msra.mxu1 %v6016_v49 }
  0x9f   : > { %1524 = vmatprep.subr.bf16.mxu1 %v6019_v53  ;;  %v6927_v53 = vshrl.u32 %v679_v46, 7 }
  0xa0   : > { %1412 = vmatpush1.bf16.msra.mxu0 %v6021_v54 }
  0xa1   : > { %1413 = vmatprep.subr.bf16.mxu0 %v6023_v56  ;;  %v6929_v56 = vstv %s498_s27  ;;  %s9622_s27 = sld [smem:[#allocation14_spill]] (%p6685_p10) }
  0xa2   : > { %1525 = vmatpush1.bf16.msra.mxu1 %v6022_v55  ;;  %v676_v55 = vld [vmem:[%s458_s17] sm:$0x3] }
  0xa3   : > { %1526 = vmatprep.subr.bf16.mxu1 %v6025_v57 }
  0xa4   : > { %1414 = vmatpush1.bf16.msra.mxu0 %v6027_v58 }
  0xa5   : > { %1415 = vmatprep.subr.bf16.mxu0 %v6029_v61 }
  0xa6   : > { %1527 = vmatpush1.bf16.msra.mxu1 %v6028_v59 }
  0xa7   : > { %1528 = vmatprep.subr.bf16.mxu1 %v6031_v62  ;;  %v677_v62 = vadd.f32 1.0, %v676_v55  ;;  %s5660_s28 = sshll.u32 (%p6685_p10), %s9622_s27, 4 }
  0xa8   : > { %1416 = vmatpush1.bf16.msra.mxu0 %v6033_v63  ;;  %v6932_v63 = vsub.s32 1, %v6927_v53  ;;  %s4172_s26 = sadd.s32 (%p6685_p10), %s5661_s30, %s5660_s28 }
  0xa9   : > { %1417 = vmatprep.subr.bf16.mxu0 %v6035_v9  ;;  %s5662_s17 = sshll.u32 (%p6685_p10), %s4172_s26, 2 }
  0xaa   : > { %1529 = vmatpush1.bf16.msra.mxu1 %v6034_v3  ;;  %v6935_v3 = vsub.s32 0, %v6927_v53 }
  0xab   : > { %1530 = vmatprep.subr.bf16.mxu1 %v6037_v10 }
  0xac   : > { %1418 = vmatpush1.bf16.msra.mxu0 %v6039_v11 }
  0xad   : > { %1419 = vmatprep.subr.bf16.mxu0 %v6041_v17 }
  0xae   : > { %1531 = vmatpush1.bf16.msra.mxu1 %v6040_v15 }
  0xaf   : > { %1532 = vmatprep.subr.bf16.mxu1 %v6043_v21 }
  0xb0   : > { %1420 = vmatpush1.bf16.msra.mxu0 %v6045_v22 }
  0xb1   : > { %1615 = vmatprep.subr.bf16.mxu0 %v6049_v24 }
  0xb2   : > { %1533 = vmatpush1.bf16.msra.mxu1 %v6046_v23 }
  0xb3   : > { %5832 = vmatprep.subr.bf16.mxu1 %v6049_v24  ;;  %v6943_v24 = vrot.slane %v677_v62, %v6932_v63 }
  0xfd   : > { %v533_v25 = vpop.xlane.xlu0 %532 }
  0xfe   : > { %v579_v26 = vmax.f32 %v533_v25, 1e-24  ;;  %v721_v25 = vld [vmem:[%s462_s11] sm:$0x3]  ;;  %s9623_s11 = sld [smem:[#allocation126_spill]] (%p6685_p10) }
  0xff   : > { %v539_v34 = vpop.xlane.xlu1 %538  ;;  %v6954_v55 = vrot.slane %v721_v25, %v6932_v63 }
 0x100   : > { %v581_v37 = vmax.f32 %v539_v34, 1e-24  ;;  %6095 = vrsqrt.f32 %v579_v26  ;;  %v6946_v26 = vrot.slane %v677_v62, %v6935_v3 }
 0x101   : > { %v536_v38 = vpop.xlane.xlu0 %535 }
 0x102   : > { %6097 = vrsqrt.f32 %v581_v37  ;;  %v580_v42 = vmax.f32 %v536_v38, 1e-24 }
 0x103   : > { %v542_v45 = vpop.xlane.xlu1 %541 }
 0x104   : > { %v582_v47 = vmax.f32 %v542_v45, 1e-24  ;;  %6099 = vrsqrt.f32 %v580_v42  ;;  %s9031_s18 = scalar_lea.vmem (%p6685_p10), %s9623_s11, %s5662_s17 }
 0x105   : > { %v545_v48 = vpop.xlane.xlu0 %544 }
 0x106   : > { %6101 = vrsqrt.f32 %v582_v47  ;;  %v583_v52 = vmax.f32 %v545_v48, 1e-24 }
 0x107   : > { %v548_v49 = vpop.xlane.xlu1 %547 }
 0x108   : > { %v584_v54 = vmax.f32 %v548_v49, 1e-24  ;;  %6103 = vrsqrt.f32 %v583_v52 }
 0x109   : > { %v551_v57 = vpop.xlane.xlu0 %550 }
 0x10a   : > { %6105 = vrsqrt.f32 %v584_v54  ;;  %v6096_v58 = vpop.eup %6095  ;;  %v585_v61 = vmax.f32 %v551_v57, 1e-24 }
 0x10b   : > { %v554_v59 = vpop.xlane.xlu1 %553  ;;  %v611_v10 = vmul.f32 16.0, %v6096_v58 }
 0x10c   : > { %v6098_v9 = vpop.eup %6097  ;;  %v586_v11 = vmax.f32 %v554_v59, 1e-24  ;;  %6107 = vrsqrt.f32 %v585_v61  ;;  %v6960_v59 = vrot.slane %v721_v25, %v6935_v3 }
 0x10d   : > { %v613_v15 = vmul.f32 16.0, %v6098_v9  ;;  %v628_v17 = vmul.f32 %v6929_v56, %v611_v10  ;;  %v557_v21 = vpop.xlane.xlu0 %556 }
 0x10e   : > { %6109 = vrsqrt.f32 %v586_v11  ;;  %v6100_v22 = vpop.eup %6099  ;;  %v587_v37 = vmax.f32 %v557_v21, 1e-24 }
 0x10f   : > { %v630_v23 = vmul.f32 %v6929_v56, %v613_v15  ;;  %v560_v34 = vpop.xlane.xlu1 %559  ;;  %v644_v42 = vmul.f32 %v628_v17, %v6760_v0  ;;  %v645_v45 = vmul.f32 %v628_v17, %v6763_v1  ;;  %v612_v46 = vmul.f32 16.0, %v6100_v22 }
 0x110   : > { %v6102_v38 = vpop.eup %6101  ;;  %v588_v47 = vmax.f32 %v560_v34, 1e-24  ;;  %6111 = vrsqrt.f32 %v587_v37 }
 0x111   : > { %v649_v48 = vmul.f32 %v630_v23, %v6781_v8  ;;  %v614_v49 = vmul.f32 16.0, %v6102_v38  ;;  %v629_v52 = vmul.f32 %v6929_v56, %v612_v46  ;;  %v648_v54 = vmul.f32 %v630_v23, %v6778_v7  ;;  %v563_v10 = vpop.xlane.xlu0 %562 }
 0x112   : > { %6113 = vrsqrt.f32 %v588_v47  ;;  %v6104_v57 = vpop.eup %6103  ;;  %v690_v0 = vmul.f32 %v6943_v24, %v645_v45  ;;  %v689_v1 = vmul.f32 %v6946_v26, %v644_v42  ;;  %v589_v38 = vmax.f32 %v563_v10, 1e-24 }
 0x113   : > { %v631_v58 = vmul.f32 %v6929_v56, %v614_v49  ;;  %v646_v61 = vmul.f32 %v629_v52, %v6766_v2  ;;  %v647_v62 = vmul.f32 %v629_v52, %v6773_v5  ;;  %v615_v7 = vmul.f32 16.0, %v6104_v57  ;;  %v566_v47 = vpop.xlane.xlu1 %565 }
 0x114   : > { %v6106_v8 = vpop.eup %6105  ;;  %v694_v9 = vmul.f32 %v6943_v24, %v649_v48  ;;  %v693_v25 = vmul.f32 %v6946_v26, %v648_v54  ;;  %v734_v34 = vadd.f32 %v6954_v55, %v690_v0  ;;  %v733_v45 = vadd.f32 %v6960_v59, %v689_v1 }
 0x115   : > { %v650_v11 = vmul.f32 %v631_v58, %v6790_v12  ;;  %v651_v15 = vmul.f32 %v631_v58, %v6793_v13  ;;  %v616_v17 = vmul.f32 16.0, %v6106_v8  ;;  %v632_v21 = vmul.f32 %v6929_v56, %v615_v7  ;;  %v6047_v8 = vld [vmem:[#allocation7 + $0x10] ss:$24 sps:$4 sm:$0xff]  }
 0x116   : > { %v692_v22 = vmul.f32 %v6943_v24, %v647_v62  ;;  %v691_v23 = vmul.f32 %v6946_v26, %v646_v61  ;;  %v6108_v2 = vpop.eup %6107  ;;  %v738_v46 = vadd.f32 %v6954_v55, %v694_v9  ;;  %v590_v9 = vmax.f32 %v566_v47, 1e-24 }
 0x117   : > { %v633_v5 = vmul.f32 %v6929_v56, %v616_v17  ;;  %v696_v37 = vmul.f32 %v6943_v24, %v651_v15  ;;  %v617_v42 = vmul.f32 16.0, %v6108_v2  ;;  %v653_v48 = vmul.f32 %v632_v21, %v6809_v20  ;;  %v6052_v20 = vld [vmem:[#allocation7 + $0x44] ss:$24 sps:$4 sm:$0xff]   ;;  %v572_v17 = vpop.xlane.xlu1 %571 }
 0x118   : > { %v6110_v12 = vpop.eup %6109  ;;  %v736_v13 = vadd.f32 %v6954_v55, %v692_v22  ;;  %v735_v52 = vadd.f32 %v6960_v59, %v691_v23  ;;  %v695_v54 = vmul.f32 %v6946_v26, %v650_v11  ;;  %6115 = vrsqrt.f32 %v589_v38 }
 0x119   : > { %v618_v49 = vmul.f32 16.0, %v6110_v12  ;;  %v655_v57 = vmul.f32 %v633_v5, %v6803_v18  ;;  %v634_v58 = vmul.f32 %v6929_v56, %v617_v42  ;;  %v740_v61 = vadd.f32 %v6954_v55, %v696_v37  ;;  %v569_v37 = vpop.xlane.xlu0 %568  ;;  %v6055_v12 = vld [vmem:[#allocation7 + $0x74] ss:$24 sps:$4 sm:$0xff]  }
 0x11a   : > { %v6982_v0 = vpack.c.bf16 %v736_v13, %v734_v34  ;;  %v6112_v1 = vpop.eup %6111  ;;  %v6986_v7 = vpack.c.bf16 %v735_v52, %v733_v45  ;;  %v654_v11 = vmul.f32 %v633_v5, %v6796_v14  ;;  %v652_v18 = vmul.f32 %v632_v21, %v6806_v19  ;;  %v6050_v19 = vld [vmem:[#allocation7 + $0x40] ss:$24 sps:$4 sm:$0xff]  }
 0x11b   : > { %v635_v62 = vmul.f32 %v6929_v56, %v618_v49  ;;  %v6992_v15 = vpack.c.bf16 %v740_v61, %v738_v46  ;;  %v619_v23 = vmul.f32 16.0, %v6112_v1  ;;  %v737_v2 = vadd.f32 %v6960_v59, %v693_v25  ;;  %v6053_v49 = vld [vmem:[#allocation7 + $0x70] ss:$24 sps:$4 sm:$0xff]  }
 0x11c   : > { %v6114_v10 = vpop.eup %6113  ;;  %1421 = vmatprep.mubr.bf16.mxu0 %v6982_v0  ;;  %1534 = vmatprep.mubr.bf16.mxu1 %v6982_v0  ;;  %v739_v34 = vadd.f32 %v6960_v59, %v695_v54  ;;  %v657_v14 = vmul.f32 %v634_v58, %v6823_v29  ;;  %6117 = vrsqrt.f32 %v590_v9  ;;  %v698_v21 = vmul.f32 %v6943_v24, %v653_v48 }
 0x11d   : > { %1422 = vmatmul.mubr.bf16.vlgmr.msra.gmra.mrb[0].mxu0 %v6986_v7  ;;  %1535 = vmatmul.mubr.bf16.vlgmr.msra.gmra.mrb[0].mxu1 %v6986_v7  ;;  %v620_v22 = vmul.f32 16.0, %v6114_v10  ;;  %v700_v5 = vmul.f32 %v6943_v24, %v655_v57  ;;  %v659_v38 = vmul.f32 %v635_v62, %v6829_v31  ;;  %v592_v42 = vmax.f32 %v572_v17, 1e-24  ;;  %v578_v31 = vpop.xlane.xlu1 %577  ;;  %v575_v61 = vpop.xlane.xlu0 %574 }
 0x11e   : > { %1616 = vmatpush1.bf16.msra.mxu0 %v6047_v8  ;;  %1431 = vmatprep.mubr.bf16.mxu0 %v6992_v15  ;;  %v742_v25 = vadd.f32 %v6954_v55, %v698_v21  ;;  %v697_v13 = vmul.f32 %v6946_v26, %v652_v18  ;;  %v699_v45 = vmul.f32 %v6946_v26, %v654_v11  ;;  %v591_v54 = vmax.f32 %v569_v37, 1e-24 }
 0x11f   : > { %1617 = vmatprep.subr.bf16.mxu0 %v6052_v20  ;;  %1544 = vmatprep.mubr.bf16.mxu1 %v6992_v15  ;;  %v744_v29 = vadd.f32 %v6954_v55, %v700_v5  ;;  %v637_v46 = vmul.f32 %v6929_v56, %v620_v22  ;;  %v636_v47 = vmul.f32 %v6929_v56, %v619_v23  ;;  %6119 = vrsqrt.f32 %v592_v42 }
 0x120   : > { %5848 = vmatpush1.bf16.msra.mxu1 %v6047_v8  ;;  %v7010_v48 = vpack.c.bf16 %v739_v34, %v737_v2  ;;  %v702_v57 = vmul.f32 %v6943_v24, %v657_v14  ;;  %v656_v1 = vmul.f32 %v634_v58, %v6820_v28  ;;  %v6058_v8 = vld [vmem:[#allocation7 + $0xa4] ss:$24 sps:$4 sm:$0xff]   ;;  %v704_v9 = vmul.f32 %v6943_v24, %v659_v38  ;;  %v6056_v58 = vld [vmem:[#allocation7 + $0xa0] ss:$24 sps:$4 sm:$0xff]   ;;  %v6059_v38 = vld [vmem:[#allocation7 + $0xd0] ss:$24 sps:$4 sm:$0xff]  }
 0x121   : > { %5833 = vmatprep.subr.bf16.mxu1 %v6052_v20  ;;  %v7012_v52 = vpack.c.bf16 %v744_v29, %v742_v25  ;;  %v741_v10 = vadd.f32 %v6960_v59, %v697_v13  ;;  %v743_v11 = vadd.f32 %v6960_v59, %v699_v45  ;;  %6121 = vrsqrt.f32 %v591_v54  ;;  %v6064_v13 = vld [vmem:[#allocation7 + $0x104] ss:$24 sps:$4 sm:$0xff]  }
 0x122   : > { %1618 = vmatpush1.bf16.msra.mxu0 %v6050_v19  ;;  %v594_v20 = vmax.f32 %v578_v31, 1e-24  ;;  %v6116_v18 = vpop.eup %6115  ;;  %v658_v17 = vmul.f32 %v635_v62, %v6826_v30  ;;  %v661_v22 = vmul.f32 %v636_v47, %v6849_v41  ;;  %v593_v23 = vmax.f32 %v575_v61, 1e-24 }
 0x123   : > { %1619 = vmatprep.subr.bf16.mxu0 %v6055_v12  ;;  %v663_v28 = vmul.f32 %v637_v46, %v6839_v36  ;;  %v621_v2 = vmul.f32 16.0, %v6116_v18  ;;  %v746_v34 = vadd.f32 %v6954_v55, %v702_v57  ;;  %v748_v14 = vadd.f32 %v6954_v55, %v704_v9 }
 0x124   : > { %5849 = vmatpush1.bf16.msra.mxu1 %v6050_v19  ;;  %v6061_v19 = vld [vmem:[#allocation7 + $0xd4] ss:$24 sps:$4 sm:$0xff]   ;;  %v7027_v41 = vpack.c.bf16 %v743_v11, %v741_v10  ;;  %v701_v62 = vmul.f32 %v6946_v26, %v656_v1  ;;  %6123 = vrsqrt.f32 %v594_v20  ;;  %v703_v21 = vmul.f32 %v6946_v26, %v658_v17  ;;  %v6062_v11 = vld [vmem:[#allocation7 + $0x100] ss:$24 sps:$4 sm:$0xff]   ;;  %v6065_v17 = vld [vmem:[#allocation7 + $0x130] ss:$24 sps:$4 sm:$0xff]  }
 0x125   : > { %1432 = vmatmul.mubr.bf16.gmra.mrb[4].mxu0 %v7010_v48  ;;  %1545 = vmatmul.mubr.bf16.gmra.mrb[4].mxu1 %v7010_v48  ;;  %6125 = vrsqrt.f32 %v593_v23  ;;  %v706_v5 = vmul.f32 %v6943_v24, %v661_v22  ;;  %v638_v37 = vmul.f32 %v6929_v56, %v621_v2  ;;  %v7034_v42 = vpack.c.bf16 %v748_v14, %v746_v34 }
 0x126   : > { %1620 = vmatpush1.bf16.msra.mxu0 %v6053_v49  ;;  %1441 = vmatprep.mubr.bf16.mxu0 %v7012_v52  ;;  %v6118_v30 = vpop.eup %6117  ;;  %v708_v25 = vmul.f32 %v6943_v24, %v663_v28  ;;  %v662_v31 = vmul.f32 %v637_v46, %v6836_v35  ;;  %v660_v54 = vmul.f32 %v636_v47, %v6846_v40  ;;  %v6067_v46 = vld [vmem:[#allocation7 + $0x134] ss:$24 sps:$4 sm:$0xff]  }
 0x127   : > { %1621 = vmatprep.subr.bf16.mxu0 %v6058_v8  ;;  %1554 = vmatprep.mubr.bf16.mxu1 %v7012_v52  ;;  %v622_v36 = vmul.f32 16.0, %v6118_v30  ;;  %v745_v57 = vadd.f32 %v6960_v59, %v701_v62  ;;  %v747_v61 = vadd.f32 %v6960_v59, %v703_v21  ;;  %v750_v1 = vadd.f32 %v6954_v55, %v706_v5  ;;  %v6068_v5 = vld [vmem:[#allocation7 + $0x160] ss:$24 sps:$4 sm:$0xff]  }
 0x128   : > { %5834 = vmatprep.subr.bf16.mxu1 %v6055_v12  ;;  %v752_v35 = vadd.f32 %v6954_v55, %v708_v25  ;;  %v705_v47 = vmul.f32 %v6946_v26, %v660_v54  ;;  %v664_v34 = vmul.f32 %v638_v37, %v6852_v43  ;;  %v6071_v54 = vld [vmem:[#allocation7 + $0x190] ss:$24 sps:$4 sm:$0xff]  }
 0x129   : > { %v639_v29 = vmul.f32 %v6929_v56, %v622_v36  ;;  %5850 = vmatpush1.bf16.msra.mxu1 %v6053_v49  ;;  %v6120_v45 = vpop.eup %6119  ;;  %v665_v49 = vmul.f32 %v638_v37, %v6855_v44 }
 0x12a   : > { %1622 = vmatpush1.bf16.msra.mxu0 %v6056_v58  ;;  %5835 = vmatprep.subr.bf16.mxu1 %v6058_v8  ;;  %v624_v12 = vmul.f32 16.0, %v6120_v45  ;;  %v707_v8 = vmul.f32 %v6946_v26, %v662_v31  ;;  %v7056_v22 = vpack.c.bf16 %v752_v35, %v750_v1  ;;  %v749_v14 = vadd.f32 %v6960_v59, %v705_v47 }
 0x12b   : > { %1623 = vmatprep.subr.bf16.mxu0 %v6061_v19  ;;  %v6122_v9 = vpop.eup %6121  ;;  %v667_v10 = vmul.f32 %v639_v29, %v6865_v51  ;;  %v7053_v51 = vpack.c.bf16 %v747_v61, %v745_v57  ;;  %v710_v23 = vmul.f32 %v6943_v24, %v665_v49  ;;  %v666_v30 = vmul.f32 %v639_v29, %v6862_v50 }
 0x12c   : > { %v623_v40 = vmul.f32 16.0, %v6122_v9  ;;  %v641_v44 = vmul.f32 %v6929_v56, %v624_v12  ;;  %v709_v50 = vmul.f32 %v6946_v26, %v664_v34  ;;  %v6085_v34 = vld [vmem:[#allocation7 + $0x254] ss:$24 sps:$4 sm:$0xff]  }
 0x12d   : > { %1442 = vmatmul.mubr.bf16.gmra.mrb[8].mxu0 %v7027_v41  ;;  %1555 = vmatmul.mubr.bf16.gmra.mrb[8].mxu1 %v7027_v41  ;;  %v712_v28 = vmul.f32 %v6943_v24, %v667_v10  ;;  %v754_v43 = vadd.f32 %v6954_v55, %v710_v23 }
 0x12e   : > { %1624 = vmatpush1.bf16.msra.mxu0 %v6059_v38  ;;  %1451 = vmatprep.mubr.bf16.mxu0 %v7034_v42  ;;  %v6124_v20 = vpop.eup %6123  ;;  %v640_v18 = vmul.f32 %v6929_v56, %v623_v40  ;;  %v671_v62 = vmul.f32 %v641_v44, %v6882_v6  ;;  %v670_v61 = vmul.f32 %v641_v44, %v6879_v4  ;;  %v6079_v40 = vld [vmem:[#allocation7 + $0x1f4] ss:$24 sps:$4 sm:$0xff]  }
 0x12f   : > { %1625 = vmatprep.subr.bf16.mxu0 %v6064_v13  ;;  %5851 = vmatpush1.bf16.msra.mxu1 %v6056_v58  ;;  %v6126_v2 = vpop.eup %6125  ;;  %v6070_v58 = vld [vmem:[#allocation7 + $0x164] ss:$24 sps:$4 sm:$0xff]   ;;  %v626_v36 = vmul.f32 16.0, %v6124_v20  ;;  %v756_v37 = vadd.f32 %v6954_v55, %v712_v28  ;;  %v753_v1 = vadd.f32 %v6960_v59, %v709_v50 }
 0x130   : > { %1564 = vmatprep.mubr.bf16.mxu1 %v7034_v42  ;;  %5836 = vmatprep.subr.bf16.mxu1 %v6061_v19  ;;  %v751_v19 = vadd.f32 %v6960_v59, %v707_v8  ;;  %v669_v21 = vmul.f32 %v640_v18, %v6889_v16  ;;  %v625_v25 = vmul.f32 16.0, %v6126_v2  ;;  %v711_v16 = vmul.f32 %v6946_v26, %v666_v30  ;;  %v6082_v20 = vld [vmem:[#allocation7 + $0x224] ss:$24 sps:$4 sm:$0xff]   ;;  %v6080_v2 = vld [vmem:[#allocation7 + $0x220] ss:$24 sps:$4 sm:$0xff]  }
 0x131   : > { %v643_v6 = vmul.f32 %v6929_v56, %v626_v36  ;;  %v716_v29 = vmul.f32 %v6943_v24, %v671_v62  ;;  %v7079_v12 = vpack.c.bf16 %v756_v37, %v754_v43  ;;  %v668_v9 = vmul.f32 %v640_v18, %v6872_v60  ;;  %v6088_v62 = vld [vmem:[#allocation7 + $0x284] ss:$24 sps:$4 sm:$0xff]  }
 0x132   : > { %1626 = vmatpush1.bf16.msra.mxu0 %v6062_v11  ;;  %v7070_v45 = vpack.c.bf16 %v751_v19, %v749_v14  ;;  %v642_v31 = vmul.f32 %v6929_v56, %v625_v25  ;;  %v714_v57 = vmul.f32 %v6943_v24, %v669_v21  ;;  %v755_v56 = vadd.f32 %v6960_v59, %v711_v16  ;;  %v6083_v19 = vld [vmem:[#allocation7 + $0x250] ss:$24 sps:$4 sm:$0xff]   ;;  %v6086_v21 = vld [vmem:[#allocation7 + $0x280] ss:$24 sps:$4 sm:$0xff]   ;;  %v6094_v43 = vld [vmem:[#allocation7 + $0x2e4] ss:$24 sps:$4 sm:$0xff]  }
 0x133   : > { %1627 = vmatprep.subr.bf16.mxu0 %v6067_v46  ;;  %5852 = vmatpush1.bf16.msra.mxu1 %v6059_v38  ;;  %v6073_v38 = vld [vmem:[#allocation7 + $0x194] ss:$24 sps:$4 sm:$0xff]   ;;  %v675_v10 = vmul.f32 %v643_v6, %v6899_v32  ;;  %v760_v4 = vadd.f32 %v6954_v55, %v716_v29  ;;  %v713_v32 = vmul.f32 %v6946_v26, %v668_v9  ;;  %v6089_v25 = vld [vmem:[#allocation7 + $0x2b0] ss:$24 sps:$4 sm:$0xff]  }
 0x134   : > { %5837 = vmatprep.subr.bf16.mxu1 %v6064_v13  ;;  %v6076_v13 = vld [vmem:[#allocation7 + $0x1c4] ss:$24 sps:$4 sm:$0xff]   ;;  %v673_v49 = vmul.f32 %v642_v31, %v6909_v39  ;;  %v758_v35 = vadd.f32 %v6954_v55, %v714_v57  ;;  %v7093_v60 = vpack.c.bf16 %v755_v56, %v753_v1  ;;  %v6077_v39 = vld [vmem:[#allocation7 + $0x1f0] ss:$24 sps:$4 sm:$0xff]   ;;  %v674_v18 = vmul.f32 %v643_v6, %v6896_v27 }
 0x135   : > { %1452 = vmatmul.mubr.bf16.gmra.mrb[12].mxu0 %v7053_v51  ;;  %1565 = vmatmul.mubr.bf16.gmra.mrb[12].mxu1 %v7053_v51  ;;  %v720_v44 = vmul.f32 %v6943_v24, %v675_v10  ;;  %v757_v23 = vadd.f32 %v6960_v59, %v713_v32 }
 0x136   : > { %1628 = vmatpush1.bf16.msra.mxu0 %v6065_v17  ;;  %1461 = vmatprep.mubr.bf16.mxu0 %v7056_v22  ;;  %v7098_v47 = vpack.c.bf16 %v760_v4, %v758_v35  ;;  %v718_v8 = vmul.f32 %v6943_v24, %v673_v49  ;;  %v719_v14 = vmul.f32 %v6946_v26, %v674_v18 }
 0x137   : > { %1629 = vmatprep.subr.bf16.mxu0 %v6070_v58  ;;  %5853 = vmatpush1.bf16.msra.mxu1 %v6062_v11  ;;  %v6074_v11 = vld [vmem:[#allocation7 + $0x1c0] ss:$24 sps:$4 sm:$0xff]  }
 0x138   : > { %1574 = vmatprep.mubr.bf16.mxu1 %v7056_v22  ;;  %5838 = vmatprep.subr.bf16.mxu1 %v6067_v46  ;;  %v715_v46 = vmul.f32 %v6946_v26, %v670_v61  ;;  %v762_v24 = vadd.f32 %v6954_v55, %v718_v8  ;;  %v763_v36 = vadd.f32 %v6960_v59, %v719_v14 }
 0x13a   : > { %1630 = vmatpush1.bf16.msra.mxu0 %v6068_v5  ;;  %v759_v28 = vadd.f32 %v6960_v59, %v715_v46 }
 0x13b   : > { %1631 = vmatprep.subr.bf16.mxu0 %v6073_v38  ;;  %5854 = vmatpush1.bf16.msra.mxu1 %v6065_v17  ;;  %v672_v17 = vmul.f32 %v642_v31, %v6902_v33 }
 0x13c   : > { %5839 = vmatprep.subr.bf16.mxu1 %v6070_v58  ;;  %v764_v58 = vadd.f32 %v6954_v55, %v720_v44  ;;  %v777_v27 = vpack.c.bf16 %v759_v28, %v757_v23 }
 0x13d   : > { %1462 = vmatmul.mubr.bf16.gmra.mrb[16].mxu0 %v7070_v45  ;;  %1575 = vmatmul.mubr.bf16.gmra.mrb[16].mxu1 %v7070_v45  ;;  %v717_v33 = vmul.f32 %v6946_v26, %v672_v17  ;;  %v6091_v26 = vld [vmem:[#allocation7 + $0x2b4] ss:$24 sps:$4 sm:$0xff]  }
 0x13e   : > { %1632 = vmatpush1.bf16.msra.mxu0 %v6071_v54  ;;  %1471 = vmatprep.mubr.bf16.mxu0 %v7079_v12  ;;  %v780_v30 = vpack.c.bf16 %v764_v58, %v762_v24 }
 0x13f   : > { %1633 = vmatprep.subr.bf16.mxu0 %v6076_v13  ;;  %5855 = vmatpush1.bf16.msra.mxu1 %v6068_v5  ;;  %v761_v55 = vadd.f32 %v6960_v59, %v717_v33  ;;  %v6092_v59 = vld [vmem:[#allocation7 + $0x2e0] ss:$24 sps:$4 sm:$0xff]  }
 0x140   : > { %1584 = vmatprep.mubr.bf16.mxu1 %v7079_v12  ;;  %5840 = vmatprep.subr.bf16.mxu1 %v6073_v38 }
 0x141   : > { %v779_v5 = vpack.c.bf16 %v763_v36, %v761_v55 }
 0x142   : > { %1634 = vmatpush1.bf16.msra.mxu0 %v6074_v11 }
 0x143   : > { %1635 = vmatprep.subr.bf16.mxu0 %v6079_v40  ;;  %5856 = vmatpush1.bf16.msra.mxu1 %v6071_v54 }
 0x144   : > { %5841 = vmatprep.subr.bf16.mxu1 %v6076_v13 }
 0x145   : > { %1472 = vmatmul.mubr.bf16.gmra.mrb[20].mxu0 %v7093_v60  ;;  %1585 = vmatmul.mubr.bf16.gmra.mrb[20].mxu1 %v7093_v60 }
 0x146   : > { %1636 = vmatpush1.bf16.msra.mxu0 %v6077_v39  ;;  %1481 = vmatprep.mubr.bf16.mxu0 %v7098_v47 }
 0x147   : > { %1637 = vmatprep.subr.bf16.mxu0 %v6082_v20  ;;  %5857 = vmatpush1.bf16.msra.mxu1 %v6074_v11 }
 0x148   : > { %1594 = vmatprep.mubr.bf16.mxu1 %v7098_v47  ;;  %5842 = vmatprep.subr.bf16.mxu1 %v6079_v40 }
 0x14a   : > { %1638 = vmatpush1.bf16.msra.mxu0 %v6080_v2 }
 0x14b   : > { %1639 = vmatprep.subr.bf16.mxu0 %v6085_v34  ;;  %5858 = vmatpush1.bf16.msra.mxu1 %v6077_v39 }
 0x14c   : > { %5843 = vmatprep.subr.bf16.mxu1 %v6082_v20 }
 0x14d   : > { %1482 = vmatmul.mubr.bf16.gmra.mrb[24].mxu0 %v777_v27  ;;  %1595 = vmatmul.mubr.bf16.gmra.mrb[24].mxu1 %v777_v27 }
 0x14e   : > { %1640 = vmatpush1.bf16.msra.mxu0 %v6083_v19  ;;  %1491 = vmatprep.mubr.bf16.mxu0 %v780_v30 }
 0x14f   : > { %1641 = vmatprep.subr.bf16.mxu0 %v6088_v62  ;;  %5859 = vmatpush1.bf16.msra.mxu1 %v6080_v2 }
 0x150   : > { %1604 = vmatprep.mubr.bf16.mxu1 %v780_v30  ;;  %5844 = vmatprep.subr.bf16.mxu1 %v6085_v34 }
 0x152   : > { %1642 = vmatpush1.bf16.msra.mxu0 %v6086_v21 }
 0x153   : > { %1643 = vmatprep.subr.bf16.mxu0 %v6091_v26  ;;  %5860 = vmatpush1.bf16.msra.mxu1 %v6083_v19 }
 0x154   : > { %5845 = vmatprep.subr.bf16.mxu1 %v6088_v62 }
 0x155   : > { %1492 = vmatmul.mubr.bf16.gmra.mrb[28].mxu0 %v779_v5  ;;  %1605 = vmatmul.mubr.bf16.gmra.mrb[28].mxu1 %v779_v5 }
 0x156   : > { %1644 = vmatpush1.bf16.msra.mxu0 %v6089_v25  ;;  %1647 = vmatprep.mubr.bf16.mxu0 %v6982_v0  ;;  %v7132_v0 = vld [vmem:[%s9265_s7] sm:$0x3f] }
 0x157   : > { %1645 = vmatprep.subr.bf16.mxu0 %v6094_v43  ;;  %5861 = vmatpush1.bf16.msra.mxu1 %v6086_v21  ;;  %v7177_v13 = vrot.slane %v7132_v0, %v6932_v63 }
 0x158   : > { %1687 = vmatprep.mubr.bf16.mxu1 %v7056_v22  ;;  %5846 = vmatprep.subr.bf16.mxu1 %v6091_v26 }
 0x15a   : > { %1646 = vmatpush1.bf16.msra.mxu0 %v6092_v59 }
 0x15b   : > { %5862 = vmatpush1.bf16.msra.mxu1 %v6089_v25 }
 0x15c   : > { %5847 = vmatprep.subr.bf16.mxu1 %v6094_v43 }
 0x15d   : > { %1648 = vmatmul.mubr.bf16.vlgmr.msra.gmra.mrb[32].mxu0 %v6986_v7  ;;  %v893_v7 = vsub.s32 3, %v6927_v53 }
 0x15e   : > { %1657 = vmatprep.mubr.bf16.mxu0 %v6992_v15  ;;  %v889_v15 = vsub.s32 2, %v6927_v53 }
 0x15f   : > { %5863 = vmatpush1.bf16.msra.mxu1 %v6092_v59 }
 0x162   : > { %1688 = vmatmul.mubr.bf16.vlgmr.msra.gmra.mrb[32].mxu1 %v7070_v45 }
 0x163   : > { %1697 = vmatprep.mubr.bf16.mxu1 %v7079_v12 }
 0x165   : > { %1658 = vmatmul.mubr.bf16.gmra.mrb[36].mxu0 %v7010_v48  ;;  %v7138_v48 = vrot.slane %v7132_v0, %v6935_v3 }
 0x166   : > { %1667 = vmatprep.mubr.bf16.mxu0 %v7012_v52  ;;  %v7141_v52 = vrot.slane %v7132_v0, %v893_v7 }
 0x16a   : > { %1698 = vmatmul.mubr.bf16.gmra.mrb[36].mxu1 %v7093_v60 }
 0x16b   : > { %1707 = vmatprep.mubr.bf16.mxu1 %v7098_v47 }
 0x16d   : > { %1668 = vmatmul.mubr.bf16.gmra.mrb[40].mxu0 %v7027_v41  ;;  %v7144_v41 = vrot.slane %v7132_v0, %v889_v15 }
 0x16e   : > { %1677 = vmatprep.mubr.bf16.mxu0 %v7034_v42 }
 0x172   : > { %1708 = vmatmul.mubr.bf16.gmra.mrb[40].mxu1 %v777_v27 }
 0x173   : > { %1717 = vmatprep.mubr.bf16.mxu1 %v780_v30 }
 0x175   : > { %1678 = vmatmul.mubr.bf16.gmra.mrb[44].mxu0 %v7053_v51 }
 0x17a   : > { %1718 = vmatmul.mubr.bf16.gmra.mrb[44].mxu1 %v779_v5 }
 0x1f0   : > { %v1423_v42 = vpop.f32.mrb[0].mxu0  ;;  %v1536_v51 = vpop.f32.mrb[0].mxu1 }
 0x1f1   : > { %v7147_v22 = vadd.f32 %v1423_v42, %v7138_v48  ;;  %v7149_v37 = vpop.f32.mrb[1].mxu0  ;;  %v1538_v38 = vpop.f32.mrb[1].mxu1  ;;  %v7155_v6 = vadd.f32 %v1536_v51, %v7144_v41 }
 0x1f2   : > { %v7152_v45 = vadd.f32 %v1538_v38, %v7141_v52  ;;  %v1427_v50 = vpop.f32.mrb[2].mxu0  ;;  %v1540_v3 = vpop.f32.mrb[2].mxu1 }
 0x1f3   : > { %9378 = vst [vmem:[#allocation17_spill] sm:$0xff] %v7147_v22  ;;  %9380 = vst [vmem:[#allocation19_spill] sm:$0xff] %v7155_v6  ;;  %v7157_v16 = vpop.f32.mrb[3].mxu0  ;;  %v7159_v29 = vpop.f32.mrb[3].mxu1  ;;  %v1729_v31 = vmul.f32 %v7147_v22, %v7147_v22  ;;  %v7164_v54 = vadd.f32 %v1427_v50, %v7138_v48  ;;  %v1876_v57 = vmul.f32 %v7155_v6, %v7155_v6 }
 0x1f4   : > { %9379 = vst [vmem:[#allocation18_spill] sm:$0xff] %v7152_v45  ;;  %v7168_v12 = vmul.f32 %v7152_v45, %v7152_v45  ;;  %v7180_v61 = vadd.f32 %v1540_v3, %v7144_v41 }
 0x1f5   : > { %9381 = vst [vmem:[#allocation20_spill] sm:$0xff] %v7164_v54  ;;  %2279 = vrot.lane.b32.xlu0 %v1729_v31, %s6519_s2  ;;  %v1730_v1 = vmul.f32 %v7164_v54, %v7164_v54  ;;  %v1746_v43 = vsel %vm1745_vm0, %v1729_v31, 0.0  ;;  %v1892_v38 = vsel %vm1745_vm0, %v1876_v57, 0.0 }
 0x1f6   : > { %3687 = vrot.lane.b32.xlu1 %v7168_v12, %s6519_s2  ;;  %9382 = vst [vmem:[#allocation21_spill] sm:$0xff] %v7180_v61  ;;  %v1877_v60 = vmul.f32 %v7180_v61, %v7180_v61 }
 0x1f8   : > { %v1433_v9 = vpop.f32.mrb[4].mxu0  ;;  %v7192_v11 = vpop.f32.mrb[4].mxu1 }
 0x1f9   : > { %2473 = vrot.lane.b32.xlu0 %v1876_v57, %s6519_s2  ;;  %v7186_v10 = vadd.f32 %v1433_v9, %v7138_v48  ;;  %v1435_v56 = vpop.f32.mrb[5].mxu0  ;;  %v7197_v40 = vpop.f32.mrb[5].mxu1 }
 0x1fa   : > { %2281 = vrot.lane.b32.xlu1 %v1730_v1, %s6519_s2  ;;  %v7190_v49 = vadd.f32 %v1435_v56, %v7177_v13  ;;  %v1437_v63 = vpop.f32.mrb[6].mxu0  ;;  %v7204_v46 = vpop.f32.mrb[6].mxu1  ;;  %v1749_v56 = vsel %vm1745_vm0, %v1730_v1, 0.0 }
 0x1fb   : > { %9383 = vst [vmem:[#allocation22_spill] sm:$0xff] %v7186_v10  ;;  %v7195_v35 = vadd.f32 %v1437_v63, %v7138_v48  ;;  %v1439_v4 = vpop.f32.mrb[7].mxu0  ;;  %v7206_v39 = vpop.f32.mrb[7].mxu1 }
 0x1fc   : > { %9384 = vst [vmem:[#allocation23_spill] sm:$0xff] %v7190_v49  ;;  %v7202_v32 = vadd.f32 %v1439_v4, %v7177_v13 }
 0x1fd   : > { %9385 = vst [vmem:[#allocation24_spill] sm:$0xff] %v7195_v35 }
 0x1fe   : > { %9386 = vst [vmem:[#allocation25_spill] sm:$0xff] %v7202_v32  ;;  %2475 = vrot.lane.b32.xlu1 %v1877_v60, %s6519_s2 }
 0x200   : > { %v1443_v47 = vpop.f32.mrb[8].mxu0 }
 0x201   : > { %v7210_v8 = vadd.f32 %v1443_v47, %v7138_v48  ;;  %v1445_v44 = vpop.f32.mrb[9].mxu0 }
 0x202   : > { %v7213_v20 = vadd.f32 %v1445_v44, %v7177_v13  ;;  %v1447_v18 = vpop.f32.mrb[10].mxu0 }
 0x203   : > { %9387 = vst [vmem:[#allocation26_spill] sm:$0xff] %v7210_v8  ;;  %v7216_v17 = vadd.f32 %v1447_v18, %v7138_v48  ;;  %v1449_v23 = vpop.f32.mrb[11].mxu0 }
 0x204   : > { %9388 = vst [vmem:[#allocation27_spill] sm:$0xff] %v7213_v20  ;;  %v7219_v28 = vadd.f32 %v1449_v23, %v7177_v13 }
 0x205   : > { %9389 = vst [vmem:[#allocation28_spill] sm:$0xff] %v7216_v17 }
 0x206   : > { %9390 = vst [vmem:[#allocation29_spill] sm:$0xff] %v7219_v28 }
 0x208   : > { %v1453_v2 = vpop.f32.mrb[12].mxu0 }
 0x209   : > { %v7222_v24 = vadd.f32 %v1453_v2, %v7138_v48  ;;  %v1455_v58 = vpop.f32.mrb[13].mxu0  ;;  %v1895_v2 = vsel %vm1745_vm0, %v1877_v60, 0.0  ;;  %v7286_v60 = vadd.f32 %v7149_v37, %v7177_v13  ;;  %v7303_v37 = vadd.f32 %v7157_v16, %v7177_v13 }
 0x20a   : > { %v7225_v34 = vadd.f32 %v1455_v58, %v7177_v13  ;;  %v1457_v27 = vpop.f32.mrb[14].mxu0 }
 0x20b   : > { %9391 = vst [vmem:[#allocation30_spill] sm:$0xff] %v7222_v24  ;;  %v7228_v33 = vadd.f32 %v1457_v27, %v7138_v48  ;;  %v1459_v14 = vpop.f32.mrb[15].mxu0  ;;  %9410 = vst [vmem:[#allocation49_spill] sm:$0xff] %v7286_v60 }
 0x20c   : > { %9392 = vst [vmem:[#allocation31_spill] sm:$0xff] %v7225_v34  ;;  %v7231_v19 = vadd.f32 %v1459_v14, %v7177_v13  ;;  %v897_v14 = vsub.s32 4, %v6927_v53  ;;  %9412 = vst [vmem:[#allocation51_spill] sm:$0xff] %v7303_v37 }
 0x20d   : > { %9393 = vst [vmem:[#allocation32_spill] sm:$0xff] %v7228_v33 }
 0x20e   : > { %9394 = vst [vmem:[#allocation33_spill] sm:$0xff] %v7231_v19 }
 0x210   : > { %v1463_v30 = vpop.f32.mrb[16].mxu0 }
 0x211   : > { %v7234_v62 = vadd.f32 %v1463_v30, %v7138_v48  ;;  %v1465_v55 = vpop.f32.mrb[17].mxu0 }
 0x212   : > { %v7237_v36 = vadd.f32 %v1465_v55, %v7177_v13  ;;  %v1467_v21 = vpop.f32.mrb[18].mxu0 }
 0x213   : > { %9395 = vst [vmem:[#allocation34_spill] sm:$0xff] %v7234_v62  ;;  %v7240_v26 = vadd.f32 %v1467_v21, %v7138_v48  ;;  %v1469_v5 = vpop.f32.mrb[19].mxu0  ;;  %v901_v21 = vsub.s32 5, %v6927_v53  ;;  %v2942_v53 = vmul.f32 %v7286_v60, %v7286_v60 }
 0x214   : > { %9396 = vst [vmem:[#allocation35_spill] sm:$0xff] %v7237_v36  ;;  %v7243_v25 = vadd.f32 %v1469_v5, %v7177_v13 }
 0x215   : > { %9397 = vst [vmem:[#allocation36_spill] sm:$0xff] %v7240_v26 }
 0x216   : > { %9398 = vst [vmem:[#allocation37_spill] sm:$0xff] %v7243_v25 }
 0x218   : > { %1747 = vadd.xlane.f32.xlu0 %v1746_v43  ;;  %v1473_v59 = vpop.f32.mrb[20].mxu0 }
 0x219   : > { %v7247_v7 = vadd.f32 %v1473_v59, %v7138_v48  ;;  %v1475_v15 = vpop.f32.mrb[21].mxu0 }
 0x21a   : > { %v7250_v42 = vadd.f32 %v1475_v15, %v7177_v13  ;;  %v1477_v51 = vpop.f32.mrb[22].mxu0  ;;  %v7292_v15 = vrot.slane %v7132_v0, %v897_v14 }
 0x21b   : > { %9399 = vst [vmem:[#allocation38_spill] sm:$0xff] %v7247_v7  ;;  %v7254_v50 = vadd.f32 %v1477_v51, %v7138_v48  ;;  %v1479_v3 = vpop.f32.mrb[23].mxu0  ;;  %v7295_v51 = vrot.slane %v7132_v0, %v901_v21 }
 0x21c   : > { %9400 = vst [vmem:[#allocation39_spill] sm:$0xff] %v7250_v42  ;;  %1893 = vadd.xlane.f32.xlu0 %v1892_v38  ;;  %v7257_v9 = vadd.f32 %v1479_v3, %v7177_v13 }
 0x21d   : > { %9401 = vst [vmem:[#allocation40_spill] sm:$0xff] %v7254_v50 }
 0x21e   : > { %9402 = vst [vmem:[#allocation41_spill] sm:$0xff] %v7257_v9 }
 0x220   : > { %v1483_v31 = vpop.f32.mrb[24].mxu0 }
 0x221   : > { %v7261_v63 = vadd.f32 %v1483_v31, %v7138_v48  ;;  %v1485_v4 = vpop.f32.mrb[25].mxu0 }
 0x222   : > { %1750 = vadd.xlane.f32.xlu1 %v1749_v56  ;;  %v7264_v47 = vadd.f32 %v1485_v4, %v7177_v13  ;;  %v1487_v57 = vpop.f32.mrb[26].mxu0 }
 0x223   : > { %9403 = vst [vmem:[#allocation42_spill] sm:$0xff] %v7261_v63  ;;  %v7267_v44 = vadd.f32 %v1487_v57, %v7138_v48  ;;  %v1489_v18 = vpop.f32.mrb[27].mxu0 }
 0x224   : > { %9404 = vst [vmem:[#allocation43_spill] sm:$0xff] %v7264_v47  ;;  %v7270_v23 = vadd.f32 %v1489_v18, %v7177_v13 }
 0x225   : > { %9405 = vst [vmem:[#allocation44_spill] sm:$0xff] %v7267_v44 }
 0x226   : > { %9406 = vst [vmem:[#allocation45_spill] sm:$0xff] %v7270_v23  ;;  %1896 = vadd.xlane.f32.xlu1 %v1895_v2 }
 0x228   : > { %v1493_v1 = vpop.f32.mrb[28].mxu0 }
 0x229   : > { %v7274_v58 = vadd.f32 %v1493_v1, %v7138_v48  ;;  %v1495_v27 = vpop.f32.mrb[29].mxu0 }
 0x22a   : > { %v7278_v30 = vadd.f32 %v1495_v27, %v7177_v13  ;;  %v1497_v55 = vpop.f32.mrb[30].mxu0 }
 0x22b   : > { %9407 = vst [vmem:[#allocation46_spill] sm:$0xff] %v7274_v58  ;;  %v7282_v5 = vadd.f32 %v1497_v55, %v7138_v48  ;;  %v1499_v43 = vpop.f32.mrb[31].mxu0  ;;  %v7299_v48 = vpop.f32.mrb[8].mxu1 }
 0x22c   : > { %9408 = vst [vmem:[#allocation47_spill] sm:$0xff] %v7278_v30  ;;  %v7289_v59 = vadd.f32 %v1499_v43, %v7177_v13  ;;  %v2943_v13 = vmul.f32 %v7303_v37, %v7303_v37 }
 0x22d   : > { %9409 = vst [vmem:[#allocation48_spill] sm:$0xff] %v7282_v5 }
 0x22e   : > { %9411 = vst [vmem:[#allocation50_spill] sm:$0xff] %v7289_v59 }
 0x230   : > { %v1649_v38 = vpop.f32.mrb[32].mxu0 }
 0x231   : > { %v1650_v3 = vadd.f32 %v1649_v38, %v7292_v15  ;;  %v1651_v31 = vpop.f32.mrb[33].mxu0 }
 0x232   : > { %v1652_v56 = vadd.f32 %v1651_v31, %v7295_v51  ;;  %3493 = vrot.lane.b32.xlu0 %v2942_v53, %s6519_s2  ;;  %v1653_v0 = vpop.f32.mrb[34].mxu0 }
 0x233   : > { %v7308_v4 = vpack.c.bf16 %v1650_v3, %v1650_v3  ;;  %v1654_v57 = vadd.f32 %v1653_v0, %v7292_v15  ;;  %v1655_v18 = vpop.f32.mrb[35].mxu0 }
 0x234   : > { %v7311_v2 = vpack.c.bf16 %v1652_v56, %v1652_v56  ;;  %v1656_v1 = vadd.f32 %v1655_v18, %v7295_v51 }
 0x235   : > { %9413 = vst [vmem:[#allocation52_spill] sm:$0xff] %v7308_v4  ;;  %2246 = vst.msk [vmem:[%s7315_s29] sm:$0xf] %vm2085_vm1, %v7308_v4  ;;  %v7320_v16 = vpack.c.bf16 %v1654_v57, %v1654_v57 }
 0x236   : > { %9414 = vst [vmem:[#allocation53_spill] sm:$0xff] %v7311_v2  ;;  %5561 = vst.msk [vmem:[%s7315_s29 + $0x80] sm:$0xf] %vm2085_vm1, %v7311_v2  ;;  %v7327_v27 = vpack.c.bf16 %v1656_v1, %v1656_v1  ;;  %v7385_v2 = vadd.f32 %v7159_v29, %v7141_v52  ;;  %v7404_v29 = vadd.f32 %v7192_v11, %v7144_v41 }
 0x237   : > { %9415 = vst [vmem:[#allocation54_spill] sm:$0xff] %v7320_v16  ;;  %2247 = vst.msk [vmem:[%s7315_s29 + $0x4] sm:$0xf] %vm2085_vm1, %v7320_v16  ;;  %3495 = vrot.lane.b32.xlu1 %v2943_v13, %s6519_s2 }
 0x238   : > { %9416 = vst [vmem:[#allocation55_spill] sm:$0xff] %v7327_v27  ;;  %5562 = vst.msk [vmem:[%s7315_s29 + $0x84] sm:$0xf] %vm2085_vm1, %v7327_v27  ;;  %v1659_v14 = vpop.f32.mrb[36].mxu0 }
 0x239   : > { %v1660_v55 = vadd.f32 %v1659_v14, %v7292_v15  ;;  %v1661_v21 = vpop.f32.mrb[37].mxu0  ;;  %9423 = vst [vmem:[#allocation62_spill] sm:$0xff] %v7385_v2  ;;  %9426 = vst [vmem:[#allocation65_spill] sm:$0xff] %v7404_v29 }
 0x23a   : > { %v1662_v43 = vadd.f32 %v1661_v21, %v7295_v51  ;;  %v1663_v38 = vpop.f32.mrb[38].mxu0 }
 0x23b   : > { %v7338_v3 = vpack.c.bf16 %v1660_v55, %v1660_v55  ;;  %v1664_v31 = vadd.f32 %v1663_v38, %v7292_v15  ;;  %v1665_v56 = vpop.f32.mrb[39].mxu0  ;;  %v7360_v55 = vpop.f32.mrb[9].mxu1 }
 0x23c   : > { %v7341_v0 = vpack.c.bf16 %v1662_v43, %v1662_v43  ;;  %v1666_v57 = vadd.f32 %v1665_v56, %v7295_v51  ;;  %v7363_v38 = vpop.f32.mrb[10].mxu1 }
 0x23d   : > { %9417 = vst [vmem:[#allocation56_spill] sm:$0xff] %v7338_v3  ;;  %2248 = vst.msk [vmem:[%s7315_s29 + $0x8] sm:$0xf] %vm2085_vm1, %v7338_v3  ;;  %v7347_v18 = vpack.c.bf16 %v1664_v31, %v1664_v31  ;;  %v7377_v27 = vpop.f32.mrb[11].mxu1 }
 0x23e   : > { %9418 = vst [vmem:[#allocation57_spill] sm:$0xff] %v7341_v0  ;;  %5563 = vst.msk [vmem:[%s7315_s29 + $0x88] sm:$0xf] %vm2085_vm1, %v7341_v0  ;;  %v7352_v1 = vpack.c.bf16 %v1666_v57, %v1666_v57 }
 0x23f   : > { %9419 = vst [vmem:[#allocation58_spill] sm:$0xff] %v7347_v18  ;;  %2249 = vst.msk [vmem:[%s7315_s29 + $0xc] sm:$0xf] %vm2085_vm1, %v7347_v18 }
 0x240   : > { %9420 = vst [vmem:[#allocation59_spill] sm:$0xff] %v7352_v1  ;;  %5564 = vst.msk [vmem:[%s7315_s29 + $0x8c] sm:$0xf] %vm2085_vm1, %v7352_v1  ;;  %v1669_v14 = vpop.f32.mrb[40].mxu0  ;;  %v2958_v1 = vsel %vm1745_vm0, %v2942_v53, 0.0 }
 0x241   : > { %v1670_v21 = vadd.f32 %v1669_v14, %v7292_v15  ;;  %v1671_v43 = vpop.f32.mrb[41].mxu0 }
 0x242   : > { %v1672_v31 = vadd.f32 %v1671_v43, %v7295_v51  ;;  %v1673_v14 = vpop.f32.mrb[42].mxu0 }
 0x243   : > { %v7366_v56 = vpack.c.bf16 %v1670_v21, %v1670_v21  ;;  %v3104_v21 = vsel %vm1745_vm0, %v7168_v12, 0.0  ;;  %v1674_v43 = vadd.f32 %v1673_v14, %v7292_v15  ;;  %v2961_v12 = vsel %vm1745_vm0, %v2943_v13, 0.0 }
 0x244   : > { %v7368_v57 = vpack.c.bf16 %v1672_v31, %v1672_v31  ;;  %v1675_v31 = vpop.f32.mrb[43].mxu0  ;;  %v1878_v13 = vmul.f32 %v7404_v29, %v7404_v29 }
 0x245   : > { %9421 = vst [vmem:[#allocation60_spill] sm:$0xff] %v7366_v56  ;;  %2250 = vst.msk [vmem:[%s7315_s29 + $0x10] sm:$0xf] %vm2085_vm1, %v7366_v56  ;;  %v1676_v0 = vadd.f32 %v1675_v31, %v7295_v51  ;;  %v7424_v31 = vadd.f32 %v7204_v46, %v7144_v41 }
 0x246   : > { %9422 = vst [vmem:[#allocation61_spill] sm:$0xff] %v7368_v57  ;;  %5565 = vst.msk [vmem:[%s7315_s29 + $0x90] sm:$0xf] %vm2085_vm1, %v7368_v57  ;;  %v7387_v57 = vpack.c.bf16 %v1674_v43, %v1674_v43  ;;  %v2944_v43 = vmul.f32 %v7190_v49, %v7190_v49 }
 0x247   : > { %v7389_v53 = vpack.c.bf16 %v1676_v0, %v1676_v0  ;;  %v1731_v0 = vmul.f32 %v7186_v10, %v7186_v10  ;;  %9428 = vst [vmem:[#allocation67_spill] sm:$0xff] %v7424_v31 }
 0x248   : > { %9424 = vst [vmem:[#allocation63_spill] sm:$0xff] %v7387_v57  ;;  %2251 = vst.msk [vmem:[%s7315_s29 + $0x14] sm:$0xf] %vm2085_vm1, %v7387_v57  ;;  %v2945_v57 = vmul.f32 %v7202_v32, %v7202_v32 }
 0x249   : > { %9425 = vst [vmem:[#allocation64_spill] sm:$0xff] %v7389_v53  ;;  %5566 = vst.msk [vmem:[%s7315_s29 + $0x94] sm:$0xf] %vm2085_vm1, %v7389_v53  ;;  %v2964_v53 = vsel %vm1745_vm0, %v2944_v43, 0.0 }
 0x24a   : > { %v2967_v18 = vsel %vm1745_vm0, %v2945_v57, 0.0 }
 0x251   : > { %2959 = vadd.xlane.f32.xlu0 %v2958_v1  ;;  %v3089_v1 = vmul.f32 %v7385_v2, %v7385_v2 }
 0x253   : > { %v3107_v14 = vsel %vm1745_vm0, %v3089_v1, 0.0 }
 0x255   : > { %3105 = vadd.xlane.f32.xlu0 %v3104_v21  ;;  %v7414_v21 = vadd.f32 %v7197_v40, %v7141_v52  ;;  %v1879_v40 = vmul.f32 %v7424_v31, %v7424_v31 }
 0x257   : > { %9427 = vst [vmem:[#allocation66_spill] sm:$0xff] %v7414_v21  ;;  %v3090_v11 = vmul.f32 %v7414_v21, %v7414_v21 }
 0x259   : > { %v3110_v46 = vsel %vm1745_vm0, %v3090_v11, 0.0 }
 0x25b   : > { %2962 = vadd.xlane.f32.xlu1 %v2961_v12  ;;  %v1732_v12 = vmul.f32 %v7195_v35, %v7195_v35 }
 0x25f   : > { %3108 = vadd.xlane.f32.xlu1 %v3107_v14  ;;  %v1898_v14 = vsel %vm1745_vm0, %v1878_v13, 0.0 }
 0x267   : > { %v7439_v16 = vpop.permute.xlu0 %2279 }
 0x268   : > { %9429 = vst [vmem:[#allocation68_spill] sm:$0xff] %v7439_v16  ;;  %v7441_v56 = vpop.permute.xlu1 %3687  ;;  %v1901_v16 = vsel %vm1745_vm0, %v1879_v40, 0.0 }
 0x269   : > { %9430 = vst [vmem:[#allocation69_spill] sm:$0xff] %v7441_v56  ;;  %v7455_v56 = vadd.f32 %v7299_v48, %v7144_v41 }
 0x26b   : > { %3689 = vrot.lane.b32.xlu0 %v3089_v1, %s6519_s2  ;;  %v1752_v1 = vsel %vm1745_vm0, %v1731_v0, 0.0  ;;  %9434 = vst [vmem:[#allocation73_spill] sm:$0xff] %v7455_v56 }
 0x270   : > { %2283 = vrot.lane.b32.xlu1 %v1731_v0, %s6519_s2  ;;  %v7443_v0 = vpop.permute.xlu0 %2473 }
 0x271   : > { %9431 = vst [vmem:[#allocation70_spill] sm:$0xff] %v7443_v0 }
 0x274   : > { %2477 = vrot.lane.b32.xlu1 %v1878_v13, %s6519_s2  ;;  %v7445_v13 = vpop.permute.xlu1 %2281 }
 0x275   : > { %9432 = vst [vmem:[#allocation71_spill] sm:$0xff] %v7445_v13  ;;  %v7472_v13 = vstv %s1875_s13 }
 0x278   : > { %3497 = vrot.lane.b32.xlu1 %v2944_v43, %s6519_s2 }
 0x27c   : > { %3691 = vrot.lane.b32.xlu1 %v3090_v11, %s6519_s2 }
 0x280   : > { %2285 = vrot.lane.b32.xlu1 %v1732_v12, %s6519_s2 }
 0x284   : > { %2479 = vrot.lane.b32.xlu1 %v1879_v40, %s6519_s2 }
 0x28a   : > { %1753 = vadd.xlane.f32.xlu0 %v1752_v1 }
 0x28e   : > { %1899 = vadd.xlane.f32.xlu0 %v1898_v14 }
 0x292   : > { %2965 = vadd.xlane.f32.xlu0 %v2964_v53  ;;  %v1755_v53 = vsel %vm1745_vm0, %v1732_v12, 0.0  ;;  %v7459_v12 = vmul.f32 %v7210_v8, %v7210_v8 }
 0x296   : > { %3111 = vadd.xlane.f32.xlu0 %v3110_v46  ;;  %v7448_v46 = vpop.f32.mrb[12].mxu1 }
 0x29a   : > { %2968 = vadd.xlane.f32.xlu0 %v2967_v18  ;;  %v7450_v18 = vpop.permute.xlu1 %2475 }
 0x29b   : > { %9433 = vst [vmem:[#allocation72_spill] sm:$0xff] %v7450_v18 }
 0x2a5   : > { %v1748_v1 = vpop.xlane.xlu0 %1747 }
 0x2a6   : > { %v1794_v43 = vmax.f32 %v1748_v1, 1e-24 }
 0x2a8   : > { %6127 = vrsqrt.f32 %v1794_v43  ;;  %1756 = vadd.xlane.f32.xlu1 %v1755_v53  ;;  %v7465_v53 = vmul.f32 %v7455_v56, %v7455_v56 }
 0x2a9   : > { %v1894_v11 = vpop.xlane.xlu0 %1893 }
 0x2aa   : > { %v1940_v14 = vmax.f32 %v1894_v11, 1e-24 }
 0x2ac   : > { %6129 = vrsqrt.f32 %v1940_v14  ;;  %1902 = vadd.xlane.f32.xlu1 %v1901_v16  ;;  %v7467_v16 = vstv %s1728_s12 }
 0x2af   : > { %v1751_v1 = vpop.xlane.xlu1 %1750 }
 0x2b0   : > { %v1795_v43 = vmax.f32 %v1751_v1, 1e-24  ;;  %2287 = vrot.lane.b32.xlu0 %v7459_v12, %s6519_s2 }
 0x2b2   : > { %v6128_v40 = vpop.eup %6127  ;;  %6131 = vrsqrt.f32 %v1795_v43  ;;  %v7478_v43 = vadd.f32 %v7206_v39, %v7141_v52 }
 0x2b3   : > { %v1826_v48 = vmul.f32 8.0, %v6128_v40  ;;  %v1897_v11 = vpop.xlane.xlu1 %1896 }
 0x2b4   : > { %v1941_v14 = vmax.f32 %v1897_v11, 1e-24  ;;  %2481 = vrot.lane.b32.xlu0 %v7465_v53, %s6519_s2  ;;  %9435 = vst [vmem:[#allocation74_spill] sm:$0xff] %v7478_v43 }
 0x2b5   : > { %v1843_v1 = vmul.f32 %v7467_v16, %v1826_v48 }
 0x2b6   : > { %v6130_v18 = vpop.eup %6129  ;;  %6133 = vrsqrt.f32 %v1941_v14 }
 0x2b7   : > { %v1859_v0 = vmul.f32 %v1843_v1, %v7147_v22  ;;  %v1972_v59 = vmul.f32 8.0, %v6130_v18  ;;  %v7487_v18 = vpop.f32.mrb[13].mxu1 }
 0x2b9   : > { %v5672_v3 = vpack.c.bf16 %v1859_v0, %v1859_v0  ;;  %v1989_v4 = vmul.f32 %v7472_v13, %v1972_v59  ;;  %v7497_v59 = vmul.f32 %v7478_v43, %v7478_v43 }
 0x2bb   : > { %2086 = vst.msk [vmem:[%s7481_s14] sm:$0xf] %vm2085_vm1, %v5672_v3  ;;  %v2005_v40 = vmul.f32 %v1989_v4, %v7155_v6  ;;  %v7499_v4 = vpop.f32.mrb[14].mxu1 }
 0x2bc   : > { %v6132_v48 = vpop.eup %6131  ;;  %v7501_v0 = vpop.f32.mrb[15].mxu1 }
 0x2bd   : > { %v5688_v11 = vpack.c.bf16 %v2005_v40, %v2005_v40  ;;  %v1827_v14 = vmul.f32 8.0, %v6132_v48  ;;  %3499 = vrot.lane.b32.xlu1 %v2945_v57, %s6519_s2  ;;  %v7506_v40 = vpop.f32.mrb[16].mxu1 }
 0x2be   : > { %v7508_v48 = vpop.f32.mrb[17].mxu1 }
 0x2bf   : > { %2166 = vst.msk [vmem:[%s7490_s9] sm:$0xf] %vm2085_vm1, %v5688_v11  ;;  %v1844_v39 = vmul.f32 %v7467_v16, %v1827_v14  ;;  %v7511_v6 = vpop.f32.mrb[18].mxu1 }
 0x2c0   : > { %v6134_v3 = vpop.eup %6133  ;;  %v7513_v22 = vpop.f32.mrb[19].mxu1 }
 0x2c1   : > { %v1860_v57 = vmul.f32 %v1844_v39, %v7164_v54  ;;  %v1973_v1 = vmul.f32 8.0, %v6134_v3  ;;  %3693 = vrot.lane.b32.xlu1 %v7497_v59, %s6519_s2  ;;  %v7518_v54 = vpop.f32.mrb[20].mxu1 }
 0x2c2   : > { %v7520_v3 = vpop.f32.mrb[21].mxu1 }
 0x2c3   : > { %v5673_v11 = vpack.c.bf16 %v1860_v57, %v1860_v57  ;;  %v1990_v14 = vmul.f32 %v7472_v13, %v1973_v1  ;;  %9436 = vst [vmem:[#allocation75_spill] sm:$0xff] %v7520_v3  ;;  %v7522_v30 = vpop.f32.mrb[22].mxu1 }
 0x2c4   : > { %9437 = vst [vmem:[#allocation76_spill] sm:$0xff] %v7522_v30  ;;  %v7524_v23 = vpop.f32.mrb[23].mxu1 }
 0x2c5   : > { %2087 = vst.msk [vmem:[%s7481_s14 + $0x4] sm:$0xf] %vm2085_vm1, %v5673_v11  ;;  %v2006_v39 = vmul.f32 %v1990_v14, %v7180_v61  ;;  %9438 = vst [vmem:[#allocation77_spill] sm:$0xff] %v7524_v23  ;;  %v7528_v57 = vpop.f32.mrb[24].mxu1  ;;  %v1679_v14 = vpop.f32.mrb[44].mxu0 }
 0x2c6   : > { %9439 = vst [vmem:[#allocation78_spill] sm:$0xff] %v7528_v57  ;;  %v7530_v1 = vpop.f32.mrb[25].mxu1  ;;  %v1681_v44 = vpop.f32.mrb[45].mxu0 }
 0x2c7   : > { %v5689_v5 = vpack.c.bf16 %v2006_v39, %v2006_v39  ;;  %9440 = vst [vmem:[#allocation79_spill] sm:$0xff] %v7530_v1  ;;  %v7532_v58 = vpop.f32.mrb[26].mxu1  ;;  %v1683_v39 = vpop.f32.mrb[46].mxu0 }
 0x2c8   : > { %9441 = vst [vmem:[#allocation80_spill] sm:$0xff] %v7532_v58  ;;  %v7534_v11 = vpop.f32.mrb[27].mxu1  ;;  %v1685_v63 = vpop.f32.mrb[47].mxu0  ;;  %v1680_v58 = vadd.f32 %v1679_v14, %v7292_v15  ;;  %v1684_v50 = vadd.f32 %v1683_v39, %v7292_v15 }
 0x2c9   : > { %2167 = vst.msk [vmem:[%s7490_s9 + $0x4] sm:$0xf] %vm2085_vm1, %v5689_v5  ;;  %9442 = vst [vmem:[#allocation81_spill] sm:$0xff] %v7534_v11  ;;  %v7536_v61 = vpop.f32.mrb[28].mxu1  ;;  %v1758_v5 = vsel %vm1745_vm0, %v7459_v12, 0.0  ;;  %v1686_v12 = vadd.f32 %v1685_v63, %v7295_v51 }
 0x2ca   : > { %9443 = vst [vmem:[#allocation82_spill] sm:$0xff] %v7536_v61  ;;  %v7538_v47 = vpop.f32.mrb[29].mxu1  ;;  %v7549_v61 = vpack.c.bf16 %v1680_v58, %v1680_v58  ;;  %v7560_v58 = vpack.c.bf16 %v1684_v50, %v1684_v50 }
 0x2cb   : > { %9444 = vst [vmem:[#allocation83_spill] sm:$0xff] %v7538_v47  ;;  %v7540_v9 = vpop.f32.mrb[30].mxu1  ;;  %v1904_v47 = vsel %vm1745_vm0, %v7465_v53, 0.0 }
 0x2cc   : > { %9445 = vst [vmem:[#allocation84_spill] sm:$0xff] %v7540_v9  ;;  %v7544_v57 = vpop.f32.mrb[31].mxu1  ;;  %9447 = vst [vmem:[#allocation86_spill] sm:$0xff] %v7549_v61  ;;  %v1682_v9 = vadd.f32 %v1681_v44, %v7295_v51  ;;  %v7562_v44 = vpack.c.bf16 %v1686_v12, %v1686_v12 }
 0x2cd   : > { %9446 = vst [vmem:[#allocation85_spill] sm:$0xff] %v7544_v57  ;;  %v1689_v1 = vpop.f32.mrb[32].mxu1  ;;  %2252 = vst.msk [vmem:[%s7315_s29 + $0x18] sm:$0xf] %vm2085_vm1, %v7549_v61 }
 0x2ce   : > { %v1691_v11 = vpop.f32.mrb[33].mxu1  ;;  %v7557_v14 = vpack.c.bf16 %v1682_v9, %v1682_v9  ;;  %9449 = vst [vmem:[#allocation88_spill] sm:$0xff] %v7560_v58  ;;  %9450 = vst [vmem:[#allocation89_spill] sm:$0xff] %v7562_v44 }
 0x2cf   : > { %v1693_v23 = vpop.f32.mrb[34].mxu1  ;;  %v1692_v3 = vadd.f32 %v1691_v11, %v7295_v51  ;;  %2253 = vst.msk [vmem:[%s7315_s29 + $0x1c] sm:$0xf] %vm2085_vm1, %v7560_v58  ;;  %5568 = vst.msk [vmem:[%s7315_s29 + $0x9c] sm:$0xf] %vm2085_vm1, %v7562_v44 }
 0x2d0   : > { %v1695_v30 = vpop.f32.mrb[35].mxu1  ;;  %9448 = vst [vmem:[#allocation87_spill] sm:$0xff] %v7557_v14  ;;  %5567 = vst.msk [vmem:[%s7315_s29 + $0x98] sm:$0xf] %vm2085_vm1, %v7557_v14  ;;  %v1694_v9 = vadd.f32 %v1693_v23, %v7292_v15 }
 0x2d1   : > { %v1699_v57 = vpop.f32.mrb[36].mxu1  ;;  %v1696_v61 = vadd.f32 %v1695_v30, %v7295_v51  ;;  %v7582_v30 = vpop.permute.xlu0 %3493 }
 0x2d2   : > { %v1701_v53 = vpop.f32.mrb[37].mxu1  ;;  %v1700_v50 = vadd.f32 %v1699_v57, %v7292_v15  ;;  %9451 = vst [vmem:[#allocation90_spill] sm:$0xff] %v7582_v30  ;;  %v7589_v44 = vpack.c.bf16 %v1694_v9, %v1694_v9 }
 0x2d3   : > { %1759 = vadd.xlane.f32.xlu0 %v1758_v5  ;;  %v1690_v5 = vadd.f32 %v1689_v1, %v7292_v15  ;;  %v1703_v39 = vpop.f32.mrb[38].mxu1  ;;  %v7591_v57 = vpack.c.bf16 %v1696_v61, %v1696_v61 }
 0x2d4   : > { %v1705_v1 = vpop.f32.mrb[39].mxu1  ;;  %v1704_v12 = vadd.f32 %v1703_v39, %v7292_v15  ;;  %2255 = vst.msk [vmem:[%s7315_s29 + $0x24] sm:$0xf] %vm2085_vm1, %v7589_v44 }
 0x2d5   : > { %v7567_v63 = vpack.c.bf16 %v1690_v5, %v1690_v5  ;;  %v1706_v11 = vadd.f32 %v1705_v1, %v7295_v51  ;;  %v1709_v23 = vpop.f32.mrb[40].mxu1  ;;  %v7587_v5 = vpack.c.bf16 %v1692_v3, %v1692_v3  ;;  %9453 = vst [vmem:[#allocation92_spill] sm:$0xff] %v7591_v57  ;;  %v7594_v1 = vpack.c.bf16 %v1700_v50, %v1700_v50 }
 0x2d6   : > { %v1711_v39 = vpop.f32.mrb[41].mxu1  ;;  %v7598_v58 = vpack.c.bf16 %v1704_v12, %v1704_v12  ;;  %5570 = vst.msk [vmem:[%s7315_s29 + $0xa4] sm:$0xf] %vm2085_vm1, %v7591_v57 }
 0x2d7   : > { %1905 = vadd.xlane.f32.xlu0 %v1904_v47  ;;  %v1702_v47 = vadd.f32 %v1701_v53, %v7295_v51  ;;  %2254 = vst.msk [vmem:[%s7315_s29 + $0x20] sm:$0xf] %vm2085_vm1, %v7567_v63  ;;  %9452 = vst [vmem:[#allocation91_spill] sm:$0xff] %v7587_v5  ;;  %v1710_v53 = vadd.f32 %v1709_v23, %v7292_v15  ;;  %v7600_v30 = vpack.c.bf16 %v1706_v11, %v1706_v11  ;;  %v1713_v3 = vpop.f32.mrb[42].mxu1 }
 0x2d8   : > { %5569 = vst.msk [vmem:[%s7315_s29 + $0xa0] sm:$0xf] %vm2085_vm1, %v7587_v5  ;;  %v1712_v9 = vadd.f32 %v1711_v39, %v7295_v51  ;;  %v1714_v50 = vadd.f32 %v1713_v3, %v7292_v15  ;;  %2256 = vst.msk [vmem:[%s7315_s29 + $0x28] sm:$0xf] %vm2085_vm1, %v7594_v1 }
 0x2d9   : > { %v7596_v14 = vpack.c.bf16 %v1702_v47, %v1702_v47  ;;  %9455 = vst [vmem:[#allocation94_spill] sm:$0xff] %v7600_v30  ;;  %v7611_v61 = vpack.c.bf16 %v1710_v53, %v1710_v53  ;;  %v1715_v47 = vpop.f32.mrb[43].mxu1  ;;  %2257 = vst.msk [vmem:[%s7315_s29 + $0x2c] sm:$0xf] %vm2085_vm1, %v7598_v58 }
 0x2da   : > { %5572 = vst.msk [vmem:[%s7315_s29 + $0xac] sm:$0xf] %vm2085_vm1, %v7600_v30  ;;  %v1716_v12 = vadd.f32 %v1715_v47, %v7295_v51  ;;  %v1719_v11 = vpop.f32.mrb[44].mxu1  ;;  %v7631_v53 = vpack.c.bf16 %v1712_v9, %v1712_v9  ;;  %v7633_v39 = vpack.c.bf16 %v1714_v50, %v1714_v50 }
 0x2db   : > { %9454 = vst [vmem:[#allocation93_spill] sm:$0xff] %v7596_v14  ;;  %5571 = vst.msk [vmem:[%s7315_s29 + $0xa8] sm:$0xf] %vm2085_vm1, %v7596_v14  ;;  %v1720_v3 = vadd.f32 %v1719_v11, %v7292_v15  ;;  %v1721_v57 = vpop.f32.mrb[45].mxu1 }
 0x2dc   : > { %2258 = vst.msk [vmem:[%s7315_s29 + $0x30] sm:$0xf] %vm2085_vm1, %v7611_v61  ;;  %9456 = vst [vmem:[#allocation95_spill] sm:$0xff] %v7631_v53  ;;  %v7636_v5 = vpack.c.bf16 %v1716_v12, %v1716_v12  ;;  %v1722_v47 = vadd.f32 %v1721_v57, %v7295_v51  ;;  %v1723_v30 = vpop.f32.mrb[46].mxu1 }
 0x2dd   : > { %9457 = vst [vmem:[#allocation96_spill] sm:$0xff] %v7633_v39  ;;  %5573 = vst.msk [vmem:[%s7315_s29 + $0xb0] sm:$0xf] %vm2085_vm1, %v7631_v53  ;;  %v7645_v9 = vpack.c.bf16 %v1720_v3, %v1720_v3  ;;  %v1724_v50 = vadd.f32 %v1723_v30, %v7292_v15  ;;  %v1725_v11 = vpop.f32.mrb[47].mxu1  ;;  %v3113_v30 = vsel %vm1745_vm0, %v7497_v59, 0.0 }
 0x2de   : > { %v2960_v23 = vpop.xlane.xlu0 %2959  ;;  %9458 = vst [vmem:[#allocation97_spill] sm:$0xff] %v7636_v5  ;;  %2259 = vst.msk [vmem:[%s7315_s29 + $0x34] sm:$0xf] %vm2085_vm1, %v7633_v39  ;;  %v7651_v12 = vpack.c.bf16 %v1722_v47, %v1722_v47  ;;  %v1726_v57 = vadd.f32 %v1725_v11, %v7295_v51  ;;  %v2946_v11 = vmul.f32 %v7213_v20, %v7213_v20 }
 0x2df   : > { %v3006_v14 = vmax.f32 %v2960_v23, 1e-24  ;;  %5574 = vst.msk [vmem:[%s7315_s29 + $0xb4] sm:$0xf] %vm2085_vm1, %v7636_v5  ;;  %2260 = vst.msk [vmem:[%s7315_s29 + $0x38] sm:$0xf] %vm2085_vm1, %v7645_v9  ;;  %v7657_v53 = vpack.c.bf16 %v1724_v50, %v1724_v50 }
 0x2e0   : > { %9459 = vst [vmem:[#allocation98_spill] sm:$0xff] %v7651_v12  ;;  %5575 = vst.msk [vmem:[%s7315_s29 + $0xb8] sm:$0xf] %vm2085_vm1, %v7651_v12  ;;  %v7662_v15 = vpack.c.bf16 %v1726_v57, %v1726_v57 }
 0x2e1   : > { %6135 = vrsqrt.f32 %v3006_v14  ;;  %9460 = vst [vmem:[#allocation99_spill] sm:$0xff] %v7657_v53  ;;  %v7664_v14 = vpop.permute.xlu1 %3495  ;;  %2261 = vst.msk [vmem:[%s7315_s29 + $0x3c] sm:$0xf] %vm2085_vm1, %v7657_v53 }
 0x2e2   : > { %v3106_v23 = vpop.xlane.xlu0 %3105  ;;  %9461 = vst [vmem:[#allocation100_spill] sm:$0xff] %v7662_v15  ;;  %9462 = vst [vmem:[#allocation101_spill] sm:$0xff] %v7664_v14 }
 0x2e3   : > { %v3152_v3 = vmax.f32 %v3106_v23, 1e-24  ;;  %5576 = vst.msk [vmem:[%s7315_s29 + $0xbc] sm:$0xf] %vm2085_vm1, %v7662_v15 }
 0x2e5   : > { %6137 = vrsqrt.f32 %v3152_v3  ;;  %3114 = vadd.xlane.f32.xlu1 %v3113_v30  ;;  %v7680_v30 = vadd.f32 %v7360_v55, %v7141_v52  ;;  %v7692_v55 = vadd.f32 %v7363_v38, %v7144_v41 }
 0x2e7   : > { %9463 = vst [vmem:[#allocation102_spill] sm:$0xff] %v7680_v30  ;;  %9464 = vst [vmem:[#allocation103_spill] sm:$0xff] %v7692_v55  ;;  %v1881_v38 = vmul.f32 %v7692_v55, %v7692_v55 }
 0x2e8   : > { %v2963_v51 = vpop.xlane.xlu1 %2962 }
 0x2e9   : > { %v3007_v47 = vmax.f32 %v2963_v51, 1e-24 }
 0x2eb   : > { %v6136_v50 = vpop.eup %6135  ;;  %6139 = vrsqrt.f32 %v3007_v47 }
 0x2ec   : > { %v3038_v57 = vmul.f32 8.0, %v6136_v50  ;;  %v3109_v23 = vpop.xlane.xlu1 %3108 }
 0x2ed   : > { %v3153_v5 = vmax.f32 %v3109_v23, 1e-24  ;;  %3501 = vrot.lane.b32.xlu0 %v2946_v11, %s6519_s2 }
 0x2ee   : > { %v3055_v59 = vmul.f32 %v3038_v57, %v7467_v16  ;;  %v3092_v57 = vmul.f32 %v7680_v30, %v7680_v30 }
 0x2ef   : > { %v6138_v3 = vpop.eup %6137  ;;  %6141 = vrsqrt.f32 %v3153_v5 }
 0x2f0   : > { %v3071_v51 = vmul.f32 %v3055_v59, %v7286_v60  ;;  %v3184_v47 = vmul.f32 8.0, %v6138_v3  ;;  %v1907_v60 = vsel %vm1745_vm0, %v1881_v38, 0.0 }
 0x2f2   : > { %v5752_v15 = vpack.c.bf16 %v3071_v51, %v3071_v51  ;;  %v3201_v12 = vmul.f32 %v3184_v47, %v7472_v13 }
 0x2f4   : > { %5497 = vst.msk [vmem:[%s7481_s14 + $0x80] sm:$0xf] %vm2085_vm1, %v5752_v15  ;;  %v3217_v50 = vmul.f32 %v3201_v12, %v7152_v45  ;;  %v1734_v12 = vmul.f32 %v7216_v17, %v7216_v17 }
 0x2f5   : > { %v6140_v23 = vpop.eup %6139 }
 0x2f6   : > { %v5768_v5 = vpack.c.bf16 %v3217_v50, %v3217_v50  ;;  %v3039_v14 = vmul.f32 8.0, %v6140_v23  ;;  %3695 = vrot.lane.b32.xlu1 %v3092_v57, %s6519_s2 }
 0x2f8   : > { %5529 = vst.msk [vmem:[%s7490_s9 + $0x80] sm:$0xf] %vm2085_vm1, %v5768_v5  ;;  %v3056_v15 = vmul.f32 %v3039_v14, %v7467_v16  ;;  %v2970_v5 = vsel %vm1745_vm0, %v2946_v11, 0.0  ;;  %v7722_v11 = vadd.f32 %v7377_v27, %v7141_v52  ;;  %v7736_v27 = vadd.f32 %v7448_v46, %v7144_v41 }
 0x2f9   : > { %v6142_v59 = vpop.eup %6141 }
 0x2fa   : > { %v3072_v3 = vmul.f32 %v3056_v15, %v7303_v37  ;;  %v3185_v51 = vmul.f32 8.0, %v6142_v59  ;;  %2289 = vrot.lane.b32.xlu1 %v1734_v12, %s6519_s2  ;;  %v3116_v15 = vsel %vm1745_vm0, %v3092_v57, 0.0  ;;  %v7712_v59 = vpop.permute.xlu0 %3689  ;;  %9466 = vst [vmem:[#allocation105_spill] sm:$0xff] %v7722_v11  ;;  %9468 = vst [vmem:[#allocation107_spill] sm:$0xff] %v7736_v27 }
 0x2fb   : > { %9465 = vst [vmem:[#allocation104_spill] sm:$0xff] %v7712_v59 }
 0x2fc   : > { %v5753_v47 = vpack.c.bf16 %v3072_v3, %v3072_v3  ;;  %v3202_v50 = vmul.f32 %v3185_v51, %v7472_v13  ;;  %v7714_v3 = vpop.permute.xlu1 %2283 }
 0x2fe   : > { %5498 = vst.msk [vmem:[%s7481_s14 + $0x84] sm:$0xf] %vm2085_vm1, %v5753_v47  ;;  %v3218_v23 = vmul.f32 %v3202_v50, %v7385_v2  ;;  %2483 = vrot.lane.b32.xlu1 %v1881_v38, %s6519_s2 }
 0x300   : > { %v5769_v14 = vpack.c.bf16 %v3218_v23, %v3218_v23  ;;  %v7716_v47 = vpop.permute.xlu1 %2477 }
 0x302   : > { %5530 = vst.msk [vmem:[%s7490_s9 + $0x84] sm:$0xf] %vm2085_vm1, %v5769_v14 }
 0x304   : > { %v7718_v23 = vpop.permute.xlu1 %3497 }
 0x30c   : > { %2971 = vadd.xlane.f32.xlu0 %v2970_v5  ;;  %v1761_v5 = vsel %vm1745_vm0, %v1734_v12, 0.0  ;;  %v1735_v12 = vmul.f32 %v7222_v24, %v7222_v24 }
 0x310   : > { %3117 = vadd.xlane.f32.xlu0 %v3116_v15 }
 0x317   : > { %v1754_v51 = vpop.xlane.xlu0 %1753 }
 0x318   : > { %v1796_v37 = vmax.f32 %v1754_v51, 1e-24 }
 0x31a   : > { %6143 = vrsqrt.f32 %v1796_v37  ;;  %v7727_v37 = vmul.f32 %v7722_v11, %v7722_v11 }
 0x31b   : > { %v1900_v50 = vpop.xlane.xlu0 %1899 }
 0x31c   : > { %v1942_v2 = vmax.f32 %v1900_v50, 1e-24 }
 0x31e   : > { %6145 = vrsqrt.f32 %v1942_v2  ;;  %v7729_v2 = vpop.permute.xlu1 %3691 }
 0x31f   : > { %v2966_v14 = vpop.xlane.xlu0 %2965  ;;  %9467 = vst [vmem:[#allocation106_spill] sm:$0xff] %v7729_v2 }
 0x320   : > { %v3008_v57 = vmax.f32 %v2966_v14, 1e-24 }
 0x322   : > { %6147 = vrsqrt.f32 %v3008_v57  ;;  %1762 = vadd.xlane.f32.xlu1 %v1761_v5  ;;  %v7745_v46 = vpop.permute.xlu1 %2285 }
 0x323   : > { %v3112_v15 = vpop.xlane.xlu0 %3111 }
 0x324   : > { %v6144_v51 = vpop.eup %6143  ;;  %v3154_v45 = vmax.f32 %v3112_v15, 1e-24 }
 0x325   : > { %v1828_v50 = vmul.f32 8.0, %v6144_v51 }
 0x326   : > { %6149 = vrsqrt.f32 %v3154_v45  ;;  %1908 = vadd.xlane.f32.xlu1 %v1907_v60  ;;  %3697 = vrot.lane.b32.xlu0 %v7727_v37, %s6519_s2  ;;  %v1882_v60 = vmul.f32 %v7736_v27, %v7736_v27  ;;  %v7753_v2 = vpop.permute.xlu1 %2479 }
 0x327   : > { %v1845_v14 = vmul.f32 %v7467_v16, %v1828_v50  ;;  %v2969_v57 = vpop.xlane.xlu0 %2968  ;;  %9469 = vst [vmem:[#allocation108_spill] sm:$0xff] %v7753_v2 }
 0x328   : > { %v6146_v5 = vpop.eup %6145  ;;  %v3009_v15 = vmax.f32 %v2969_v57, 1e-24 }
 0x329   : > { %v1861_v38 = vmul.f32 %v1845_v14, %v7186_v10  ;;  %v1974_v45 = vmul.f32 8.0, %v6146_v5 }
 0x32a   : > { %6151 = vrsqrt.f32 %v3009_v15  ;;  %2291 = vrot.lane.b32.xlu0 %v1735_v12, %s6519_s2 }
 0x32b   : > { %v5674_v51 = vpack.c.bf16 %v1861_v38, %v1861_v38  ;;  %v1991_v59 = vmul.f32 %v7472_v13, %v1974_v45 }
 0x32c   : > { %v6148_v50 = vpop.eup %6147 }
 0x32d   : > { %2088 = vst.msk [vmem:[%s7481_s14 + $0x8] sm:$0xf] %vm2085_vm1, %v5674_v51  ;;  %v2007_v57 = vmul.f32 %v1991_v59, %v7404_v29  ;;  %v3040_v14 = vmul.f32 8.0, %v6148_v50 }
 0x32e   : > { %2485 = vrot.lane.b32.xlu0 %v1882_v60, %s6519_s2 }
 0x32f   : > { %v5690_v5 = vpack.c.bf16 %v2007_v57, %v2007_v57  ;;  %v3057_v15 = vmul.f32 %v3040_v14, %v7467_v16  ;;  %v2947_v14 = vmul.f32 %v7219_v28, %v7219_v28 }
 0x330   : > { %v6150_v10 = vpop.eup %6149 }
 0x331   : > { %2168 = vst.msk [vmem:[%s7490_s9 + $0x8] sm:$0xf] %vm2085_vm1, %v5690_v5  ;;  %v3073_v38 = vmul.f32 %v3057_v15, %v7190_v49  ;;  %v3186_v45 = vmul.f32 8.0, %v6150_v10 }
 0x333   : > { %v5754_v53 = vpack.c.bf16 %v3073_v38, %v3073_v38  ;;  %v3203_v51 = vmul.f32 %v3186_v45, %v7472_v13 }
 0x334   : > { %v6152_v39 = vpop.eup %6151 }
 0x335   : > { %5499 = vst.msk [vmem:[%s7481_s14 + $0x88] sm:$0xf] %vm2085_vm1, %v5754_v53  ;;  %v3219_v59 = vmul.f32 %v3203_v51, %v7414_v21  ;;  %v3041_v50 = vmul.f32 8.0, %v6152_v39  ;;  %v1757_v57 = vpop.xlane.xlu1 %1756 }
 0x336   : > { %v1797_v29 = vmax.f32 %v1757_v57, 1e-24 }
 0x337   : > { %v5770_v5 = vpack.c.bf16 %v3219_v59, %v3219_v59  ;;  %v3058_v2 = vmul.f32 %v3041_v50, %v7467_v16  ;;  %3503 = vrot.lane.b32.xlu1 %v2947_v14, %s6519_s2 }
 0x338   : > { %6153 = vrsqrt.f32 %v1797_v29 }
 0x339   : > { %5531 = vst.msk [vmem:[%s7490_s9 + $0x88] sm:$0xf] %vm2085_vm1, %v5770_v5  ;;  %v3074_v10 = vmul.f32 %v3058_v2, %v7202_v32  ;;  %v1903_v53 = vpop.xlane.xlu1 %1902  ;;  %v1764_v2 = vsel %vm1745_vm0, %v1735_v12, 0.0  ;;  %v3119_v12 = vsel %vm1745_vm0, %v7727_v37, 0.0 }
 0x33a   : > { %v1943_v15 = vmax.f32 %v1903_v53, 1e-24 }
 0x33b   : > { %v5755_v38 = vpack.c.bf16 %v3074_v10, %v3074_v10 }
 0x33c   : > { %6155 = vrsqrt.f32 %v1943_v15  ;;  %v1910_v15 = vsel %vm1745_vm0, %v1882_v60, 0.0  ;;  %v2948_v60 = vmul.f32 %v7225_v34, %v7225_v34 }
 0x33d   : > { %5500 = vst.msk [vmem:[%s7481_s14 + $0x8c] sm:$0xf] %vm2085_vm1, %v5755_v38  ;;  %v7781_v38 = vpop.permute.xlu0 %2287 }
 0x342   : > { %v6154_v39 = vpop.eup %6153 }
 0x343   : > { %v1829_v45 = vmul.f32 8.0, %v6154_v39  ;;  %v2973_v39 = vsel %vm1745_vm0, %v2947_v14, 0.0  ;;  %v7795_v14 = vadd.f32 %v7487_v18, %v7141_v52 }
 0x345   : > { %v1846_v51 = vmul.f32 %v7467_v16, %v1829_v45  ;;  %v7784_v45 = vpop.permute.xlu0 %2481  ;;  %9470 = vst [vmem:[#allocation109_spill] sm:$0xff] %v7795_v14 }
 0x346   : > { %v6156_v59 = vpop.eup %6155 }
 0x347   : > { %v1862_v50 = vmul.f32 %v1846_v51, %v7195_v35  ;;  %v1975_v29 = vmul.f32 8.0, %v6156_v59 }
 0x349   : > { %v5675_v57 = vpack.c.bf16 %v1862_v50, %v1862_v50  ;;  %v1992_v5 = vmul.f32 %v7472_v13, %v1975_v29 }
 0x34b   : > { %2089 = vst.msk [vmem:[%s7481_s14 + $0xc] sm:$0xf] %vm2085_vm1, %v5675_v57  ;;  %v2008_v10 = vmul.f32 %v1992_v5, %v7424_v31  ;;  %v7791_v57 = vpop.permute.xlu1 %3499 }
 0x34d   : > { %v5691_v53 = vpack.c.bf16 %v2008_v10, %v2008_v10  ;;  %1765 = vadd.xlane.f32.xlu0 %v1764_v2  ;;  %v3094_v10 = vmul.f32 %v7795_v14, %v7795_v14 }
 0x34f   : > { %2169 = vst.msk [vmem:[%s7490_s9 + $0xc] sm:$0xf] %vm2085_vm1, %v5691_v53  ;;  %v7797_v37 = vpop.permute.xlu1 %3693 }
 0x350   : > { %9471 = vst [vmem:[#allocation110_spill] sm:$0xff] %v7797_v37 }
 0x351   : > { %1911 = vadd.xlane.f32.xlu0 %v1910_v15 }
 0x35b   : > { %2974 = vadd.xlane.f32.xlu1 %v2973_v39  ;;  %v7805_v39 = vadd.f32 %v7499_v4, %v7144_v41 }
 0x35d   : > { %9472 = vst [vmem:[#allocation111_spill] sm:$0xff] %v7805_v39 }
 0x35f   : > { %3120 = vadd.xlane.f32.xlu1 %v3119_v12 }
 0x360   : > { %v1760_v51 = vpop.xlane.xlu0 %1759 }
 0x361   : > { %v1798_v59 = vmax.f32 %v1760_v51, 1e-24 }
 0x363   : > { %6157 = vrsqrt.f32 %v1798_v59  ;;  %v1736_v59 = vmul.f32 %v7228_v33, %v7228_v33 }
 0x364   : > { %v1906_v50 = vpop.xlane.xlu0 %1905 }
 0x365   : > { %v1944_v29 = vmax.f32 %v1906_v50, 1e-24 }
 0x367   : > { %6159 = vrsqrt.f32 %v1944_v29  ;;  %3505 = vrot.lane.b32.xlu0 %v2948_v60, %s6519_s2 }
 0x36d   : > { %v6158_v5 = vpop.eup %6157 }
 0x36e   : > { %v1830_v2 = vmul.f32 8.0, %v6158_v5 }
 0x370   : > { %v1847_v53 = vmul.f32 %v7467_v16, %v1830_v2  ;;  %3699 = vrot.lane.b32.xlu1 %v3094_v10, %s6519_s2  ;;  %v1883_v2 = vmul.f32 %v7805_v39, %v7805_v39 }
 0x371   : > { %v6160_v15 = vpop.eup %6159 }
 0x372   : > { %v1863_v18 = vmul.f32 %v1847_v53, %v7210_v8  ;;  %v1976_v12 = vmul.f32 8.0, %v6160_v15  ;;  %v3115_v51 = vpop.xlane.xlu1 %3114 }
 0x373   : > { %v3155_v50 = vmax.f32 %v3115_v51, 1e-24 }
 0x374   : > { %v5676_v29 = vpack.c.bf16 %v1863_v18, %v1863_v18  ;;  %v1993_v5 = vmul.f32 %v7472_v13, %v1976_v12  ;;  %2293 = vrot.lane.b32.xlu1 %v1736_v59, %s6519_s2 }
 0x375   : > { %6161 = vrsqrt.f32 %v3155_v50  ;;  %v2976_v50 = vsel %vm1745_vm0, %v2948_v60, 0.0 }
 0x376   : > { %2090 = vst.msk [vmem:[%s7481_s14 + $0x10] sm:$0xf] %vm2085_vm1, %v5676_v29  ;;  %v2009_v4 = vmul.f32 %v1993_v5, %v7455_v56  ;;  %v3122_v29 = vsel %vm1745_vm0, %v3094_v10, 0.0  ;;  %v7826_v5 = vpop.permute.xlu0 %3501  ;;  %v1913_v10 = vsel %vm1745_vm0, %v1883_v2, 0.0 }
 0x378   : > { %v5692_v53 = vpack.c.bf16 %v2009_v4, %v2009_v4  ;;  %2487 = vrot.lane.b32.xlu1 %v1883_v2, %s6519_s2 }
 0x37a   : > { %2170 = vst.msk [vmem:[%s7490_s9 + $0x10] sm:$0xf] %vm2085_vm1, %v5692_v53  ;;  %v7830_v53 = vadd.f32 %v7501_v0, %v7141_v52  ;;  %v7841_v0 = vadd.f32 %v7506_v40, %v7144_v41 }
 0x37c   : > { %9473 = vst [vmem:[#allocation112_spill] sm:$0xff] %v7830_v53  ;;  %9475 = vst [vmem:[#allocation114_spill] sm:$0xff] %v7841_v0  ;;  %v1884_v2 = vmul.f32 %v7841_v0, %v7841_v0 }
 0x37f   : > { %v6162_v15 = vpop.eup %6161 }
 0x380   : > { %v3187_v18 = vmul.f32 8.0, %v6162_v15 }
 0x382   : > { %v3204_v12 = vmul.f32 %v3187_v18, %v7472_v13  ;;  %v1767_v18 = vsel %vm1745_vm0, %v1736_v59, 0.0  ;;  %v1737_v59 = vmul.f32 %v7234_v62, %v7234_v62 }
 0x384   : > { %v3220_v51 = vmul.f32 %v3204_v12, %v7478_v43 }
 0x386   : > { %v5771_v32 = vpack.c.bf16 %v3220_v51, %v3220_v51  ;;  %2977 = vadd.xlane.f32.xlu0 %v2976_v50  ;;  %v7835_v51 = vpop.permute.xlu1 %3695 }
 0x387   : > { %9474 = vst [vmem:[#allocation113_spill] sm:$0xff] %v7835_v51 }
 0x388   : > { %5532 = vst.msk [vmem:[%s7490_s9 + $0x8c] sm:$0xf] %vm2085_vm1, %v5771_v32  ;;  %v3095_v32 = vmul.f32 %v7830_v53, %v7830_v53 }
 0x38a   : > { %3123 = vadd.xlane.f32.xlu0 %v3122_v29  ;;  %v7846_v50 = vpop.permute.xlu1 %2289 }
 0x38e   : > { %v7852_v40 = vpop.permute.xlu1 %2483 }
 0x399   : > { %v2972_v4 = vpop.xlane.xlu0 %2971 }
 0x39a   : > { %v3010_v15 = vmax.f32 %v2972_v4, 1e-24 }
 0x39c   : > { %6163 = vrsqrt.f32 %v3010_v15  ;;  %1768 = vadd.xlane.f32.xlu1 %v1767_v18 }
 0x39d   : > { %v3118_v60 = vpop.xlane.xlu0 %3117 }
 0x39e   : > { %v3156_v12 = vmax.f32 %v3118_v60, 1e-24 }
 0x3a0   : > { %6165 = vrsqrt.f32 %v3156_v12  ;;  %1914 = vadd.xlane.f32.xlu1 %v1913_v10  ;;  %3701 = vrot.lane.b32.xlu0 %v3095_v32, %s6519_s2 }
 0x3a4   : > { %2295 = vrot.lane.b32.xlu0 %v1737_v59, %s6519_s2 }
 0x3a6   : > { %v6164_v29 = vpop.eup %6163 }
 0x3a7   : > { %v3042_v4 = vmul.f32 8.0, %v6164_v29  ;;  %v2949_v29 = vmul.f32 %v7231_v19, %v7231_v19 }
 0x3a8   : > { %2489 = vrot.lane.b32.xlu0 %v1884_v2, %s6519_s2 }
 0x3a9   : > { %v3059_v15 = vmul.f32 %v3042_v4, %v7467_v16 }
 0x3aa   : > { %v6166_v18 = vpop.eup %6165 }
 0x3ab   : > { %v3075_v60 = vmul.f32 %v3059_v15, %v7213_v20  ;;  %v3188_v12 = vmul.f32 8.0, %v6166_v18 }
 0x3ad   : > { %v5756_v10 = vpack.c.bf16 %v3075_v60, %v3075_v60  ;;  %v3205_v43 = vmul.f32 %v3188_v12, %v7472_v13 }
 0x3af   : > { %5501 = vst.msk [vmem:[%s7481_s14 + $0x90] sm:$0xf] %vm2085_vm1, %v5756_v10  ;;  %v3221_v49 = vmul.f32 %v3205_v43, %v7680_v30  ;;  %v1763_v21 = vpop.xlane.xlu1 %1762 }
 0x3b0   : > { %v1799_v31 = vmax.f32 %v1763_v21, 1e-24 }
 0x3b1   : > { %v5772_v4 = vpack.c.bf16 %v3221_v49, %v3221_v49  ;;  %3507 = vrot.lane.b32.xlu1 %v2949_v29, %s6519_s2 }
 0x3b2   : > { %6167 = vrsqrt.f32 %v1799_v31 }
 0x3b3   : > { %5533 = vst.msk [vmem:[%s7490_s9 + $0x90] sm:$0xf] %vm2085_vm1, %v5772_v4  ;;  %v1909_v15 = vpop.xlane.xlu1 %1908  ;;  %v1770_v4 = vsel %vm1745_vm0, %v1737_v59, 0.0 }
 0x3b4   : > { %v1945_v18 = vmax.f32 %v1909_v15, 1e-24  ;;  %v1916_v15 = vsel %vm1745_vm0, %v1884_v2, 0.0  ;;  %v2950_v2 = vmul.f32 %v7237_v36, %v7237_v36 }
 0x3b6   : > { %6169 = vrsqrt.f32 %v1945_v18  ;;  %v7874_v18 = vpop.permute.xlu0 %3697 }
 0x3b7   : > { %9476 = vst [vmem:[#allocation115_spill] sm:$0xff] %v7874_v18 }
 0x3bc   : > { %v6168_v60 = vpop.eup %6167 }
 0x3bd   : > { %v1831_v12 = vmul.f32 8.0, %v6168_v60  ;;  %v7876_v60 = vpop.permute.xlu0 %2291 }
 0x3bf   : > { %v1848_v43 = vmul.f32 %v7467_v16, %v1831_v12  ;;  %v3125_v12 = vsel %vm1745_vm0, %v3095_v32, 0.0 }
 0x3c0   : > { %v6170_v10 = vpop.eup %6169 }
 0x3c1   : > { %v1864_v30 = vmul.f32 %v1848_v43, %v7216_v17  ;;  %v1977_v20 = vmul.f32 8.0, %v6170_v10  ;;  %v2982_v17 = vsel %vm1745_vm0, %v2950_v2, 0.0 }
 0x3c3   : > { %v5677_v21 = vpack.c.bf16 %v1864_v30, %v1864_v30  ;;  %v1994_v49 = vmul.f32 %v7472_v13, %v1977_v20  ;;  %v2979_v30 = vsel %vm1745_vm0, %v2949_v29, 0.0  ;;  %v7879_v20 = vpop.permute.xlu0 %2485  ;;  %v7887_v29 = vadd.f32 %v7508_v48, %v7141_v52 }
 0x3c4   : > { %v7897_v48 = vadd.f32 %v7511_v6, %v7144_v41 }
 0x3c5   : > { %2091 = vst.msk [vmem:[%s7481_s14 + $0x14] sm:$0xf] %vm2085_vm1, %v5677_v21  ;;  %v2010_v31 = vmul.f32 %v1994_v49, %v7692_v55  ;;  %9477 = vst [vmem:[#allocation116_spill] sm:$0xff] %v7887_v29  ;;  %v7889_v21 = vpop.permute.xlu1 %3503 }
 0x3c6   : > { %9478 = vst [vmem:[#allocation117_spill] sm:$0xff] %v7897_v48 }
 0x3c7   : > { %v5693_v35 = vpack.c.bf16 %v2010_v31, %v2010_v31  ;;  %1771 = vadd.xlane.f32.xlu0 %v1770_v4  ;;  %v3096_v4 = vmul.f32 %v7887_v29, %v7887_v29 }
 0x3c9   : > { %2171 = vst.msk [vmem:[%s7490_s9 + $0x14] sm:$0xf] %vm2085_vm1, %v5693_v35 }
 0x3cb   : > { %1917 = vadd.xlane.f32.xlu0 %v1916_v15 }
 0x3d5   : > { %2980 = vadd.xlane.f32.xlu1 %v2979_v30 }
 0x3d9   : > { %3126 = vadd.xlane.f32.xlu1 %v3125_v12 }
 0x3da   : > { %v1766_v59 = vpop.xlane.xlu0 %1765 }
 0x3db   : > { %v1800_v43 = vmax.f32 %v1766_v59, 1e-24 }
 0x3dd   : > { %6171 = vrsqrt.f32 %v1800_v43 }
 0x3de   : > { %v1912_v10 = vpop.xlane.xlu0 %1911 }
 0x3df   : > { %v1946_v35 = vmax.f32 %v1912_v10, 1e-24 }
 0x3e1   : > { %6173 = vrsqrt.f32 %v1946_v35  ;;  %3509 = vrot.lane.b32.xlu0 %v2950_v2, %s6519_s2  ;;  %v1738_v35 = vmul.f32 %v7240_v26, %v7240_v26 }
 0x3e7   : > { %v6172_v49 = vpop.eup %6171 }
 0x3e8   : > { %v1832_v32 = vmul.f32 8.0, %v6172_v49  ;;  %v2975_v31 = vpop.xlane.xlu1 %2974 }
 0x3e9   : > { %v3011_v15 = vmax.f32 %v2975_v31, 1e-24 }
 0x3ea   : > { %v1849_v30 = vmul.f32 %v7467_v16, %v1832_v32  ;;  %3703 = vrot.lane.b32.xlu1 %v3096_v4, %s6519_s2 }
 0x3eb   : > { %v6174_v12 = vpop.eup %6173  ;;  %6175 = vrsqrt.f32 %v3011_v15  ;;  %v1885_v15 = vmul.f32 %v7897_v48, %v7897_v48 }
 0x3ec   : > { %v1865_v59 = vmul.f32 %v1849_v30, %v7222_v24  ;;  %v1978_v43 = vmul.f32 8.0, %v6174_v12  ;;  %v3121_v10 = vpop.xlane.xlu1 %3120 }
 0x3ed   : > { %v3157_v49 = vmax.f32 %v3121_v10, 1e-24 }
 0x3ee   : > { %v5678_v31 = vpack.c.bf16 %v1865_v59, %v1865_v59  ;;  %v1995_v32 = vmul.f32 %v7472_v13, %v1978_v43  ;;  %2297 = vrot.lane.b32.xlu1 %v1738_v35, %s6519_s2 }
 0x3ef   : > { %6177 = vrsqrt.f32 %v3157_v49 }
 0x3f0   : > { %2092 = vst.msk [vmem:[%s7481_s14 + $0x18] sm:$0xf] %vm2085_vm1, %v5678_v31  ;;  %v2011_v6 = vmul.f32 %v1995_v32, %v7736_v27 }
 0x3f2   : > { %v5694_v30 = vpack.c.bf16 %v2011_v6, %v2011_v6  ;;  %2491 = vrot.lane.b32.xlu1 %v1885_v15, %s6519_s2 }
 0x3f4   : > { %2172 = vst.msk [vmem:[%s7490_s9 + $0x18] sm:$0xf] %vm2085_vm1, %v5694_v30  ;;  %v3128_v30 = vsel %vm1745_vm0, %v3096_v4, 0.0  ;;  %v1919_v4 = vsel %vm1745_vm0, %v1885_v15, 0.0 }
 0x3f5   : > { %v6176_v12 = vpop.eup %6175 }
 0x3f6   : > { %v3043_v59 = vmul.f32 8.0, %v6176_v12  ;;  %v7922_v12 = vpop.permute.xlu0 %3505 }
 0x3f8   : > { %v3060_v43 = vmul.f32 %v3043_v59, %v7467_v16 }
 0x3f9   : > { %v6178_v10 = vpop.eup %6177 }
 0x3fa   : > { %v3076_v49 = vmul.f32 %v3060_v43, %v7219_v28  ;;  %v3189_v55 = vmul.f32 8.0, %v6178_v10  ;;  %v7926_v43 = vadd.f32 %v7513_v22, %v7141_v52  ;;  %v1773_v10 = vsel %vm1745_vm0, %v1738_v35, 0.0 }
 0x3fb   : > { %v7937_v22 = vadd.f32 %v7518_v54, %v7144_v41  ;;  %v1739_v35 = vmul.f32 %v7247_v7, %v7247_v7 }
 0x3fc   : > { %v5757_v31 = vpack.c.bf16 %v3076_v49, %v3076_v49  ;;  %v3206_v32 = vmul.f32 %v3189_v55, %v7472_v13  ;;  %9479 = vst [vmem:[#allocation118_spill] sm:$0xff] %v7926_v43 }
 0x3fd   : > { %9481 = vst [vmem:[#allocation120_spill] sm:$0xff] %v7937_v22  ;;  %v1886_v15 = vmul.f32 %v7937_v22, %v7937_v22 }
 0x3fe   : > { %5502 = vst.msk [vmem:[%s7481_s14 + $0x94] sm:$0xf] %vm2085_vm1, %v5757_v31  ;;  %v3222_v6 = vmul.f32 %v3206_v32, %v7722_v11 }
 0x400   : > { %v5773_v27 = vpack.c.bf16 %v3222_v6, %v3222_v6  ;;  %2983 = vadd.xlane.f32.xlu0 %v2982_v17  ;;  %v3097_v17 = vmul.f32 %v7926_v43, %v7926_v43 }
 0x402   : > { %5534 = vst.msk [vmem:[%s7490_s9 + $0x94] sm:$0xf] %vm2085_vm1, %v5773_v27  ;;  %v7931_v27 = vpop.permute.xlu1 %3699 }
 0x403   : > { %9480 = vst [vmem:[#allocation119_spill] sm:$0xff] %v7931_v27 }
 0x404   : > { %3129 = vadd.xlane.f32.xlu0 %v3128_v30 }
 0x406   : > { %v7942_v31 = vpop.permute.xlu1 %2293 }
 0x40a   : > { %v7948_v54 = vpop.permute.xlu1 %2487 }
 0x40b   : > { %9482 = vst [vmem:[#allocation121_spill] sm:$0xff] %v7948_v54 }
 0x413   : > { %v2978_v59 = vpop.xlane.xlu0 %2977 }
 0x414   : > { %v3012_v55 = vmax.f32 %v2978_v59, 1e-24 }
 0x416   : > { %6179 = vrsqrt.f32 %v3012_v55  ;;  %1774 = vadd.xlane.f32.xlu1 %v1773_v10 }
 0x417   : > { %v3124_v2 = vpop.xlane.xlu0 %3123 }
 0x418   : > { %v3158_v49 = vmax.f32 %v3124_v2, 1e-24 }
 0x41a   : > { %6181 = vrsqrt.f32 %v3158_v49  ;;  %1920 = vadd.xlane.f32.xlu1 %v1919_v4  ;;  %3705 = vrot.lane.b32.xlu0 %v3097_v17, %s6519_s2 }
 0x41e   : > { %2299 = vrot.lane.b32.xlu0 %v1739_v35, %s6519_s2 }
 0x420   : > { %v6180_v32 = vpop.eup %6179 }
 0x421   : > { %v3044_v6 = vmul.f32 8.0, %v6180_v32  ;;  %v2951_v32 = vmul.f32 %v7243_v25, %v7243_v25 }
 0x422   : > { %2493 = vrot.lane.b32.xlu0 %v1886_v15, %s6519_s2 }
 0x423   : > { %v3061_v30 = vmul.f32 %v3044_v6, %v7467_v16 }
 0x424   : > { %v6182_v59 = vpop.eup %6181 }
 0x425   : > { %v3077_v55 = vmul.f32 %v3061_v30, %v7225_v34  ;;  %v3190_v10 = vmul.f32 8.0, %v6182_v59 }
 0x427   : > { %v5758_v2 = vpack.c.bf16 %v3077_v55, %v3077_v55  ;;  %v3207_v49 = vmul.f32 %v3190_v10, %v7472_v13 }
 0x429   : > { %5503 = vst.msk [vmem:[%s7481_s14 + $0x98] sm:$0xf] %vm2085_vm1, %v5758_v2  ;;  %v3223_v4 = vmul.f32 %v3207_v49, %v7795_v14  ;;  %v1769_v11 = vpop.xlane.xlu1 %1768 }
 0x42a   : > { %v1801_v28 = vmax.f32 %v1769_v11, 1e-24 }
 0x42b   : > { %v5774_v6 = vpack.c.bf16 %v3223_v4, %v3223_v4  ;;  %3511 = vrot.lane.b32.xlu1 %v2951_v32, %s6519_s2 }
 0x42c   : > { %6183 = vrsqrt.f32 %v1801_v28 }
 0x42d   : > { %5535 = vst.msk [vmem:[%s7490_s9 + $0x98] sm:$0xf] %vm2085_vm1, %v5774_v6  ;;  %v1915_v30 = vpop.xlane.xlu1 %1914  ;;  %v1776_v6 = vsel %vm1745_vm0, %v1739_v35, 0.0 }
 0x42e   : > { %v1947_v59 = vmax.f32 %v1915_v30, 1e-24  ;;  %v7969_v30 = vpop.permute.xlu0 %3701 }
 0x42f   : > { %9483 = vst [vmem:[#allocation122_spill] sm:$0xff] %v7969_v30 }
 0x430   : > { %6185 = vrsqrt.f32 %v1947_v59  ;;  %v1922_v59 = vsel %vm1745_vm0, %v1886_v15, 0.0  ;;  %v9484_v15 = vld [vmem:[#allocation75_spill] sm:$0xff] }
 0x436   : > { %v6184_v55 = vpop.eup %6183 }
 0x437   : > { %v1833_v10 = vmul.f32 8.0, %v6184_v55  ;;  %v7972_v55 = vpop.permute.xlu0 %2295 }
 0x439   : > { %v1850_v2 = vmul.f32 %v7467_v16, %v1833_v10  ;;  %v3131_v10 = vsel %vm1745_vm0, %v3097_v17, 0.0 }
 0x43a   : > { %v6186_v49 = vpop.eup %6185 }
 0x43b   : > { %v1866_v14 = vmul.f32 %v1850_v2, %v7228_v33  ;;  %v1979_v34 = vmul.f32 8.0, %v6186_v49 }
 0x43d   : > { %v5679_v11 = vpack.c.bf16 %v1866_v14, %v1866_v14  ;;  %v1996_v4 = vmul.f32 %v7472_v13, %v1979_v34  ;;  %v2985_v14 = vsel %vm1745_vm0, %v2951_v32, 0.0  ;;  %v7975_v34 = vpop.permute.xlu0 %2489  ;;  %v7983_v32 = vadd.f32 %v9484_v15, %v7141_v52 }
 0x43f   : > { %2093 = vst.msk [vmem:[%s7481_s14 + $0x1c] sm:$0xf] %vm2085_vm1, %v5679_v11  ;;  %v2012_v28 = vmul.f32 %v1996_v4, %v7805_v39  ;;  %9485 = vst [vmem:[#allocation75_spill] sm:$0xff] %v7983_v32  ;;  %v7985_v4 = vpop.permute.xlu1 %3507  ;;  %v3098_v17 = vmul.f32 %v7983_v32, %v7983_v32 }
 0x440   : > { %9486 = vst [vmem:[#allocation123_spill] sm:$0xff] %v7985_v4 }
 0x441   : > { %v5695_v24 = vpack.c.bf16 %v2012_v28, %v2012_v28  ;;  %1777 = vadd.xlane.f32.xlu0 %v1776_v6 }
 0x443   : > { %2173 = vst.msk [vmem:[%s7490_s9 + $0x1c] sm:$0xf] %vm2085_vm1, %v5695_v24  ;;  %v2952_v24 = vmul.f32 %v7250_v42, %v7250_v42 }
 0x445   : > { %1923 = vadd.xlane.f32.xlu0 %v1922_v59 }
 0x44f   : > { %2986 = vadd.xlane.f32.xlu1 %v2985_v14 }
 0x453   : > { %3132 = vadd.xlane.f32.xlu1 %v3131_v10 }
 0x454   : > { %v1772_v35 = vpop.xlane.xlu0 %1771 }
 0x455   : > { %v1802_v2 = vmax.f32 %v1772_v35, 1e-24 }
 0x457   : > { %6187 = vrsqrt.f32 %v1802_v2  ;;  %v9487_v2 = vld [vmem:[#allocation40_spill] sm:$0xff] }
 0x458   : > { %v1918_v49 = vpop.xlane.xlu0 %1917 }
 0x459   : > { %v1948_v11 = vmax.f32 %v1918_v49, 1e-24  ;;  %v1740_v49 = vmul.f32 %v9487_v2, %v9487_v2 }
 0x45b   : > { %6189 = vrsqrt.f32 %v1948_v11  ;;  %3513 = vrot.lane.b32.xlu0 %v2952_v24, %s6519_s2  ;;  %v9488_v11 = vld [vmem:[#allocation76_spill] sm:$0xff] }
 0x45c   : > { %v7995_v15 = vadd.f32 %v9488_v11, %v7144_v41 }
 0x45e   : > { %9489 = vst [vmem:[#allocation76_spill] sm:$0xff] %v7995_v15 }
 0x461   : > { %v6188_v28 = vpop.eup %6187 }
 0x462   : > { %v1834_v6 = vmul.f32 8.0, %v6188_v28  ;;  %v2981_v59 = vpop.xlane.xlu1 %2980 }
 0x463   : > { %v3013_v14 = vmax.f32 %v2981_v59, 1e-24 }
 0x464   : > { %v1851_v10 = vmul.f32 %v7467_v16, %v1834_v6  ;;  %3707 = vrot.lane.b32.xlu1 %v3098_v17, %s6519_s2 }
 0x465   : > { %v6190_v35 = vpop.eup %6189  ;;  %6191 = vrsqrt.f32 %v3013_v14  ;;  %v1887_v14 = vmul.f32 %v7995_v15, %v7995_v15 }
 0x466   : > { %v1867_v39 = vmul.f32 %v1851_v10, %v7234_v62  ;;  %v1980_v28 = vmul.f32 8.0, %v6190_v35  ;;  %v3127_v33 = vpop.xlane.xlu1 %3126 }
 0x467   : > { %v3159_v59 = vmax.f32 %v3127_v33, 1e-24 }
 0x468   : > { %v5680_v56 = vpack.c.bf16 %v1867_v39, %v1867_v39  ;;  %v1997_v6 = vmul.f32 %v7472_v13, %v1980_v28  ;;  %2301 = vrot.lane.b32.xlu1 %v1740_v49, %s6519_s2 }
 0x469   : > { %6193 = vrsqrt.f32 %v3159_v59 }
 0x46a   : > { %2094 = vst.msk [vmem:[%s7481_s14 + $0x20] sm:$0xf] %vm2085_vm1, %v5680_v56  ;;  %v2013_v11 = vmul.f32 %v1997_v6, %v7841_v0  ;;  %v2988_v6 = vsel %vm1745_vm0, %v2952_v24, 0.0  ;;  %v9497_v0 = vld [vmem:[#allocation41_spill] sm:$0xff] }
 0x46b   : > { %v2953_v18 = vmul.f32 %v9497_v0, %v9497_v0 }
 0x46c   : > { %v5696_v30 = vpack.c.bf16 %v2013_v11, %v2013_v11  ;;  %2495 = vrot.lane.b32.xlu1 %v1887_v14, %s6519_s2 }
 0x46e   : > { %2174 = vst.msk [vmem:[%s7490_s9 + $0x20] sm:$0xf] %vm2085_vm1, %v5696_v30  ;;  %v3134_v30 = vsel %vm1745_vm0, %v3098_v17, 0.0  ;;  %v1925_v17 = vsel %vm1745_vm0, %v1887_v14, 0.0 }
 0x46f   : > { %v6192_v33 = vpop.eup %6191 }
 0x470   : > { %v3045_v39 = vmul.f32 8.0, %v6192_v33  ;;  %v8018_v33 = vpop.permute.xlu0 %3509 }
 0x472   : > { %v3062_v10 = vmul.f32 %v3045_v39, %v7467_v16 }
 0x473   : > { %v6194_v35 = vpop.eup %6193 }
 0x474   : > { %v3078_v28 = vmul.f32 %v3062_v10, %v7231_v19  ;;  %v3191_v59 = vmul.f32 8.0, %v6194_v35  ;;  %v9490_v10 = vld [vmem:[#allocation77_spill] sm:$0xff] }
 0x475   : > { %v8022_v35 = vadd.f32 %v9490_v10, %v7141_v52 }
 0x476   : > { %v5759_v62 = vpack.c.bf16 %v3078_v28, %v3078_v28  ;;  %v3208_v8 = vmul.f32 %v3191_v59, %v7472_v13 }
 0x477   : > { %9491 = vst [vmem:[#allocation77_spill] sm:$0xff] %v8022_v35  ;;  %v3099_v24 = vmul.f32 %v8022_v35, %v8022_v35 }
 0x478   : > { %5504 = vst.msk [vmem:[%s7481_s14 + $0x9c] sm:$0xf] %vm2085_vm1, %v5759_v62  ;;  %v3224_v56 = vmul.f32 %v3208_v8, %v7830_v53  ;;  %v1779_v62 = vsel %vm1745_vm0, %v1740_v49, 0.0  ;;  %v9494_v49 = vld [vmem:[#allocation78_spill] sm:$0xff] }
 0x47a   : > { %v5775_v11 = vpack.c.bf16 %v3224_v56, %v3224_v56  ;;  %2989 = vadd.xlane.f32.xlu0 %v2988_v6  ;;  %v8027_v56 = vpop.permute.xlu1 %3703  ;;  %v9493_v6 = vld [vmem:[#allocation42_spill] sm:$0xff] }
 0x47b   : > { %9492 = vst [vmem:[#allocation124_spill] sm:$0xff] %v8027_v56 }
 0x47c   : > { %5536 = vst.msk [vmem:[%s7490_s9 + $0x9c] sm:$0xf] %vm2085_vm1, %v5775_v11  ;;  %v1741_v11 = vmul.f32 %v9493_v6, %v9493_v6 }
 0x47e   : > { %3135 = vadd.xlane.f32.xlu0 %v3134_v30  ;;  %v8035_v30 = vadd.f32 %v9494_v49, %v7144_v41 }
 0x480   : > { %v1888_v14 = vmul.f32 %v8035_v30, %v8035_v30 }
 0x48d   : > { %v2984_v39 = vpop.xlane.xlu0 %2983 }
 0x48e   : > { %v3014_v28 = vmax.f32 %v2984_v39, 1e-24  ;;  %v8038_v39 = vpop.permute.xlu1 %2297 }
 0x48f   : > { %9495 = vst [vmem:[#allocation42_spill] sm:$0xff] %v8038_v39 }
 0x490   : > { %6195 = vrsqrt.f32 %v3014_v28  ;;  %1780 = vadd.xlane.f32.xlu1 %v1779_v62 }
 0x491   : > { %v3130_v8 = vpop.xlane.xlu0 %3129 }
 0x492   : > { %v3160_v59 = vmax.f32 %v3130_v8, 1e-24 }
 0x494   : > { %6197 = vrsqrt.f32 %v3160_v59  ;;  %1926 = vadd.xlane.f32.xlu1 %v1925_v17  ;;  %3709 = vrot.lane.b32.xlu0 %v3099_v24, %s6519_s2  ;;  %v8044_v59 = vpop.permute.xlu1 %2491 }
 0x495   : > { %9496 = vst [vmem:[#allocation78_spill] sm:$0xff] %v8044_v59 }
 0x498   : > { %2303 = vrot.lane.b32.xlu0 %v1741_v11, %s6519_s2 }
 0x49a   : > { %v6196_v10 = vpop.eup %6195 }
 0x49b   : > { %v3046_v28 = vmul.f32 8.0, %v6196_v10 }
 0x49c   : > { %2497 = vrot.lane.b32.xlu0 %v1888_v14, %s6519_s2 }
 0x49d   : > { %v3063_v62 = vmul.f32 %v3046_v28, %v7467_v16 }
 0x49e   : > { %v6198_v8 = vpop.eup %6197 }
 0x49f   : > { %v3079_v17 = vmul.f32 %v3063_v62, %v7237_v36  ;;  %v3192_v49 = vmul.f32 8.0, %v6198_v8 }
 0x4a1   : > { %v5760_v53 = vpack.c.bf16 %v3079_v17, %v3079_v17  ;;  %v3209_v19 = vmul.f32 %v3192_v49, %v7472_v13 }
 0x4a3   : > { %5505 = vst.msk [vmem:[%s7481_s14 + $0xa0] sm:$0xf] %vm2085_vm1, %v5760_v53  ;;  %v3225_v10 = vmul.f32 %v3209_v19, %v7887_v29  ;;  %v1775_v37 = vpop.xlane.xlu1 %1774 }
 0x4a4   : > { %v1803_v4 = vmax.f32 %v1775_v37, 1e-24 }
 0x4a5   : > { %v5776_v28 = vpack.c.bf16 %v3225_v10, %v3225_v10  ;;  %3515 = vrot.lane.b32.xlu1 %v2953_v18, %s6519_s2 }
 0x4a6   : > { %6199 = vrsqrt.f32 %v1803_v4 }
 0x4a7   : > { %5537 = vst.msk [vmem:[%s7490_s9 + $0xa0] sm:$0xf] %vm2085_vm1, %v5776_v28  ;;  %v1921_v62 = vpop.xlane.xlu1 %1920  ;;  %v1782_v28 = vsel %vm1745_vm0, %v1741_v11, 0.0 }
 0x4a8   : > { %v1949_v8 = vmax.f32 %v1921_v62, 1e-24  ;;  %v8065_v62 = vpop.permute.xlu0 %3705 }
 0x4a9   : > { %9498 = vst [vmem:[#allocation41_spill] sm:$0xff] %v8065_v62 }
 0x4aa   : > { %6201 = vrsqrt.f32 %v1949_v8  ;;  %v1928_v8 = vsel %vm1745_vm0, %v1888_v14, 0.0 }
 0x4ab   : > { %v8077_v14 = vpop.permute.xlu1 %3511 }
 0x4b0   : > { %v6200_v17 = vpop.eup %6199 }
 0x4b1   : > { %v1835_v49 = vmul.f32 8.0, %v6200_v17  ;;  %v2991_v17 = vsel %vm1745_vm0, %v2953_v18, 0.0 }
 0x4b3   : > { %v1852_v36 = vmul.f32 %v7467_v16, %v1835_v49  ;;  %v3137_v49 = vsel %vm1745_vm0, %v3099_v24, 0.0  ;;  %v9502_v24 = vld [vmem:[#allocation80_spill] sm:$0xff] }
 0x4b4   : > { %v6202_v53 = vpop.eup %6201 }
 0x4b5   : > { %v1868_v19 = vmul.f32 %v1852_v36, %v7240_v26  ;;  %v1981_v29 = vmul.f32 8.0, %v6202_v53  ;;  %v8068_v36 = vpop.permute.xlu0 %2299 }
 0x4b7   : > { %v5681_v37 = vpack.c.bf16 %v1868_v19, %v1868_v19  ;;  %v1998_v10 = vmul.f32 %v7472_v13, %v1981_v29 }
 0x4b9   : > { %2095 = vst.msk [vmem:[%s7481_s14 + $0x24] sm:$0xf] %vm2085_vm1, %v5681_v37  ;;  %v2014_v4 = vmul.f32 %v1998_v10, %v7897_v48  ;;  %v8071_v29 = vpop.permute.xlu0 %2493 }
 0x4bb   : > { %v5697_v56 = vpack.c.bf16 %v2014_v4, %v2014_v4  ;;  %1783 = vadd.xlane.f32.xlu0 %v1782_v28  ;;  %v9501_v4 = vld [vmem:[#allocation44_spill] sm:$0xff] }
 0x4bc   : > { %v1742_v28 = vmul.f32 %v9501_v4, %v9501_v4 }
 0x4bd   : > { %2175 = vst.msk [vmem:[%s7490_s9 + $0x24] sm:$0xf] %vm2085_vm1, %v5697_v56  ;;  %v9499_v56 = vld [vmem:[#allocation43_spill] sm:$0xff] }
 0x4be   : > { %v2954_v37 = vmul.f32 %v9499_v56, %v9499_v56  ;;  %9500 = vst [vmem:[#allocation43_spill] sm:$0xff] %v8077_v14 }
 0x4bf   : > { %1929 = vadd.xlane.f32.xlu0 %v1928_v8  ;;  %v8083_v8 = vadd.f32 %v9502_v24, %v7144_v41 }
 0x4c9   : > { %2992 = vadd.xlane.f32.xlu1 %v2991_v17 }
 0x4cd   : > { %3138 = vadd.xlane.f32.xlu1 %v3137_v49 }
 0x4ce   : > { %v1778_v11 = vpop.xlane.xlu0 %1777 }
 0x4cf   : > { %v1804_v53 = vmax.f32 %v1778_v11, 1e-24 }
 0x4d1   : > { %6203 = vrsqrt.f32 %v1804_v53 }
 0x4d2   : > { %v1924_v19 = vpop.xlane.xlu0 %1923 }
 0x4d3   : > { %v1950_v10 = vmax.f32 %v1924_v19, 1e-24 }
 0x4d5   : > { %6205 = vrsqrt.f32 %v1950_v10  ;;  %3517 = vrot.lane.b32.xlu0 %v2954_v37, %s6519_s2  ;;  %v1889_v10 = vmul.f32 %v8083_v8, %v8083_v8 }
 0x4db   : > { %v6204_v18 = vpop.eup %6203 }
 0x4dc   : > { %v1836_v17 = vmul.f32 8.0, %v6204_v18  ;;  %v2987_v49 = vpop.xlane.xlu1 %2986 }
 0x4dd   : > { %v3015_v11 = vmax.f32 %v2987_v49, 1e-24 }
 0x4de   : > { %v1853_v53 = vmul.f32 %v7467_v16, %v1836_v17  ;;  %2305 = vrot.lane.b32.xlu1 %v1742_v28, %s6519_s2 }
 0x4df   : > { %v6206_v19 = vpop.eup %6205  ;;  %6207 = vrsqrt.f32 %v3015_v11 }
 0x4e0   : > { %v1869_v48 = vmul.f32 %v1853_v53, %v7247_v7  ;;  %v1982_v26 = vmul.f32 8.0, %v6206_v19  ;;  %v3133_v62 = vpop.xlane.xlu1 %3132  ;;  %v9503_v7 = vld [vmem:[#allocation79_spill] sm:$0xff] }
 0x4e1   : > { %v3161_v24 = vmax.f32 %v3133_v62, 1e-24  ;;  %v8101_v51 = vadd.f32 %v9503_v7, %v7141_v52 }
 0x4e2   : > { %v5682_v27 = vpack.c.bf16 %v1869_v48, %v1869_v48  ;;  %v1999_v18 = vmul.f32 %v7472_v13, %v1982_v26  ;;  %2499 = vrot.lane.b32.xlu1 %v1889_v10, %s6519_s2 }
 0x4e3   : > { %6209 = vrsqrt.f32 %v3161_v24 }
 0x4e4   : > { %2096 = vst.msk [vmem:[%s7481_s14 + $0x28] sm:$0xf] %vm2085_vm1, %v5682_v27  ;;  %v2015_v17 = vmul.f32 %v1999_v18, %v7937_v22 }
 0x4e6   : > { %v5698_v49 = vpack.c.bf16 %v2015_v17, %v2015_v17  ;;  %v2994_v17 = vsel %vm1745_vm0, %v2954_v37, 0.0  ;;  %v1931_v37 = vsel %vm1745_vm0, %v1889_v10, 0.0 }
 0x4e8   : > { %2176 = vst.msk [vmem:[%s7490_s9 + $0x28] sm:$0xf] %vm2085_vm1, %v5698_v49  ;;  %v8110_v49 = vmul.f32 %v8101_v51, %v8101_v51 }
 0x4e9   : > { %v6208_v11 = vpop.eup %6207 }
 0x4ea   : > { %v3047_v53 = vmul.f32 8.0, %v6208_v11  ;;  %v3140_v7 = vsel %vm1745_vm0, %v8110_v49, 0.0 }
 0x4ec   : > { %v3064_v19 = vmul.f32 %v3047_v53, %v7467_v16  ;;  %v8116_v53 = vpop.permute.xlu0 %3513 }
 0x4ed   : > { %v6210_v62 = vpop.eup %6209  ;;  %9504 = vst [vmem:[#allocation44_spill] sm:$0xff] %v8116_v53 }
 0x4ee   : > { %v3080_v48 = vmul.f32 %v3064_v19, %v7243_v25  ;;  %v3193_v26 = vmul.f32 8.0, %v6210_v62  ;;  %v1785_v19 = vsel %vm1745_vm0, %v1742_v28, 0.0 }
 0x4f0   : > { %v5761_v24 = vpack.c.bf16 %v3080_v48, %v3080_v48  ;;  %v3210_v27 = vmul.f32 %v3193_v26, %v7472_v13 }
 0x4f2   : > { %5506 = vst.msk [vmem:[%s7481_s14 + $0xa4] sm:$0xf] %vm2085_vm1, %v5761_v24  ;;  %v3226_v18 = vmul.f32 %v3210_v27, %v7926_v43  ;;  %v9505_v24 = vld [vmem:[#allocation46_spill] sm:$0xff] }
 0x4f3   : > { %v1743_v27 = vmul.f32 %v9505_v24, %v9505_v24 }
 0x4f4   : > { %v5777_v11 = vpack.c.bf16 %v3226_v18, %v3226_v18  ;;  %2995 = vadd.xlane.f32.xlu0 %v2994_v17  ;;  %v9506_v18 = vld [vmem:[#allocation82_spill] sm:$0xff] }
 0x4f5   : > { %v8124_v17 = vadd.f32 %v9506_v18, %v7144_v41 }
 0x4f6   : > { %5538 = vst.msk [vmem:[%s7490_s9 + $0xa4] sm:$0xf] %vm2085_vm1, %v5777_v11 }
 0x4f7   : > { %v1890_v28 = vmul.f32 %v8124_v17, %v8124_v17 }
 0x4f8   : > { %3141 = vadd.xlane.f32.xlu0 %v3140_v7  ;;  %v8126_v7 = vpop.permute.xlu1 %3707 }
 0x4f9   : > { %9507 = vst [vmem:[#allocation80_spill] sm:$0xff] %v8126_v7 }
 0x4fc   : > { %v8132_v10 = vpop.permute.xlu1 %2301 }
 0x4fd   : > { %9508 = vst [vmem:[#allocation79_spill] sm:$0xff] %v8132_v10 }
 0x506   : > { %1786 = vadd.xlane.f32.xlu1 %v1785_v19 }
 0x507   : > { %v2990_v62 = vpop.xlane.xlu0 %2989 }
 0x508   : > { %v3016_v48 = vmax.f32 %v2990_v62, 1e-24 }
 0x50a   : > { %6211 = vrsqrt.f32 %v3016_v48  ;;  %1932 = vadd.xlane.f32.xlu1 %v1931_v37 }
 0x50b   : > { %v3136_v26 = vpop.xlane.xlu0 %3135 }
 0x50c   : > { %v3162_v11 = vmax.f32 %v3136_v26, 1e-24  ;;  %v9509_v26 = vld [vmem:[#allocation45_spill] sm:$0xff] }
 0x50d   : > { %v2955_v18 = vmul.f32 %v9509_v26, %v9509_v26 }
 0x50e   : > { %6213 = vrsqrt.f32 %v3162_v11  ;;  %2307 = vrot.lane.b32.xlu0 %v1743_v27, %s6519_s2  ;;  %v8137_v11 = vpop.permute.xlu1 %2495 }
 0x50f   : > { %9510 = vst [vmem:[#allocation46_spill] sm:$0xff] %v8137_v11 }
 0x512   : > { %2501 = vrot.lane.b32.xlu0 %v1890_v28, %s6519_s2 }
 0x514   : > { %v6212_v19 = vpop.eup %6211 }
 0x515   : > { %v3048_v62 = vmul.f32 8.0, %v6212_v19 }
 0x517   : > { %v3065_v48 = vmul.f32 %v3048_v62, %v7467_v16 }
 0x518   : > { %v6214_v37 = vpop.eup %6213 }
 0x519   : > { %v3081_v43 = vmul.f32 %v3065_v48, %v7250_v42  ;;  %v3194_v25 = vmul.f32 8.0, %v6214_v37 }
 0x51b   : > { %v5762_v22 = vpack.c.bf16 %v3081_v43, %v3081_v43  ;;  %v3211_v7 = vmul.f32 %v3194_v25, %v7472_v13  ;;  %3519 = vrot.lane.b32.xlu1 %v2955_v18, %s6519_s2 }
 0x51d   : > { %5507 = vst.msk [vmem:[%s7481_s14 + $0xa8] sm:$0xf] %vm2085_vm1, %v5762_v22  ;;  %v3227_v19 = vmul.f32 %v3211_v7, %v7983_v32  ;;  %v1781_v10 = vpop.xlane.xlu1 %1780  ;;  %v1788_v7 = vsel %vm1745_vm0, %v1743_v27, 0.0 }
 0x51e   : > { %v1805_v62 = vmax.f32 %v1781_v10, 1e-24 }
 0x51f   : > { %v5778_v59 = vpack.c.bf16 %v3227_v19, %v3227_v19 }
 0x520   : > { %6215 = vrsqrt.f32 %v1805_v62  ;;  %v8157_v62 = vpop.permute.xlu0 %3709 }
 0x521   : > { %5539 = vst.msk [vmem:[%s7490_s9 + $0xa8] sm:$0xf] %vm2085_vm1, %v5778_v59  ;;  %v1927_v11 = vpop.xlane.xlu1 %1926  ;;  %9511 = vst [vmem:[#allocation82_spill] sm:$0xff] %v8157_v62 }
 0x522   : > { %v1951_v39 = vmax.f32 %v1927_v11, 1e-24 }
 0x524   : > { %6217 = vrsqrt.f32 %v1951_v39  ;;  %v1934_v39 = vsel %vm1745_vm0, %v1890_v28, 0.0  ;;  %v8163_v27 = vpop.permute.xlu0 %2303 }
 0x52a   : > { %v6216_v43 = vpop.eup %6215 }
 0x52b   : > { %v1837_v48 = vmul.f32 8.0, %v6216_v43  ;;  %v9512_v43 = vld [vmem:[#allocation81_spill] sm:$0xff] }
 0x52d   : > { %v1854_v25 = vmul.f32 %v7467_v16, %v1837_v48  ;;  %v8161_v48 = vadd.f32 %v9512_v43, %v7141_v52  ;;  %v9515_v43 = vld [vmem:[#allocation84_spill] sm:$0xff] }
 0x52e   : > { %v6218_v37 = vpop.eup %6217 }
 0x52f   : > { %v1870_v22 = vmul.f32 %v1854_v25, %v9487_v2  ;;  %v1983_v42 = vmul.f32 8.0, %v6218_v37  ;;  %v8168_v25 = vmul.f32 %v8161_v48, %v8161_v48  ;;  %v8172_v37 = vpop.permute.xlu0 %2497 }
 0x531   : > { %v5683_v10 = vpack.c.bf16 %v1870_v22, %v1870_v22  ;;  %v2000_v19 = vmul.f32 %v7472_v13, %v1983_v42  ;;  %1789 = vadd.xlane.f32.xlu0 %v1788_v7  ;;  %v2997_v42 = vsel %vm1745_vm0, %v2955_v18, 0.0  ;;  %v3143_v28 = vsel %vm1745_vm0, %v8168_v25, 0.0  ;;  %v9513_v7 = vld [vmem:[#allocation47_spill] sm:$0xff] }
 0x533   : > { %2097 = vst.msk [vmem:[%s7481_s14 + $0x2c] sm:$0xf] %vm2085_vm1, %v5683_v10  ;;  %v2016_v59 = vmul.f32 %v2000_v19, %v7995_v15  ;;  %v2956_v10 = vmul.f32 %v9513_v7, %v9513_v7 }
 0x535   : > { %v5699_v11 = vpack.c.bf16 %v2016_v59, %v2016_v59  ;;  %1935 = vadd.xlane.f32.xlu0 %v1934_v39  ;;  %v9514_v39 = vld [vmem:[#allocation48_spill] sm:$0xff] }
 0x537   : > { %2177 = vst.msk [vmem:[%s7490_s9 + $0x2c] sm:$0xf] %vm2085_vm1, %v5699_v11  ;;  %v1744_v11 = vmul.f32 %v9514_v39, %v9514_v39 }
 0x53f   : > { %2998 = vadd.xlane.f32.xlu1 %v2997_v42  ;;  %v8181_v42 = vadd.f32 %v9515_v43, %v7144_v41 }
 0x543   : > { %3144 = vadd.xlane.f32.xlu1 %v3143_v28  ;;  %v8183_v28 = vpop.permute.xlu1 %3515 }
 0x544   : > { %9516 = vst [vmem:[#allocation45_spill] sm:$0xff] %v8183_v28 }
 0x548   : > { %v1784_v22 = vpop.xlane.xlu0 %1783 }
 0x549   : > { %v1806_v19 = vmax.f32 %v1784_v22, 1e-24  ;;  %v1891_v22 = vmul.f32 %v8181_v42, %v8181_v42 }
 0x54b   : > { %6219 = vrsqrt.f32 %v1806_v19  ;;  %3521 = vrot.lane.b32.xlu0 %v2956_v10, %s6519_s2 }
 0x54c   : > { %v1930_v18 = vpop.xlane.xlu0 %1929 }
 0x54d   : > { %v1952_v59 = vmax.f32 %v1930_v18, 1e-24 }
 0x54f   : > { %6221 = vrsqrt.f32 %v1952_v59 }
 0x554   : > { %2309 = vrot.lane.b32.xlu1 %v1744_v11, %s6519_s2 }
 0x555   : > { %v6220_v32 = vpop.eup %6219 }
 0x556   : > { %v1838_v19 = vmul.f32 8.0, %v6220_v32  ;;  %v2993_v15 = vpop.xlane.xlu1 %2992 }
 0x557   : > { %v3017_v18 = vmax.f32 %v2993_v15, 1e-24 }
 0x558   : > { %v1855_v59 = vmul.f32 %v7467_v16, %v1838_v19  ;;  %2503 = vrot.lane.b32.xlu1 %v1891_v22, %s6519_s2 }
 0x559   : > { %v6222_v2 = vpop.eup %6221  ;;  %6223 = vrsqrt.f32 %v3017_v18  ;;  %v9517_v18 = vld [vmem:[#allocation83_spill] sm:$0xff] }
 0x55a   : > { %v1871_v41 = vmul.f32 %v1855_v59, %v9493_v6  ;;  %v1984_v43 = vmul.f32 8.0, %v6222_v2  ;;  %v3139_v62 = vpop.xlane.xlu1 %3138  ;;  %v8199_v2 = vadd.f32 %v9517_v18, %v7141_v52  ;;  %v8217_v18 = vpop.permute.xlu0 %3517 }
 0x55b   : > { %v3163_v28 = vmax.f32 %v3139_v62, 1e-24 }
 0x55c   : > { %v5684_v53 = vpack.c.bf16 %v1871_v41, %v1871_v41  ;;  %v2001_v54 = vmul.f32 %v7472_v13, %v1984_v43 }
 0x55d   : > { %6225 = vrsqrt.f32 %v3163_v28 }
 0x55e   : > { %2098 = vst.msk [vmem:[%s7481_s14 + $0x30] sm:$0xf] %vm2085_vm1, %v5684_v53  ;;  %v2017_v32 = vmul.f32 %v2001_v54, %v8035_v30  ;;  %v3000_v53 = vsel %vm1745_vm0, %v2956_v10, 0.0  ;;  %v8206_v54 = vmul.f32 %v8199_v2, %v8199_v2  ;;  %v1791_v10 = vsel %vm1745_vm0, %v1744_v11, 0.0  ;;  %v9519_v11 = vld [vmem:[#allocation56_spill] sm:$0xff] }
 0x560   : > { %v5700_v15 = vpack.c.bf16 %v2017_v32, %v2017_v32 }
 0x562   : > { %2178 = vst.msk [vmem:[%s7490_s9 + $0x30] sm:$0xf] %vm2085_vm1, %v5700_v15 }
 0x563   : > { %v6224_v19 = vpop.eup %6223 }
 0x564   : > { %v3049_v14 = vmul.f32 8.0, %v6224_v19 }
 0x566   : > { %v3066_v62 = vmul.f32 %v3049_v14, %v7467_v16  ;;  %v3146_v14 = vsel %vm1745_vm0, %v8206_v54, 0.0 }
 0x567   : > { %v6226_v59 = vpop.eup %6225 }
 0x568   : > { %v3082_v28 = vmul.f32 %v3066_v62, %v9497_v0  ;;  %v3195_v41 = vmul.f32 8.0, %v6226_v59  ;;  %v1937_v62 = vsel %vm1745_vm0, %v1891_v22, 0.0  ;;  %v9520_v22 = vld [vmem:[#allocation50_spill] sm:$0xff] }
 0x56a   : > { %v5763_v43 = vpack.c.bf16 %v3082_v28, %v3082_v28  ;;  %v3212_v32 = vmul.f32 %v3195_v41, %v7472_v13  ;;  %3001 = vadd.xlane.f32.xlu0 %v3000_v53  ;;  %v9518_v41 = vld [vmem:[#allocation52_spill] sm:$0xff] }
 0x56c   : > { %5508 = vst.msk [vmem:[%s7481_s14 + $0xac] sm:$0xf] %vm2085_vm1, %v5763_v43  ;;  %v3228_v15 = vmul.f32 %v3212_v32, %v8022_v35  ;;  %v8224_v32 = vpop.permute.xlu1 %2305 }
 0x56e   : > { %v5779_v19 = vpack.c.bf16 %v3228_v15, %v3228_v15  ;;  %3147 = vadd.xlane.f32.xlu0 %v3146_v14  ;;  %v2957_v14 = vmul.f32 %v9520_v22, %v9520_v22 }
 0x570   : > { %5540 = vst.msk [vmem:[%s7490_s9 + $0xac] sm:$0xf] %vm2085_vm1, %v5779_v19  ;;  %v8230_v19 = vpop.permute.xlu1 %2499 }
 0x57c   : > { %1792 = vadd.xlane.f32.xlu1 %v1791_v10 }
 0x580   : > { %1938 = vadd.xlane.f32.xlu1 %v1937_v62 }
 0x581   : > { %v2996_v59 = vpop.xlane.xlu0 %2995 }
 0x582   : > { %v3018_v28 = vmax.f32 %v2996_v59, 1e-24 }
 0x584   : > { %6227 = vrsqrt.f32 %v3018_v28  ;;  %2876 = vrot.lane.b32.xlu0 %v9518_v41, %s6519_s2 }
 0x585   : > { %v3142_v53 = vpop.xlane.xlu0 %3141 }
 0x586   : > { %v3164_v43 = vmax.f32 %v3142_v53, 1e-24 }
 0x588   : > { %6229 = vrsqrt.f32 %v3164_v43  ;;  %2892 = vrot.lane.b32.xlu0 %v7567_v63, %s6519_s2  ;;  %v9521_v43 = vld [vmem:[#allocation60_spill] sm:$0xff] }
 0x58c   : > { %2880 = vrot.lane.b32.xlu0 %v9519_v11, %s6519_s2 }
 0x58e   : > { %v6228_v15 = vpop.eup %6227 }
 0x58f   : > { %v3050_v10 = vmul.f32 8.0, %v6228_v15 }
 0x590   : > { %2896 = vrot.lane.b32.xlu0 %v7594_v1, %s6519_s2 }
 0x591   : > { %v3067_v62 = vmul.f32 %v3050_v10, %v7467_v16  ;;  %3523 = vrot.lane.b32.xlu1 %v2957_v14, %s6519_s2 }
 0x592   : > { %v6230_v63 = vpop.eup %6229 }
 0x593   : > { %v3083_v59 = vmul.f32 %v3067_v62, %v9499_v56  ;;  %v3196_v28 = vmul.f32 8.0, %v6230_v63  ;;  %v1787_v41 = vpop.xlane.xlu1 %1786  ;;  %v9522_v63 = vld [vmem:[#allocation86_spill] sm:$0xff] }
 0x594   : > { %v1807_v53 = vmax.f32 %v1787_v41, 1e-24  ;;  %2884 = vrot.lane.b32.xlu0 %v9521_v43, %s6519_s2 }
 0x595   : > { %v5764_v11 = vpack.c.bf16 %v3083_v59, %v3083_v59  ;;  %v3213_v15 = vmul.f32 %v3196_v28, %v7472_v13 }
 0x596   : > { %6231 = vrsqrt.f32 %v1807_v53 }
 0x597   : > { %5509 = vst.msk [vmem:[%s7481_s14 + $0xb0] sm:$0xf] %vm2085_vm1, %v5764_v11  ;;  %v3229_v1 = vmul.f32 %v3213_v15, %v8101_v51  ;;  %v1933_v10 = vpop.xlane.xlu1 %1932 }
 0x598   : > { %v1953_v35 = vmax.f32 %v1933_v10, 1e-24  ;;  %2900 = vrot.lane.b32.xlu0 %v7611_v61, %s6519_s2  ;;  %v9523_v10 = vld [vmem:[#allocation85_spill] sm:$0xff] }
 0x599   : > { %v5780_v62 = vpack.c.bf16 %v3229_v1, %v3229_v1 }
 0x59a   : > { %6233 = vrsqrt.f32 %v1953_v35 }
 0x59b   : > { %5541 = vst.msk [vmem:[%s7490_s9 + $0xb0] sm:$0xf] %vm2085_vm1, %v5780_v62  ;;  %v8263_v62 = vpop.permute.xlu0 %2307 }
 0x59c   : > { %2888 = vrot.lane.b32.xlu0 %v9522_v63, %s6519_s2  ;;  %v3003_v63 = vsel %vm1745_vm0, %v2957_v14, 0.0  ;;  %v9525_v14 = vld [vmem:[#allocation70_spill] sm:$0xff] }
 0x5a0   : > { %v6232_v59 = vpop.eup %6231  ;;  %2904 = vrot.lane.b32.xlu0 %v7645_v9, %s6519_s2  ;;  %v8261_v9 = vadd.f32 %v9523_v10, %v7141_v52 }
 0x5a1   : > { %v1839_v28 = vmul.f32 8.0, %v6232_v59 }
 0x5a2   : > { %v8268_v59 = vmul.f32 %v8261_v9, %v8261_v9 }
 0x5a3   : > { %v1856_v41 = vmul.f32 %v7467_v16, %v1839_v28 }
 0x5a4   : > { %v6234_v53 = vpop.eup %6233  ;;  %v3149_v28 = vsel %vm1745_vm0, %v8268_v59, 0.0 }
 0x5a5   : > { %v1872_v43 = vmul.f32 %v1856_v41, %v9501_v4  ;;  %v1985_v11 = vmul.f32 8.0, %v6234_v53  ;;  %v8272_v41 = vpop.permute.xlu0 %2501 }
 0x5a7   : > { %v5685_v61 = vpack.c.bf16 %v1872_v43, %v1872_v43  ;;  %v2002_v15 = vmul.f32 %v7472_v13, %v1985_v11  ;;  %v9524_v43 = vld [vmem:[#allocation68_spill] sm:$0xff] }
 0x5a8   : > { %v2327_v52 = vsel %vm1745_vm0, %v9524_v43, 0.0 }
 0x5a9   : > { %2099 = vst.msk [vmem:[%s7481_s14 + $0x34] sm:$0xf] %vm2085_vm1, %v5685_v61  ;;  %v2018_v35 = vmul.f32 %v2002_v15, %v8083_v8  ;;  %v2521_v15 = vsel %vm1745_vm0, %v9525_v14, 0.0 }
 0x5ab   : > { %v5701_v1 = vpack.c.bf16 %v2018_v35, %v2018_v35 }
 0x5ad   : > { %2179 = vst.msk [vmem:[%s7490_s9 + $0x34] sm:$0xf] %vm2085_vm1, %v5701_v1  ;;  %v9526_v1 = vld [vmem:[#allocation90_spill] sm:$0xff] }
 0x5ae   : > { %v3541_v10 = vsel %vm1745_vm0, %v9526_v1, 0.0 }
 0x5b5   : > { %3004 = vadd.xlane.f32.xlu1 %v3003_v63  ;;  %v8280_v63 = vpop.permute.xlu1 %3519 }
 0x5b9   : > { %3150 = vadd.xlane.f32.xlu1 %v3149_v28  ;;  %v9527_v28 = vld [vmem:[#allocation54_spill] sm:$0xff] }
 0x5be   : > { %v1790_v53 = vpop.xlane.xlu0 %1789 }
 0x5bf   : > { %v1808_v11 = vmax.f32 %v1790_v53, 1e-24  ;;  %2328 = vadd.xlane.f32.xlu0 %v2327_v52  ;;  %v2333_v53 = vsel %vm1745_vm0, %v7714_v3, 0.0 }
 0x5c1   : > { %6235 = vrsqrt.f32 %v1808_v11 }
 0x5c2   : > { %v1936_v61 = vpop.xlane.xlu0 %1935 }
 0x5c3   : > { %v1954_v35 = vmax.f32 %v1936_v61, 1e-24  ;;  %2522 = vadd.xlane.f32.xlu0 %v2521_v15  ;;  %v2527_v15 = vsel %vm1745_vm0, %v7716_v47, 0.0 }
 0x5c5   : > { %6237 = vrsqrt.f32 %v1954_v35 }
 0x5c7   : > { %3542 = vadd.xlane.f32.xlu0 %v3541_v10 }
 0x5ca   : > { %2878 = vrot.lane.b32.xlu1 %v9527_v28, %s6519_s2 }
 0x5cb   : > { %v6236_v43 = vpop.eup %6235  ;;  %2334 = vadd.xlane.f32.xlu0 %v2333_v53 }
 0x5cc   : > { %v1840_v52 = vmul.f32 8.0, %v6236_v43  ;;  %v2999_v11 = vpop.xlane.xlu1 %2998 }
 0x5cd   : > { %v3019_v14 = vmax.f32 %v2999_v11, 1e-24 }
 0x5ce   : > { %v1857_v61 = vmul.f32 %v7467_v16, %v1840_v52  ;;  %2894 = vrot.lane.b32.xlu1 %v7589_v44, %s6519_s2  ;;  %v9528_v52 = vld [vmem:[#allocation58_spill] sm:$0xff]  ;;  %v3547_v44 = vsel %vm1745_vm0, %v7718_v23, 0.0  ;;  %v9529_v23 = vld [vmem:[#allocation63_spill] sm:$0xff] }
 0x5cf   : > { %v6238_v35 = vpop.eup %6237  ;;  %6239 = vrsqrt.f32 %v3019_v14  ;;  %2528 = vadd.xlane.f32.xlu0 %v2527_v15  ;;  %v2336_v14 = vsel %vm1745_vm0, %v7745_v46, 0.0 }
 0x5d0   : > { %v1873_v1 = vmul.f32 %v1857_v61, %v9505_v24  ;;  %v1986_v3 = vmul.f32 8.0, %v6238_v35  ;;  %v3145_v10 = vpop.xlane.xlu1 %3144  ;;  %v9530_v35 = vld [vmem:[#allocation108_spill] sm:$0xff] }
 0x5d1   : > { %v3165_v28 = vmax.f32 %v3145_v10, 1e-24 }
 0x5d2   : > { %v5686_v53 = vpack.c.bf16 %v1873_v1, %v1873_v1  ;;  %v2003_v43 = vmul.f32 %v7472_v13, %v1986_v3  ;;  %2882 = vrot.lane.b32.xlu1 %v9528_v52, %s6519_s2  ;;  %v2530_v1 = vsel %vm1745_vm0, %v9530_v35, 0.0  ;;  %v8336_v35 = vpop.permute.xlu0 %3521 }
 0x5d3   : > { %6241 = vrsqrt.f32 %v3165_v28  ;;  %3548 = vadd.xlane.f32.xlu0 %v3547_v44  ;;  %v9531_v28 = vld [vmem:[#allocation96_spill] sm:$0xff] }
 0x5d4   : > { %2100 = vst.msk [vmem:[%s7481_s14 + $0x38] sm:$0xf] %vm2085_vm1, %v5686_v53  ;;  %v2019_v47 = vmul.f32 %v2003_v43, %v8124_v17  ;;  %v3550_v53 = vsel %vm1745_vm0, %v7791_v57, 0.0  ;;  %v9533_v57 = vld [vmem:[#allocation99_spill] sm:$0xff] }
 0x5d6   : > { %v5702_v11 = vpack.c.bf16 %v2019_v47, %v2019_v47  ;;  %2898 = vrot.lane.b32.xlu1 %v7598_v58, %s6519_s2  ;;  %v9532_v47 = vld [vmem:[#allocation88_spill] sm:$0xff] }
 0x5d7   : > { %2337 = vadd.xlane.f32.xlu0 %v2336_v14 }
 0x5d8   : > { %2180 = vst.msk [vmem:[%s7490_s9 + $0x38] sm:$0xf] %vm2085_vm1, %v5702_v11  ;;  %v2339_v11 = vsel %vm1745_vm0, %v7781_v38, 0.0  ;;  %v2539_v38 = vsel %vm1745_vm0, %v7879_v20, 0.0  ;;  %v2545_v20 = vsel %vm1745_vm0, %v7975_v34, 0.0  ;;  %v2551_v34 = vsel %vm1745_vm0, %v8071_v29, 0.0 }
 0x5d9   : > { %v6240_v61 = vpop.eup %6239  ;;  %v2363_v29 = vsel %vm1745_vm0, %v8163_v27, 0.0 }
 0x5da   : > { %v3051_v15 = vmul.f32 8.0, %v6240_v61  ;;  %2886 = vrot.lane.b32.xlu1 %v9529_v23, %s6519_s2  ;;  %v2533_v61 = vsel %vm1745_vm0, %v7784_v45, 0.0  ;;  %v2345_v23 = vsel %vm1745_vm0, %v7876_v60, 0.0 }
 0x5db   : > { %2531 = vadd.xlane.f32.xlu0 %v2530_v1  ;;  %v3559_v1 = vsel %vm1745_vm0, %v7922_v12, 0.0 }
 0x5dc   : > { %v3068_v3 = vmul.f32 %v3051_v15, %v7467_v16  ;;  %v3553_v15 = vsel %vm1745_vm0, %v7826_v5, 0.0  ;;  %v2351_v5 = vsel %vm1745_vm0, %v7972_v55, 0.0 }
 0x5dd   : > { %v6242_v58 = vpop.eup %6241 }
 0x5de   : > { %v3084_v10 = vmul.f32 %v3068_v3, %v9509_v26  ;;  %v3197_v46 = vmul.f32 8.0, %v6242_v58  ;;  %2902 = vrot.lane.b32.xlu1 %v9531_v28, %s6519_s2 }
 0x5df   : > { %3551 = vadd.xlane.f32.xlu0 %v3550_v53 }
 0x5e0   : > { %v5765_v43 = vpack.c.bf16 %v3084_v10, %v3084_v10  ;;  %v3214_v52 = vmul.f32 %v3197_v46, %v7472_v13  ;;  %v8344_v10 = vpop.permute.xlu1 %2309  ;;  %v2357_v46 = vsel %vm1745_vm0, %v8068_v36, 0.0 }
 0x5e2   : > { %5510 = vst.msk [vmem:[%s7481_s14 + $0xb4] sm:$0xf] %vm2085_vm1, %v5765_v43  ;;  %v3230_v44 = vmul.f32 %v3214_v52, %v8161_v48  ;;  %2890 = vrot.lane.b32.xlu1 %v9532_v47, %s6519_s2 }
 0x5e3   : > { %2340 = vadd.xlane.f32.xlu0 %v2339_v11 }
 0x5e4   : > { %v5781_v14 = vpack.c.bf16 %v3230_v44, %v3230_v44  ;;  %v8352_v53 = vpop.permute.xlu1 %2503 }
 0x5e6   : > { %5542 = vst.msk [vmem:[%s7490_s9 + $0xb4] sm:$0xf] %vm2085_vm1, %v5781_v14  ;;  %2906 = vrot.lane.b32.xlu1 %v9533_v57, %s6519_s2  ;;  %v9534_v57 = vld [vmem:[#allocation71_spill] sm:$0xff] }
 0x5e7   : > { %2534 = vadd.xlane.f32.xlu0 %v2533_v61  ;;  %v2330_v61 = vsel %vm1745_vm0, %v9534_v57, 0.0 }
 0x5eb   : > { %3554 = vadd.xlane.f32.xlu0 %v3553_v15 }
 0x5ef   : > { %2346 = vadd.xlane.f32.xlu0 %v2345_v23 }
 0x5f3   : > { %2540 = vadd.xlane.f32.xlu0 %v2539_v38 }
 0x5f7   : > { %3560 = vadd.xlane.f32.xlu0 %v3559_v1  ;;  %v3002_v45 = vpop.xlane.xlu0 %3001 }
 0x5f8   : > { %v3020_v3 = vmax.f32 %v3002_v45, 1e-24 }
 0x5fa   : > { %6243 = vrsqrt.f32 %v3020_v3 }
 0x5fb   : > { %2352 = vadd.xlane.f32.xlu0 %v2351_v5  ;;  %v3148_v60 = vpop.xlane.xlu0 %3147  ;;  %v9535_v5 = vld [vmem:[#allocation72_spill] sm:$0xff] }
 0x5fc   : > { %v3166_v58 = vmax.f32 %v3148_v60, 1e-24  ;;  %v2524_v60 = vsel %vm1745_vm0, %v9535_v5, 0.0 }
 0x5fe   : > { %6245 = vrsqrt.f32 %v3166_v58  ;;  %v2557_v58 = vsel %vm1745_vm0, %v8172_v37, 0.0 }
 0x5ff   : > { %2546 = vadd.xlane.f32.xlu0 %v2545_v20  ;;  %v2877_v12 = vpop.permute.xlu0 %2876 }
 0x600   : > { %5465 = vst.msk [vmem:[%s7315_s29 + $0x40] sm:$0xf] %vm2085_vm1, %v2877_v12 }
 0x603   : > { %2358 = vadd.xlane.f32.xlu0 %v2357_v46  ;;  %v2893_v28 = vpop.permute.xlu0 %2892  ;;  %v9536_v46 = vld [vmem:[#allocation101_spill] sm:$0xff] }
 0x604   : > { %v6244_v55 = vpop.eup %6243  ;;  %5473 = vst.msk [vmem:[%s7315_s29 + $0x60] sm:$0xf] %vm2085_vm1, %v2893_v28  ;;  %v3544_v28 = vsel %vm1745_vm0, %v9536_v46, 0.0  ;;  %v2348_v46 = vsel %vm1745_vm0, %v7942_v31, 0.0 }
 0x605   : > { %v3052_v43 = vmul.f32 8.0, %v6244_v55  ;;  %v2369_v55 = vsel %vm1745_vm0, %v8263_v62, 0.0 }
 0x607   : > { %v3069_v52 = vmul.f32 %v3052_v43, %v7467_v16  ;;  %2552 = vadd.xlane.f32.xlu0 %v2551_v34  ;;  %v2881_v44 = vpop.permute.xlu0 %2880  ;;  %v2563_v34 = vsel %vm1745_vm0, %v8272_v41, 0.0 }
 0x608   : > { %v6246_v47 = vpop.eup %6245  ;;  %5467 = vst.msk [vmem:[%s7315_s29 + $0x48] sm:$0xf] %vm2085_vm1, %v2881_v44 }
 0x609   : > { %v3085_v36 = vmul.f32 %v3069_v52, %v9513_v7  ;;  %v3198_v11 = vmul.f32 8.0, %v6246_v47  ;;  %v1793_v14 = vpop.xlane.xlu1 %1792 }
 0x60a   : > { %v1809_v15 = vmax.f32 %v1793_v14, 1e-24  ;;  %2331 = vadd.xlane.f32.xlu1 %v2330_v61 }
 0x60b   : > { %v5766_v23 = vpack.c.bf16 %v3085_v36, %v3085_v36  ;;  %v3215_v38 = vmul.f32 %v3198_v11, %v7472_v13  ;;  %2364 = vadd.xlane.f32.xlu0 %v2363_v29  ;;  %v2897_v1 = vpop.permute.xlu0 %2896 }
 0x60c   : > { %6247 = vrsqrt.f32 %v1809_v15  ;;  %5475 = vst.msk [vmem:[%s7315_s29 + $0x68] sm:$0xf] %vm2085_vm1, %v2897_v1 }
 0x60d   : > { %5511 = vst.msk [vmem:[%s7481_s14 + $0xb8] sm:$0xf] %vm2085_vm1, %v5766_v23  ;;  %v3231_v45 = vmul.f32 %v3215_v38, %v8199_v2  ;;  %v1939_v3 = vpop.xlane.xlu1 %1938 }
 0x60e   : > { %v1955_v27 = vmax.f32 %v1939_v3, 1e-24  ;;  %2525 = vadd.xlane.f32.xlu1 %v2524_v60  ;;  %v3556_v60 = vsel %vm1745_vm0, %v7889_v21, 0.0 }
 0x60f   : > { %v5782_v20 = vpack.c.bf16 %v3231_v45, %v3231_v45  ;;  %2558 = vadd.xlane.f32.xlu0 %v2557_v58  ;;  %v2885_v12 = vpop.permute.xlu0 %2884  ;;  %v2342_v45 = vsel %vm1745_vm0, %v7846_v50, 0.0  ;;  %v3565_v50 = vsel %vm1745_vm0, %v8018_v33, 0.0 }
 0x610   : > { %6249 = vrsqrt.f32 %v1955_v27  ;;  %5469 = vst.msk [vmem:[%s7315_s29 + $0x50] sm:$0xf] %vm2085_vm1, %v2885_v12 }
 0x611   : > { %5543 = vst.msk [vmem:[%s7490_s9 + $0xb8] sm:$0xf] %vm2085_vm1, %v5782_v20  ;;  %v8404_v29 = vpop.permute.xlu1 %3523 }
 0x612   : > { %3545 = vadd.xlane.f32.xlu1 %v3544_v28  ;;  %v9537_v28 = vld [vmem:[#allocation43_spill] sm:$0xff] }
 0x613   : > { %2370 = vadd.xlane.f32.xlu0 %v2369_v55  ;;  %v2901_v43 = vpop.permute.xlu0 %2900  ;;  %v3568_v55 = vsel %vm1745_vm0, %v9537_v28, 0.0 }
 0x614   : > { %5477 = vst.msk [vmem:[%s7315_s29 + $0x70] sm:$0xf] %vm2085_vm1, %v2901_v43 }
 0x616   : > { %v6248_v37 = vpop.eup %6247 }
 0x617   : > { %v1841_v52 = vmul.f32 8.0, %v6248_v37  ;;  %2564 = vadd.xlane.f32.xlu0 %v2563_v34  ;;  %v2889_v44 = vpop.permute.xlu0 %2888 }
 0x618   : > { %5471 = vst.msk [vmem:[%s7315_s29 + $0x58] sm:$0xf] %vm2085_vm1, %v2889_v44 }
 0x619   : > { %v1858_v47 = vmul.f32 %v7467_v16, %v1841_v52  ;;  %v9538_v52 = vld [vmem:[#allocation121_spill] sm:$0xff] }
 0x61a   : > { %v6250_v36 = vpop.eup %6249  ;;  %v2542_v44 = vsel %vm1745_vm0, %v9538_v52, 0.0  ;;  %v9548_v52 = vld [vmem:[#allocation124_spill] sm:$0xff] }
 0x61b   : > { %v1874_v62 = vmul.f32 %v1858_v47, %v9514_v39  ;;  %v1987_v11 = vmul.f32 8.0, %v6250_v36  ;;  %v2905_v14 = vpop.permute.xlu0 %2904  ;;  %v9539_v47 = vld [vmem:[#allocation44_spill] sm:$0xff] }
 0x61c   : > { %5479 = vst.msk [vmem:[%s7315_s29 + $0x78] sm:$0xf] %vm2085_vm1, %v2905_v14  ;;  %v3571_v36 = vsel %vm1745_vm0, %v9539_v47, 0.0  ;;  %v9549_v47 = vld [vmem:[#allocation80_spill] sm:$0xff] }
 0x61d   : > { %v5687_v57 = vpack.c.bf16 %v1874_v62, %v1874_v62  ;;  %v2004_v61 = vmul.f32 %v7472_v13, %v1987_v11 }
 0x61f   : > { %2101 = vst.msk [vmem:[%s7481_s14 + $0x3c] sm:$0xf] %vm2085_vm1, %v5687_v57  ;;  %v2020_v41 = vmul.f32 %v2004_v61, %v8181_v42  ;;  %v9540_v57 = vld [vmem:[#allocation42_spill] sm:$0xff] }
 0x620   : > { %v2354_v61 = vsel %vm1745_vm0, %v9540_v57, 0.0 }
 0x621   : > { %v5703_v15 = vpack.c.bf16 %v2020_v41, %v2020_v41  ;;  %v3577_v41 = vsel %vm1745_vm0, %v8217_v18, 0.0 }
 0x623   : > { %2181 = vst.msk [vmem:[%s7490_s9 + $0x3c] sm:$0xf] %vm2085_vm1, %v5703_v15  ;;  %3711 = vrot.lane.b32.xlu1 %v8110_v49, %s6519_s2 }
 0x62d   : > { %3713 = vrot.lane.b32.xlu0 %v8168_v25, %s6519_s2  ;;  %v2536_v25 = vsel %vm1745_vm0, %v7852_v40, 0.0 }
 0x631   : > { %3717 = vrot.lane.b32.xlu0 %v8268_v59, %s6519_s2 }
 0x642   : > { %v3005_v23 = vpop.xlane.xlu1 %3004 }
 0x643   : > { %v3021_v38 = vmax.f32 %v3005_v23, 1e-24 }
 0x645   : > { %6251 = vrsqrt.f32 %v3021_v38  ;;  %v9541_v38 = vld [vmem:[#allocation78_spill] sm:$0xff] }
 0x646   : > { %v3151_v1 = vpop.xlane.xlu1 %3150 }
 0x647   : > { %v3167_v3 = vmax.f32 %v3151_v1, 1e-24  ;;  %2343 = vadd.xlane.f32.xlu1 %v2342_v45  ;;  %v2548_v1 = vsel %vm1745_vm0, %v9541_v38, 0.0  ;;  %v3583_v45 = vsel %vm1745_vm0, %v8336_v35, 0.0  ;;  %v9545_v35 = vld [vmem:[#allocation106_spill] sm:$0xff] }
 0x649   : > { %6253 = vrsqrt.f32 %v3167_v3 }
 0x64a   : > { %v2879_v49 = vpop.permute.xlu1 %2878 }
 0x64b   : > { %5466 = vst.msk [vmem:[%s7315_s29 + $0x44] sm:$0xf] %vm2085_vm1, %v2879_v49  ;;  %2537 = vadd.xlane.f32.xlu1 %v2536_v25  ;;  %v9542_v49 = vld [vmem:[#allocation79_spill] sm:$0xff]  ;;  %v9543_v25 = vld [vmem:[#allocation69_spill] sm:$0xff] }
 0x64c   : > { %v8412_v59 = vpop.xlane.xlu0 %2328  ;;  %v2360_v18 = vsel %vm1745_vm0, %v9542_v49, 0.0  ;;  %v9551_v49 = vld [vmem:[#allocation19_spill] sm:$0xff] }
 0x64e   : > { %v2895_v5 = vpop.permute.xlu1 %2894 }
 0x64f   : > { %v6252_v27 = vpop.eup %6251  ;;  %5474 = vst.msk [vmem:[%s7315_s29 + $0x64] sm:$0xf] %vm2085_vm1, %v2895_v5  ;;  %3557 = vadd.xlane.f32.xlu1 %v3556_v60  ;;  %v3735_v5 = vsel %vm1745_vm0, %v9543_v25, 0.0 }
 0x650   : > { %v3053_v58 = vmul.f32 8.0, %v6252_v27  ;;  %3566 = vadd.xlane.f32.xlu0 %v3565_v50  ;;  %v8420_v40 = vpop.xlane.xlu0 %2522  ;;  %v9544_v50 = vld [vmem:[#allocation46_spill] sm:$0xff] }
 0x652   : > { %v3070_v20 = vmul.f32 %v3053_v58, %v7467_v16  ;;  %v2883_v12 = vpop.permute.xlu1 %2882  ;;  %v2554_v58 = vsel %vm1745_vm0, %v9544_v50, 0.0 }
 0x653   : > { %v6254_v21 = vpop.eup %6253  ;;  %5468 = vst.msk [vmem:[%s7315_s29 + $0x4c] sm:$0xf] %vm2085_vm1, %v2883_v12  ;;  %2349 = vadd.xlane.f32.xlu1 %v2348_v46  ;;  %v2366_v46 = vsel %vm1745_vm0, %v8224_v32, 0.0  ;;  %v2372_v32 = vsel %vm1745_vm0, %v8344_v10, 0.0 }
 0x654   : > { %v3086_v33 = vmul.f32 %v3070_v20, %v9520_v22  ;;  %v3199_v43 = vmul.f32 8.0, %v6254_v21  ;;  %3569 = vadd.xlane.f32.xlu0 %v3568_v55  ;;  %v8430_v37 = vpop.xlane.xlu0 %3542  ;;  %v3741_v20 = vsel %vm1745_vm0, %v9545_v35, 0.0  ;;  %v9546_v21 = vld [vmem:[#allocation113_spill] sm:$0xff]  ;;  %v2560_v55 = vsel %vm1745_vm0, %v8230_v19, 0.0 }
 0x655   : > { %v3747_v28 = vsel %vm1745_vm0, %v9546_v21, 0.0 }
 0x656   : > { %v5767_v16 = vpack.c.bf16 %v3086_v33, %v3086_v33  ;;  %v3216_v34 = vmul.f32 %v3199_v43, %v7472_v13  ;;  %v2899_v31 = vpop.permute.xlu1 %2898  ;;  %v2375_v33 = vmax.f32 %v8412_v59, 1e-24  ;;  %v9547_v43 = vld [vmem:[#allocation119_spill] sm:$0xff]  ;;  %v2566_v59 = vsel %vm1745_vm0, %v8352_v53, 0.0 }
 0x657   : > { %5476 = vst.msk [vmem:[%s7315_s29 + $0x6c] sm:$0xf] %vm2085_vm1, %v2899_v31  ;;  %2543 = vadd.xlane.f32.xlu1 %v2542_v44  ;;  %v2569_v31 = vmax.f32 %v8420_v40, 1e-24  ;;  %v3759_v44 = vsel %vm1745_vm0, %v9548_v52, 0.0 }
 0x658   : > { %5512 = vst.msk [vmem:[%s7481_s14 + $0xbc] sm:$0xf] %vm2085_vm1, %v5767_v16  ;;  %v3232_v62 = vmul.f32 %v3216_v34, %v8261_v9  ;;  %3572 = vadd.xlane.f32.xlu0 %v3571_v36  ;;  %v8442_v11 = vpop.xlane.xlu0 %2334  ;;  %v3753_v16 = vsel %vm1745_vm0, %v9547_v43, 0.0  ;;  %6255 = vrsqrt.f32 %v2375_v33  ;;  %v3765_v36 = vsel %vm1745_vm0, %v9549_v47, 0.0 }
 0x659   : > { %6257 = vrsqrt.f32 %v2569_v31 }
 0x65a   : > { %v5783_v13 = vpack.c.bf16 %v3232_v62, %v3232_v62  ;;  %v2887_v14 = vpop.permute.xlu1 %2886 }
 0x65b   : > { %5470 = vst.msk [vmem:[%s7315_s29 + $0x54] sm:$0xf] %vm2085_vm1, %v2887_v14  ;;  %2355 = vadd.xlane.f32.xlu1 %v2354_v61  ;;  %v8498_v14 = vstv %s2262_s8 }
 0x65c   : > { %5544 = vst.msk [vmem:[%s7490_s9 + $0xbc] sm:$0xf] %vm2085_vm1, %v5783_v13  ;;  %3578 = vadd.xlane.f32.xlu0 %v3577_v41  ;;  %v8452_v15 = vpop.xlane.xlu0 %2528 }
 0x65d   : > { %v2571_v21 = vmax.f32 %v8452_v15, 1e-24  ;;  %v3580_v15 = vsel %vm1745_vm0, %v8280_v63, 0.0 }
 0x65e   : > { %v2903_v23 = vpop.permute.xlu1 %2902 }
 0x65f   : > { %5478 = vst.msk [vmem:[%s7315_s29 + $0x74] sm:$0xf] %vm2085_vm1, %v2903_v23  ;;  %2549 = vadd.xlane.f32.xlu1 %v2548_v1  ;;  %v8501_v23 = vstv %s2456_s22  ;;  %v9550_v1 = vld [vmem:[#allocation17_spill] sm:$0xff]  ;;  %6259 = vrsqrt.f32 %v2571_v21 }
 0x660   : > { %3584 = vadd.xlane.f32.xlu0 %v3583_v45  ;;  %v8466_v60 = vpop.xlane.xlu0 %3548 }
 0x662   : > { %v2891_v3 = vpop.permute.xlu1 %2890  ;;  %v6256_v62 = vpop.eup %6255 }
 0x663   : > { %5472 = vst.msk [vmem:[%s7315_s29 + $0x5c] sm:$0xf] %vm2085_vm1, %v2891_v3  ;;  %2361 = vadd.xlane.f32.xlu1 %v2360_v18  ;;  %v2407_v40 = vmul.f32 8.0, %v6256_v62  ;;  %v6258_v13 = vpop.eup %6257 }
 0x664   : > { %3736 = vadd.xlane.f32.xlu0 %v3735_v5  ;;  %v8474_v12 = vpop.xlane.xlu0 %2337  ;;  %v2601_v41 = vmul.f32 8.0, %v6258_v13 }
 0x665   : > { %v2424_v61 = vmul.f32 %v8498_v14, %v2407_v40 }
 0x666   : > { %v2907_v27 = vpop.permute.xlu1 %2906  ;;  %v2618_v53 = vmul.f32 %v8501_v23, %v2601_v41 }
 0x667   : > { %5480 = vst.msk [vmem:[%s7315_s29 + $0x7c] sm:$0xf] %vm2085_vm1, %v2907_v27  ;;  %2555 = vadd.xlane.f32.xlu1 %v2554_v58  ;;  %v2440_v45 = vmul.f32 %v2424_v61, %v9550_v1  ;;  %v9554_v61 = vld [vmem:[#allocation104_spill] sm:$0xff] }
 0x668   : > { %3742 = vadd.xlane.f32.xlu0 %v3741_v20  ;;  %v8485_v34 = vpop.xlane.xlu0 %2531  ;;  %v2634_v18 = vmul.f32 %v2618_v53, %v9551_v49  ;;  %v3738_v41 = vsel %vm1745_vm0, %v9554_v61, 0.0  ;;  %v9555_v49 = vld [vmem:[#allocation110_spill] sm:$0xff]  ;;  %v9560_v61 = vld [vmem:[#allocation73_spill] sm:$0xff] }
 0x669   : > { %v5720_v3 = vpack.c.bf16 %v2440_v45, %v2440_v45 }
 0x66a   : > { %v5736_v5 = vpack.c.bf16 %v2634_v18, %v2634_v18 }
 0x66b   : > { %2367 = vadd.xlane.f32.xlu1 %v2366_v46 }
 0x66c   : > { %3748 = vadd.xlane.f32.xlu0 %v3747_v28  ;;  %v8492_v19 = vpop.xlane.xlu0 %3551  ;;  %v9552_v28 = vld [vmem:[#allocation123_spill] sm:$0xff] }
 0x66f   : > { %2561 = vadd.xlane.f32.xlu1 %v2560_v55  ;;  %v3562_v55 = vsel %vm1745_vm0, %v9552_v28, 0.0 }
 0x670   : > { %3754 = vadd.xlane.f32.xlu0 %v3753_v16  ;;  %v2341_v10 = vpop.xlane.xlu0 %2340 }
 0x671   : > { %v2379_v33 = vmax.f32 %v2341_v10, 1e-24  ;;  %v3586_v10 = vsel %vm1745_vm0, %v8404_v29, 0.0  ;;  %v3744_v29 = vsel %vm1745_vm0, %v9555_v49, 0.0 }
 0x673   : > { %2373 = vadd.xlane.f32.xlu1 %v2372_v32  ;;  %v9553_v32 = vld [vmem:[#allocation45_spill] sm:$0xff]  ;;  %6261 = vrsqrt.f32 %v2379_v33 }
 0x674   : > { %3760 = vadd.xlane.f32.xlu0 %v3759_v44  ;;  %v2535_v57 = vpop.xlane.xlu0 %2534  ;;  %v3574_v31 = vsel %vm1745_vm0, %v9553_v32, 0.0 }
 0x675   : > { %v2573_v52 = vmax.f32 %v2535_v57, 1e-24 }
 0x677   : > { %2567 = vadd.xlane.f32.xlu1 %v2566_v59  ;;  %6263 = vrsqrt.f32 %v2573_v52 }
 0x678   : > { %3766 = vadd.xlane.f32.xlu0 %v3765_v36  ;;  %v8504_v38 = vpop.xlane.xlu0 %3554  ;;  %v6260_v36 = vpop.eup %6259 }
 0x679   : > { %v2603_v13 = vmul.f32 8.0, %v6260_v36  ;;  %v9559_v36 = vld [vmem:[#allocation122_spill] sm:$0xff] }
 0x67b   : > { %v2620_v63 = vmul.f32 %v8501_v23, %v2603_v13 }
 0x67c   : > { %v2347_v25 = vpop.xlane.xlu0 %2346 }
 0x67d   : > { %v2381_v47 = vmax.f32 %v2347_v25, 1e-24  ;;  %v6262_v57 = vpop.eup %6261 }
 0x67e   : > { %v2411_v1 = vmul.f32 8.0, %v6262_v57 }
 0x67f   : > { %6265 = vrsqrt.f32 %v2381_v47 }
 0x680   : > { %v2541_v27 = vpop.xlane.xlu0 %2540  ;;  %v2428_v25 = vmul.f32 %v8498_v14, %v2411_v1 }
 0x681   : > { %v2575_v62 = vmax.f32 %v2541_v27, 1e-24  ;;  %v6264_v45 = vpop.eup %6263  ;;  %v9556_v27 = vld [vmem:[#allocation65_spill] sm:$0xff] }
 0x682   : > { %v2636_v21 = vmul.f32 %v2620_v63, %v9556_v27 }
 0x683   : > { %6267 = vrsqrt.f32 %v2575_v62 }
 0x684   : > { %v8512_v50 = vpop.xlane.xlu0 %3560  ;;  %v5738_v52 = vpack.c.bf16 %v2636_v21, %v2636_v21  ;;  %v2377_v21 = vmax.f32 %v8442_v11, 1e-24  ;;  %v2378_v11 = vmax.f32 %v8474_v12, 1e-24  ;;  %v2572_v12 = vmax.f32 %v8485_v34, 1e-24 }
 0x688   : > { %3715 = vrot.lane.b32.xlu1 %v8206_v54, %s6519_s2  ;;  %v2353_v35 = vpop.xlane.xlu0 %2352 }
 0x689   : > { %v2383_v53 = vmax.f32 %v2353_v35, 1e-24  ;;  %v6266_v28 = vpop.eup %6265 }
 0x68b   : > { %6269 = vrsqrt.f32 %v2383_v53 }
 0x68c   : > { %v2547_v54 = vpop.xlane.xlu0 %2546 }
 0x68d   : > { %v2577_v18 = vmax.f32 %v2547_v54, 1e-24  ;;  %v9558_v54 = vld [vmem:[#allocation26_spill] sm:$0xff] }
 0x68e   : > { %2698 = vrot.lane.b32.xlu0 %v5720_v3, %s6519_s2 }
 0x68f   : > { %6271 = vrsqrt.f32 %v2577_v18 }
 0x690   : > { %v2359_v43 = vpop.xlane.xlu0 %2358 }
 0x691   : > { %v2385_v33 = vmax.f32 %v2359_v43, 1e-24 }
 0x692   : > { %2811 = vrot.lane.b32.xlu0 %v5736_v5, %s6519_s2  ;;  %v2605_v5 = vmul.f32 8.0, %v6264_v45 }
 0x693   : > { %6273 = vrsqrt.f32 %v2385_v33 }
 0x694   : > { %v2553_v59 = vpop.xlane.xlu0 %2552  ;;  %v2622_v32 = vmul.f32 %v8501_v23, %v2605_v5 }
 0x695   : > { %v2579_v62 = vmax.f32 %v2553_v59, 1e-24 }
 0x697   : > { %v8514_v58 = vpop.xlane.xlu1 %2331 }
 0x698   : > { %v2365_v40 = vpop.xlane.xlu0 %2364  ;;  %v2376_v47 = vmax.f32 %v8514_v58, 1e-24  ;;  %v9561_v58 = vld [vmem:[#allocation41_spill] sm:$0xff] }
 0x699   : > { %v3762_v45 = vsel %vm1745_vm0, %v9561_v58, 0.0  ;;  %v2387_v49 = vmax.f32 %v2365_v40, 1e-24 }
 0x69a   : > { %6275 = vrsqrt.f32 %v2376_v47 }
 0x69b   : > { %v8516_v20 = vpop.xlane.xlu1 %2525  ;;  %6277 = vrsqrt.f32 %v2579_v62 }
 0x69c   : > { %v2559_v3 = vpop.xlane.xlu0 %2558  ;;  %v2570_v63 = vmax.f32 %v8516_v20, 1e-24  ;;  %v9563_v20 = vld [vmem:[#allocation82_spill] sm:$0xff] }
 0x69e   : > { %6279 = vrsqrt.f32 %v2570_v63 }
 0x69f   : > { %v8518_v46 = vpop.xlane.xlu1 %3545  ;;  %6281 = vrsqrt.f32 %v2387_v49 }
 0x6a0   : > { %6283 = vrsqrt.f32 %v2377_v21 }
 0x6a3   : > { %v3712_v16 = vpop.permute.xlu1 %3711 }
 0x6a4   : > { %v3771_v44 = vsel %vm1745_vm0, %v3712_v16, 0.0  ;;  %v8539_v16 = vpop.xlane.xlu0 %2370 }
 0x6a8   : > { %v2565_v1 = vpop.xlane.xlu0 %2564 }
 0x6ac   : > { %3563 = vadd.xlane.f32.xlu1 %v3562_v55  ;;  %v9557_v55 = vld [vmem:[#allocation115_spill] sm:$0xff] }
 0x6ad   : > { %v3750_v35 = vsel %vm1745_vm0, %v9557_v55, 0.0  ;;  %v2581_v55 = vmax.f32 %v2559_v3, 1e-24  ;;  %v2389_v3 = vmax.f32 %v8539_v16, 1e-24 }
 0x6af   : > { %6285 = vrsqrt.f32 %v2581_v55 }
 0x6b0   : > { %3575 = vadd.xlane.f32.xlu1 %v3574_v31  ;;  %v2413_v31 = vmul.f32 8.0, %v6266_v28  ;;  %v3768_v28 = vsel %vm1745_vm0, %v9563_v20, 0.0  ;;  %6287 = vrsqrt.f32 %v2378_v11 }
 0x6b1   : > { %3772 = vadd.xlane.f32.xlu0 %v3771_v44  ;;  %v2444_v44 = vmul.f32 %v2428_v25, %v9558_v54  ;;  %v9562_v25 = vld [vmem:[#allocation30_spill] sm:$0xff]  ;;  %6289 = vrsqrt.f32 %v2389_v3 }
 0x6b2   : > { %v2430_v43 = vmul.f32 %v8498_v14, %v2413_v31  ;;  %v9564_v31 = vld [vmem:[#allocation107_spill] sm:$0xff]  ;;  %6291 = vrsqrt.f32 %v2572_v12 }
 0x6b3   : > { %v5724_v57 = vpack.c.bf16 %v2444_v44, %v2444_v44 }
 0x6b4   : > { %3581 = vadd.xlane.f32.xlu1 %v3580_v15  ;;  %v6268_v15 = vpop.eup %6267  ;;  %v2446_v5 = vmul.f32 %v2430_v43, %v9562_v25  ;;  %v9565_v43 = vld [vmem:[#allocation34_spill] sm:$0xff] }
 0x6b5   : > { %v2607_v13 = vmul.f32 8.0, %v6268_v15  ;;  %v6270_v53 = vpop.eup %6269 }
 0x6b6   : > { %v6272_v27 = vpop.eup %6271 }
 0x6b7   : > { %v2624_v59 = vmul.f32 %v8501_v23, %v2607_v13  ;;  %v2609_v33 = vmul.f32 8.0, %v6272_v27  ;;  %v6274_v54 = vpop.eup %6273 }
 0x6b8   : > { %3587 = vadd.xlane.f32.xlu1 %v3586_v10  ;;  %v3756_v10 = vsel %vm1745_vm0, %v9559_v36, 0.0  ;;  %v6276_v15 = vpop.eup %6275 }
 0x6b9   : > { %v2626_v36 = vmul.f32 %v8501_v23, %v2609_v33 }
 0x6bc   : > { %3739 = vadd.xlane.f32.xlu1 %v3738_v41  ;;  %v2638_v41 = vmul.f32 %v2622_v32, %v9560_v61  ;;  %v5726_v32 = vpack.c.bf16 %v2446_v5, %v2446_v5  ;;  %v2408_v61 = vmul.f32 8.0, %v6276_v15 }
 0x6be   : > { %v5740_v18 = vpack.c.bf16 %v2638_v41, %v2638_v41  ;;  %v2425_v34 = vmul.f32 %v8498_v14, %v2408_v61 }
 0x6c0   : > { %3745 = vadd.xlane.f32.xlu1 %v3744_v29  ;;  %v2415_v29 = vmul.f32 8.0, %v6270_v53  ;;  %v2583_v53 = vmax.f32 %v2565_v1, 1e-24 }
 0x6c2   : > { %v2432_v40 = vmul.f32 %v8498_v14, %v2415_v29  ;;  %6293 = vrsqrt.f32 %v2583_v53  ;;  %v9570_v53 = vld [vmem:[#allocation21_spill] sm:$0xff] }
 0x6c4   : > { %3751 = vadd.xlane.f32.xlu1 %v3750_v35  ;;  %v3714_v35 = vpop.permute.xlu0 %3713  ;;  %v2448_v13 = vmul.f32 %v2432_v40, %v9565_v43 }
 0x6c5   : > { %v3774_v44 = vsel %vm1745_vm0, %v3714_v35, 0.0  ;;  %v9567_v35 = vld [vmem:[#allocation38_spill] sm:$0xff] }
 0x6c6   : > { %v5728_v49 = vpack.c.bf16 %v2448_v13, %v2448_v13 }
 0x6c7   : > { %2815 = vrot.lane.b32.xlu0 %v5738_v52, %s6519_s2  ;;  %v2640_v52 = vmul.f32 %v2624_v59, %v9564_v31  ;;  %v9566_v59 = vld [vmem:[#allocation114_spill] sm:$0xff] }
 0x6c8   : > { %3757 = vadd.xlane.f32.xlu1 %v3756_v10  ;;  %v2417_v10 = vmul.f32 8.0, %v6274_v54  ;;  %v2642_v29 = vmul.f32 %v2626_v36, %v9566_v59  ;;  %v9568_v54 = vld [vmem:[#allocation20_spill] sm:$0xff] }
 0x6c9   : > { %v5742_v62 = vpack.c.bf16 %v2640_v52, %v2640_v52  ;;  %v2441_v11 = vmul.f32 %v2425_v34, %v9568_v54 }
 0x6ca   : > { %v2434_v16 = vmul.f32 %v8498_v14, %v2417_v10  ;;  %v5744_v55 = vpack.c.bf16 %v2642_v29, %v2642_v29 }
 0x6cb   : > { %2706 = vrot.lane.b32.xlu0 %v5724_v57, %s6519_s2  ;;  %v6278_v57 = vpop.eup %6277 }
 0x6cc   : > { %3763 = vadd.xlane.f32.xlu1 %v3762_v45  ;;  %v6280_v41 = vpop.eup %6279  ;;  %v2611_v58 = vmul.f32 8.0, %v6278_v57  ;;  %v8570_v45 = vpop.permute.xlu0 %3717  ;;  %v2450_v40 = vmul.f32 %v2434_v16, %v9567_v35 }
 0x6cd   : > { %v2602_v5 = vmul.f32 8.0, %v6280_v41  ;;  %v5721_v41 = vpack.c.bf16 %v2441_v11, %v2441_v11 }
 0x6ce   : > { %v2628_v21 = vmul.f32 %v8501_v23, %v2611_v58  ;;  %v5730_v10 = vpack.c.bf16 %v2450_v40, %v2450_v40 }
 0x6cf   : > { %2819 = vrot.lane.b32.xlu0 %v5740_v18, %s6519_s2  ;;  %v6282_v18 = vpop.eup %6281  ;;  %v2619_v52 = vmul.f32 %v8501_v23, %v2602_v5 }
 0x6d0   : > { %3769 = vadd.xlane.f32.xlu1 %v3768_v28  ;;  %v6284_v27 = vpop.eup %6283  ;;  %v2419_v20 = vmul.f32 8.0, %v6282_v18 }
 0x6d1   : > { %v6286_v33 = vpop.eup %6285  ;;  %v2409_v31 = vmul.f32 8.0, %v6284_v27 }
 0x6d2   : > { %v2436_v3 = vmul.f32 %v8498_v14, %v2419_v20 }
 0x6d3   : > { %2710 = vrot.lane.b32.xlu0 %v5726_v32, %s6519_s2  ;;  %v2426_v12 = vmul.f32 %v8498_v14, %v2409_v31 }
 0x6d4   : > { %v2344_v47 = vpop.xlane.xlu1 %2343  ;;  %3775 = vadd.xlane.f32.xlu1 %v3774_v44  ;;  %v6288_v44 = vpop.eup %6287 }
 0x6d5   : > { %v2380_v25 = vmax.f32 %v2344_v47, 1e-24  ;;  %v2613_v47 = vmul.f32 8.0, %v6286_v33  ;;  %v6290_v13 = vpop.eup %6289  ;;  %v2410_v61 = vmul.f32 8.0, %v6288_v44 }
 0x6d6   : > { %v6292_v16 = vpop.eup %6291  ;;  %v2421_v59 = vmul.f32 8.0, %v6290_v13 }
 0x6d7   : > { %2823 = vrot.lane.b32.xlu0 %v5742_v62, %s6519_s2  ;;  %6295 = vrsqrt.f32 %v2380_v25  ;;  %v9569_v62 = vld [vmem:[#allocation120_spill] sm:$0xff]  ;;  %v2452_v25 = vmul.f32 %v2436_v3, %v9493_v6  ;;  %v6294_v34 = vpop.eup %6293  ;;  %v2427_v27 = vmul.f32 %v8498_v14, %v2410_v61 }
 0x6d8   : > { %v2538_v63 = vpop.xlane.xlu1 %2537  ;;  %v2644_v43 = vmul.f32 %v2628_v21, %v9569_v62  ;;  %v2604_v21 = vmul.f32 8.0, %v6292_v16  ;;  %v2615_v31 = vmul.f32 8.0, %v6294_v34  ;;  %v9573_v16 = vld [vmem:[#allocation67_spill] sm:$0xff] }
 0x6d9   : > { %v2574_v32 = vmax.f32 %v2538_v63, 1e-24  ;;  %v2635_v63 = vmul.f32 %v2619_v52, %v9570_v53  ;;  %v5732_v6 = vpack.c.bf16 %v2452_v25, %v2452_v25 }
 0x6da   : > { %v5746_v18 = vpack.c.bf16 %v2644_v43, %v2644_v43  ;;  %v2621_v44 = vmul.f32 %v8501_v23, %v2604_v21  ;;  %v2632_v13 = vmul.f32 %v8501_v23, %v2615_v31 }
 0x6db   : > { %2714 = vrot.lane.b32.xlu0 %v5728_v49, %s6519_s2  ;;  %6297 = vrsqrt.f32 %v2574_v32  ;;  %v2630_v49 = vmul.f32 %v8501_v23, %v2613_v47  ;;  %v5737_v20 = vpack.c.bf16 %v2635_v63, %v2635_v63  ;;  %v2438_v32 = vmul.f32 %v8498_v14, %v2421_v59  ;;  %v9572_v47 = vld [vmem:[#allocation24_spill] sm:$0xff] }
 0x6dc   : > { %v8575_v1 = vpop.xlane.xlu1 %3557  ;;  %v2648_v34 = vmul.f32 %v2632_v13, %v8124_v17 }
 0x6dd   : > { %v8578_v28 = vpop.xlane.xlu0 %3566  ;;  %v2646_v54 = vmul.f32 %v2630_v49, %v8035_v30  ;;  %v2454_v30 = vmul.f32 %v2438_v32, %v9505_v24 }
 0x6de   : > { %v5750_v32 = vpack.c.bf16 %v2648_v34, %v2648_v34 }
 0x6df   : > { %2827 = vrot.lane.b32.xlu0 %v5744_v55, %s6519_s2  ;;  %v9571_v55 = vld [vmem:[#allocation22_spill] sm:$0xff]  ;;  %v5734_v25 = vpack.c.bf16 %v2454_v30, %v2454_v30 }
 0x6e0   : > { %v2350_v15 = vpop.xlane.xlu1 %2349  ;;  %v2442_v35 = vmul.f32 %v2426_v12, %v9571_v55  ;;  %v5748_v12 = vpack.c.bf16 %v2646_v54, %v2646_v54 }
 0x6e1   : > { %v8585_v36 = vpop.xlane.xlu0 %3569  ;;  %v2382_v57 = vmax.f32 %v2350_v15, 1e-24  ;;  %v6296_v40 = vpop.eup %6295 }
 0x6e2   : > { %v2412_v15 = vmul.f32 8.0, %v6296_v40  ;;  %v5722_v3 = vpack.c.bf16 %v2442_v35, %v2442_v35 }
 0x6e3   : > { %2718 = vrot.lane.b32.xlu0 %v5730_v10, %s6519_s2  ;;  %6299 = vrsqrt.f32 %v2382_v57  ;;  %v2443_v10 = vmul.f32 %v2427_v27, %v9572_v47 }
 0x6e4   : > { %v2544_v58 = vpop.xlane.xlu1 %2543 }
 0x6e5   : > { %2700 = vrot.lane.b32.xlu1 %v5721_v41, %s6519_s2  ;;  %v8593_v29 = vpop.xlane.xlu0 %3572  ;;  %v2576_v5 = vmax.f32 %v2544_v58, 1e-24  ;;  %v6298_v62 = vpop.eup %6297  ;;  %v2429_v41 = vmul.f32 %v8498_v14, %v2412_v15  ;;  %v5723_v63 = vpack.c.bf16 %v2443_v10, %v2443_v10  ;;  %v2637_v58 = vmul.f32 %v2621_v44, %v9573_v16 }
 0x6e6   : > { %v2606_v53 = vmul.f32 8.0, %v6298_v62 }
 0x6e7   : > { %2831 = vrot.lane.b32.xlu0 %v5746_v18, %s6519_s2  ;;  %6301 = vrsqrt.f32 %v2576_v5  ;;  %v5739_v21 = vpack.c.bf16 %v2637_v58, %v2637_v58 }
 0x6e8   : > { %v2356_v33 = vpop.xlane.xlu1 %2355  ;;  %v2623_v5 = vmul.f32 %v8501_v23, %v2606_v53 }
 0x6e9   : > { %2813 = vrot.lane.b32.xlu1 %v5737_v20, %s6519_s2  ;;  %v8601_v52 = vpop.xlane.xlu0 %3578  ;;  %v2384_v11 = vmax.f32 %v2356_v33, 1e-24  ;;  %v9574_v20 = vld [vmem:[#allocation28_spill] sm:$0xff] }
 0x6ea   : > { %v2445_v55 = vmul.f32 %v2429_v41, %v9574_v20  ;;  %v9578_v20 = vld [vmem:[#allocation36_spill] sm:$0xff] }
 0x6eb   : > { %2722 = vrot.lane.b32.xlu0 %v5732_v6, %s6519_s2  ;;  %6303 = vrsqrt.f32 %v2384_v11  ;;  %v9575_v11 = vld [vmem:[#allocation103_spill] sm:$0xff] }
 0x6ec   : > { %v2550_v43 = vpop.xlane.xlu1 %2549  ;;  %v5725_v54 = vpack.c.bf16 %v2445_v55, %v2445_v55  ;;  %v2639_v44 = vmul.f32 %v2623_v5, %v9575_v11 }
 0x6ed   : > { %2702 = vrot.lane.b32.xlu1 %v5722_v3, %s6519_s2  ;;  %v8609_v57 = vpop.xlane.xlu0 %3584  ;;  %v2578_v61 = vmax.f32 %v2550_v43, 1e-24  ;;  %v6300_v49 = vpop.eup %6299 }
 0x6ee   : > { %v2414_v27 = vmul.f32 8.0, %v6300_v49  ;;  %v5741_v13 = vpack.c.bf16 %v2639_v44, %v2639_v44 }
 0x6ef   : > { %2835 = vrot.lane.b32.xlu0 %v5748_v12, %s6519_s2  ;;  %6305 = vrsqrt.f32 %v2578_v61  ;;  %v9576_v12 = vld [vmem:[#allocation32_spill] sm:$0xff] }
 0x6f0   : > { %v2362_v59 = vpop.xlane.xlu1 %2361  ;;  %v2431_v17 = vmul.f32 %v8498_v14, %v2414_v27 }
 0x6f1   : > { %2704 = vrot.lane.b32.xlu1 %v5723_v63, %s6519_s2  ;;  %v8616_v18 = vpop.xlane.xlu0 %3736  ;;  %v2386_v24 = vmax.f32 %v2362_v59, 1e-24  ;;  %v6302_v35 = vpop.eup %6301  ;;  %v9577_v59 = vld [vmem:[#allocation111_spill] sm:$0xff] }
 0x6f2   : > { %v2608_v6 = vmul.f32 8.0, %v6302_v35  ;;  %v2447_v30 = vmul.f32 %v2431_v17, %v9576_v12 }
 0x6f3   : > { %2726 = vrot.lane.b32.xlu0 %v5734_v25, %s6519_s2  ;;  %6307 = vrsqrt.f32 %v2386_v24 }
 0x6f4   : > { %v2556_v40 = vpop.xlane.xlu1 %2555  ;;  %v2625_v62 = vmul.f32 %v8501_v23, %v2608_v6  ;;  %v5727_v49 = vpack.c.bf16 %v2447_v30, %v2447_v30 }
 0x6f5   : > { %2817 = vrot.lane.b32.xlu1 %v5739_v21, %s6519_s2  ;;  %v8623_v33 = vpop.xlane.xlu0 %3742  ;;  %v2580_v31 = vmax.f32 %v2556_v40, 1e-24  ;;  %v6304_v15 = vpop.eup %6303 }
 0x6f6   : > { %v2416_v43 = vmul.f32 8.0, %v6304_v15  ;;  %v2641_v25 = vmul.f32 %v2625_v62, %v9577_v59 }
 0x6f7   : > { %2839 = vrot.lane.b32.xlu0 %v5750_v32, %s6519_s2  ;;  %6309 = vrsqrt.f32 %v2580_v31 }
 0x6f8   : > { %v2368_v3 = vpop.xlane.xlu1 %2367  ;;  %v2433_v16 = vmul.f32 %v8498_v14, %v2416_v43  ;;  %v5743_v21 = vpack.c.bf16 %v2641_v25, %v2641_v25  ;;  %v9580_v43 = vld [vmem:[#allocation40_spill] sm:$0xff]  ;;  %v3593_v25 = vmax.f32 %v8504_v38, 1e-24  ;;  %v3597_v38 = vmax.f32 %v8578_v28, 1e-24 }
 0x6f9   : > { %2708 = vrot.lane.b32.xlu1 %v5725_v54, %s6519_s2  ;;  %v8629_v47 = vpop.xlane.xlu0 %3748  ;;  %v2388_v10 = vmax.f32 %v2368_v3, 1e-24  ;;  %v6306_v61 = vpop.eup %6305  ;;  %v9579_v54 = vld [vmem:[#allocation117_spill] sm:$0xff]  ;;  %v3603_v28 = vmax.f32 %v8609_v57, 1e-24 }
 0x6fa   : > { %v2610_v58 = vmul.f32 8.0, %v6306_v61  ;;  %v2449_v55 = vmul.f32 %v2433_v16, %v9578_v20  ;;  %v3589_v61 = vmax.f32 %v8430_v37, 1e-24  ;;  %v3785_v57 = vmax.f32 %v8623_v33, 1e-24 }
 0x6fb   : > { %6311 = vrsqrt.f32 %v2388_v10 }
 0x6fc   : > { %v2562_v41 = vpop.xlane.xlu1 %2561  ;;  %v2627_v5 = vmul.f32 %v8501_v23, %v2610_v58  ;;  %v5729_v6 = vpack.c.bf16 %v2449_v55, %v2449_v55 }
 0x6fd   : > { %2821 = vrot.lane.b32.xlu1 %v5741_v13, %s6519_s2  ;;  %v8634_v53 = vpop.xlane.xlu0 %3754  ;;  %v2582_v63 = vmax.f32 %v2562_v41, 1e-24  ;;  %v6308_v34 = vpop.eup %6307 }
 0x6fe   : > { %v2418_v27 = vmul.f32 8.0, %v6308_v34  ;;  %v2643_v11 = vmul.f32 %v2627_v5, %v9579_v54  ;;  %v3601_v54 = vmax.f32 %v8601_v52, 1e-24 }
 0x6ff   : > { %6313 = vrsqrt.f32 %v2582_v63 }
 0x700   : > { %v8646_v32 = vpop.xlane.xlu1 %2373  ;;  %v2435_v31 = vmul.f32 %v8498_v14, %v2418_v27  ;;  %v5745_v62 = vpack.c.bf16 %v2643_v11, %v2643_v11  ;;  %6315 = vrsqrt.f32 %v3589_v61  ;;  %v9583_v61 = vld [vmem:[#allocation27_spill] sm:$0xff] }
 0x701   : > { %2712 = vrot.lane.b32.xlu1 %v5727_v49, %s6519_s2  ;;  %v8639_v24 = vpop.xlane.xlu0 %3760  ;;  %v6310_v35 = vpop.eup %6309  ;;  %v9581_v49 = vld [vmem:[#allocation76_spill] sm:$0xff]  ;;  %6317 = vrsqrt.f32 %v3593_v25  ;;  %v2390_v33 = vmax.f32 %v8646_v32, 1e-24 }
 0x702   : > { %v2612_v17 = vmul.f32 8.0, %v6310_v35  ;;  %v2451_v13 = vmul.f32 %v2435_v31, %v9580_v43  ;;  %v3783_v43 = vmax.f32 %v8616_v18, 1e-24  ;;  %v3787_v18 = vmax.f32 %v8629_v47, 1e-24 }
 0x703   : > { %v3791_v32 = vmax.f32 %v8639_v24, 1e-24 }
 0x704   : > { %v2629_v3 = vmul.f32 %v8501_v23, %v2612_v17  ;;  %v8655_v30 = vpop.xlane.xlu1 %2567  ;;  %v5731_v58 = vpack.c.bf16 %v2451_v13, %v2451_v13 }
 0x705   : > { %2825 = vrot.lane.b32.xlu1 %v5743_v21, %s6519_s2  ;;  %v8644_v40 = vpop.xlane.xlu0 %3766  ;;  %v6312_v44 = vpop.eup %6311  ;;  %v3595_v21 = vmax.f32 %v8512_v50, 1e-24 }
 0x706   : > { %v2420_v10 = vmul.f32 8.0, %v6312_v44  ;;  %v2645_v59 = vmul.f32 %v2629_v3, %v9581_v49 }
 0x707   : > { %6319 = vrsqrt.f32 %v3595_v21  ;;  %v9585_v21 = vld [vmem:[#allocation35_spill] sm:$0xff] }
 0x708   : > { %v2437_v63 = vmul.f32 %v8498_v14, %v2420_v10  ;;  %v3716_v34 = vpop.permute.xlu1 %3715  ;;  %v5747_v37 = vpack.c.bf16 %v2645_v59, %v2645_v59  ;;  %6321 = vrsqrt.f32 %v3597_v38  ;;  %v9582_v10 = vld [vmem:[#allocation49_spill] sm:$0xff]  ;;  %v9584_v59 = vld [vmem:[#allocation31_spill] sm:$0xff] }
 0x709   : > { %2716 = vrot.lane.b32.xlu1 %v5729_v6, %s6519_s2  ;;  %v2699_v15 = vpop.permute.xlu0 %2698  ;;  %v6314_v12 = vpop.eup %6313  ;;  %v3777_v20 = vsel %vm1745_vm0, %v3716_v34, 0.0  ;;  %v9586_v38 = vld [vmem:[#allocation39_spill] sm:$0xff] }
 0x70a   : > { %5417 = vst.msk [vmem:[%s7481_s14 + $0x40] sm:$0xf] %vm2085_vm1, %v2699_v15  ;;  %v2614_v16 = vmul.f32 8.0, %v6314_v12  ;;  %v2453_v27 = vmul.f32 %v2437_v63, %v9501_v4  ;;  %v6316_v31 = vpop.eup %6315  ;;  %v3599_v4 = vmax.f32 %v8593_v29, 1e-24 }
 0x70b   : > { %v3621_v50 = vmul.f32 8.0, %v6316_v31  ;;  %v6318_v6 = vpop.eup %6317 }
 0x70c   : > { %v2631_v5 = vmul.f32 %v8501_v23, %v2614_v16  ;;  %v5733_v55 = vpack.c.bf16 %v2453_v27, %v2453_v27  ;;  %6323 = vrsqrt.f32 %v3599_v4 }
 0x70d   : > { %2829 = vrot.lane.b32.xlu1 %v5745_v62, %s6519_s2  ;;  %v2812_v41 = vpop.permute.xlu0 %2811  ;;  %v3638_v11 = vmul.f32 %v3621_v50, %v8498_v14  ;;  %6325 = vrsqrt.f32 %v3601_v54 }
 0x70e   : > { %5449 = vst.msk [vmem:[%s7490_s9 + $0x40] sm:$0xf] %vm2085_vm1, %v2812_v41  ;;  %v2647_v35 = vmul.f32 %v2631_v5, %v8083_v8  ;;  %v3625_v8 = vmul.f32 8.0, %v6318_v6  ;;  %6327 = vrsqrt.f32 %v3603_v28  ;;  %v2584_v6 = vmax.f32 %v8655_v30, 1e-24 }
 0x70f   : > { %v3654_v62 = vmul.f32 %v3638_v11, %v9582_v10  ;;  %6329 = vrsqrt.f32 %v3783_v43  ;;  %v3793_v30 = vmax.f32 %v8644_v40, 1e-24 }
 0x710   : > { %v5749_v17 = vpack.c.bf16 %v2647_v35, %v2647_v35  ;;  %v3642_v15 = vmul.f32 %v3625_v8, %v8498_v14  ;;  %6331 = vrsqrt.f32 %v3785_v57  ;;  %v3789_v35 = vmax.f32 %v8634_v53, 1e-24 }
 0x711   : > { %2720 = vrot.lane.b32.xlu1 %v5731_v58, %s6519_s2  ;;  %v6320_v44 = vpop.eup %6319  ;;  %v5800_v52 = vpack.c.bf16 %v3654_v62, %v3654_v62  ;;  %6333 = vrsqrt.f32 %v3787_v18 }
 0x712   : > { %v3627_v3 = vmul.f32 8.0, %v6320_v44  ;;  %v6322_v29 = vpop.eup %6321  ;;  %v3658_v41 = vmul.f32 %v3642_v15, %v9583_v61  ;;  %6335 = vrsqrt.f32 %v2390_v33  ;;  %v3590_v15 = vmax.f32 %v8518_v46, 1e-24 }
 0x713   : > { %v3629_v12 = vmul.f32 8.0, %v6322_v29  ;;  %6337 = vrsqrt.f32 %v3789_v35  ;;  %v3780_v46 = vsel %vm1745_vm0, %v8570_v45, 0.0 }
 0x714   : > { %v3644_v13 = vmul.f32 %v3627_v3, %v8498_v14  ;;  %v5804_v49 = vpack.c.bf16 %v3658_v41, %v3658_v41  ;;  %6339 = vrsqrt.f32 %v2584_v6 }
 0x715   : > { %2833 = vrot.lane.b32.xlu1 %v5747_v37, %s6519_s2  ;;  %v3646_v16 = vmul.f32 %v3629_v12, %v8498_v14  ;;  %6341 = vrsqrt.f32 %v3791_v32 }
 0x716   : > { %3778 = vadd.xlane.f32.xlu0 %v3777_v20  ;;  %v6324_v63 = vpop.eup %6323  ;;  %v3660_v25 = vmul.f32 %v3644_v13, %v9584_v59  ;;  %v3591_v13 = vmax.f32 %v8466_v60, 1e-24  ;;  %6343 = vrsqrt.f32 %v3590_v15 }
 0x717   : > { %v3631_v58 = vmul.f32 8.0, %v6324_v63  ;;  %v6326_v34 = vpop.eup %6325  ;;  %v3662_v20 = vmul.f32 %v3646_v16, %v9585_v21  ;;  %6345 = vrsqrt.f32 %v3793_v30 }
 0x718   : > { %v3633_v37 = vmul.f32 8.0, %v6326_v34  ;;  %v5806_v27 = vpack.c.bf16 %v3660_v25, %v3660_v25  ;;  %6347 = vrsqrt.f32 %v3591_v13  ;;  %v9588_v25 = vld [vmem:[#allocation66_spill] sm:$0xff] }
 0x719   : > { %2724 = vrot.lane.b32.xlu1 %v5733_v55, %s6519_s2  ;;  %v3648_v5 = vmul.f32 %v3631_v58, %v8498_v14  ;;  %v6328_v55 = vpop.eup %6327  ;;  %v5808_v47 = vpack.c.bf16 %v3662_v20, %v3662_v20  ;;  %v3592_v58 = vmax.f32 %v8492_v19, 1e-24  ;;  %v3594_v19 = vmax.f32 %v8575_v1, 1e-24 }
 0x71a   : > { %v3635_v4 = vmul.f32 8.0, %v6328_v55  ;;  %v6330_v50 = vpop.eup %6329 }
 0x71b   : > { %v3664_v31 = vmul.f32 %v3648_v5, %v9586_v38  ;;  %v3815_v8 = vmul.f32 8.0, %v6330_v50  ;;  %v6332_v28 = vpop.eup %6331  ;;  %v9589_v38 = vld [vmem:[#allocation102_spill] sm:$0xff] }
 0x71c   : > { %v3652_v53 = vmul.f32 %v3635_v4, %v8498_v14  ;;  %v6334_v43 = vpop.eup %6333 }
 0x71d   : > { %2837 = vrot.lane.b32.xlu1 %v5749_v17, %s6519_s2  ;;  %v3650_v17 = vmul.f32 %v3633_v37, %v8498_v14  ;;  %v5810_v44 = vpack.c.bf16 %v3664_v31, %v3664_v31  ;;  %v3832_v10 = vmul.f32 %v3815_v8, %v8501_v23  ;;  %v6336_v40 = vpop.eup %6335  ;;  %v3819_v63 = vmul.f32 8.0, %v6334_v43 }
 0x71e   : > { %v3668_v24 = vmul.f32 %v3652_v53, %v9513_v7  ;;  %v9587_v7 = vld [vmem:[#allocation18_spill] sm:$0xff]  ;;  %v6338_v16 = vpop.eup %6337  ;;  %v2422_v45 = vmul.f32 8.0, %v6336_v40 }
 0x71f   : > { %v3666_v11 = vmul.f32 %v3650_v17, %v9499_v56  ;;  %v3817_v56 = vmul.f32 8.0, %v6332_v28  ;;  %v3848_v61 = vmul.f32 %v3832_v10, %v9587_v7  ;;  %v3836_v18 = vmul.f32 %v3819_v63, %v8501_v23  ;;  %v9590_v28 = vld [vmem:[#allocation109_spill] sm:$0xff] }
 0x720   : > { %v5814_v60 = vpack.c.bf16 %v3668_v24, %v3668_v24  ;;  %v3821_v5 = vmul.f32 8.0, %v6338_v16  ;;  %v2439_v20 = vmul.f32 %v8498_v14, %v2422_v45 }
 0x721   : > { %v5812_v29 = vpack.c.bf16 %v3666_v11, %v3666_v11  ;;  %v3834_v41 = vmul.f32 %v3817_v56, %v8501_v23  ;;  %v3852_v31 = vmul.f32 %v3836_v18, %v9589_v38 }
 0x722   : > { %v3838_v17 = vmul.f32 %v3821_v5, %v8501_v23  ;;  %v2455_v53 = vmul.f32 %v2439_v20, %v9514_v39 }
 0x723   : > { %v3850_v34 = vmul.f32 %v3834_v41, %v9588_v25 }
 0x724   : > { %v3854_v15 = vmul.f32 %v3838_v17, %v9590_v28  ;;  %v5735_v43 = vpack.c.bf16 %v2455_v53, %v2455_v53 }
 0x725   : > { %v5818_v50 = vpack.c.bf16 %v3850_v34, %v3850_v34  ;;  %v9593_v34 = vld [vmem:[#allocation75_spill] sm:$0xff] }
 0x726   : > { %v5822_v63 = vpack.c.bf16 %v3854_v15, %v3854_v15 }
 0x72c   : > { %3912 = vrot.lane.b32.xlu0 %v5800_v52, %s6519_s2 }
 0x730   : > { %3920 = vrot.lane.b32.xlu0 %v5804_v49, %s6519_s2  ;;  %v6340_v49 = vpop.eup %6339 }
 0x731   : > { %v6342_v21 = vpop.eup %6341  ;;  %v2616_v55 = vmul.f32 8.0, %v6340_v49 }
 0x732   : > { %v6344_v33 = vpop.eup %6343  ;;  %v3823_v4 = vmul.f32 8.0, %v6342_v21 }
 0x733   : > { %v6346_v6 = vpop.eup %6345  ;;  %v3622_v32 = vmul.f32 8.0, %v6344_v33  ;;  %v2633_v11 = vmul.f32 %v8501_v23, %v2616_v55  ;;  %v9594_v55 = vld [vmem:[#allocation23_spill] sm:$0xff] }
 0x734   : > { %3924 = vrot.lane.b32.xlu0 %v5806_v27, %s6519_s2  ;;  %v5816_v27 = vpack.c.bf16 %v3848_v61, %v3848_v61  ;;  %v6348_v8 = vpop.eup %6347  ;;  %v3840_v30 = vmul.f32 %v3823_v4, %v8501_v23  ;;  %v3825_v24 = vmul.f32 8.0, %v6346_v6 }
 0x735   : > { %v3639_v39 = vmul.f32 %v3622_v32, %v8498_v14  ;;  %v2649_v13 = vmul.f32 %v2633_v11, %v8181_v42  ;;  %v9595_v32 = vld [vmem:[#allocation25_spill] sm:$0xff] }
 0x736   : > { %v3842_v61 = vmul.f32 %v3825_v24, %v8501_v23 }
 0x737   : > { %v5751_v16 = vpack.c.bf16 %v2649_v13, %v2649_v13 }
 0x738   : > { %3928 = vrot.lane.b32.xlu0 %v5808_v47, %s6519_s2  ;;  %v3858_v18 = vmul.f32 %v3842_v61, %v9593_v34 }
 0x739   : > { %v8699_v54 = vpop.xlane.xlu1 %3563 }
 0x73a   : > { %v3596_v1 = vmax.f32 %v8699_v54, 1e-24  ;;  %v5820_v54 = vpack.c.bf16 %v3852_v31, %v3852_v31 }
 0x73c   : > { %3932 = vrot.lane.b32.xlu0 %v5810_v44, %s6519_s2 }
 0x73d   : > { %v8706_v3 = vpop.xlane.xlu1 %3575 }
 0x73e   : > { %v3773_v62 = vpop.xlane.xlu0 %3772 }
 0x73f   : > { %v3795_v12 = vmax.f32 %v3773_v62, 1e-24  ;;  %v3598_v62 = vmax.f32 %v8585_v36, 1e-24 }
 0x740   : > { %3936 = vrot.lane.b32.xlu0 %v5812_v29, %s6519_s2  ;;  %v3623_v29 = vmul.f32 8.0, %v6348_v8 }
 0x741   : > { %v8714_v52 = vpop.xlane.xlu1 %3581  ;;  %3781 = vadd.xlane.f32.xlu1 %v3780_v46  ;;  %6349 = vrsqrt.f32 %v3795_v12  ;;  %v9591_v12 = vld [vmem:[#allocation116_spill] sm:$0xff] }
 0x742   : > { %v2816_v57 = vpop.permute.xlu0 %2815  ;;  %6351 = vrsqrt.f32 %v3592_v58  ;;  %v3856_v7 = vmul.f32 %v3840_v30, %v9591_v12  ;;  %v3640_v42 = vmul.f32 %v3623_v29, %v8498_v14  ;;  %v9592_v58 = vld [vmem:[#allocation51_spill] sm:$0xff] }
 0x743   : > { %5451 = vst.msk [vmem:[%s7490_s9 + $0x48] sm:$0xf] %vm2085_vm1, %v2816_v57  ;;  %6353 = vrsqrt.f32 %v3594_v19  ;;  %v3600_v57 = vmax.f32 %v8706_v3, 1e-24  ;;  %v3655_v45 = vmul.f32 %v3639_v39, %v9592_v58 }
 0x744   : > { %3940 = vrot.lane.b32.xlu0 %v5814_v60, %s6519_s2  ;;  %6355 = vrsqrt.f32 %v3596_v1  ;;  %v3656_v33 = vmul.f32 %v3640_v42, %v9594_v55  ;;  %v9598_v42 = vld [vmem:[#allocation37_spill] sm:$0xff] }
 0x745   : > { %v8722_v59 = vpop.xlane.xlu1 %3587  ;;  %6357 = vrsqrt.f32 %v3598_v62  ;;  %v5801_v20 = vpack.c.bf16 %v3655_v45, %v3655_v45 }
 0x746   : > { %v2707_v37 = vpop.permute.xlu0 %2706  ;;  %6359 = vrsqrt.f32 %v3600_v57  ;;  %v5802_v1 = vpack.c.bf16 %v3656_v33, %v3656_v33 }
 0x747   : > { %5421 = vst.msk [vmem:[%s7481_s14 + $0x50] sm:$0xf] %vm2085_vm1, %v2707_v37  ;;  %v5824_v37 = vpack.c.bf16 %v3856_v7, %v3856_v7 }
 0x748   : > { %4025 = vrot.lane.b32.xlu0 %v5816_v27, %s6519_s2  ;;  %v3602_v27 = vmax.f32 %v8714_v52, 1e-24  ;;  %v3604_v52 = vmax.f32 %v8722_v59, 1e-24 }
 0x749   : > { %v8731_v35 = vpop.xlane.xlu1 %3739 }
 0x74a   : > { %v2820_v47 = vpop.permute.xlu0 %2819  ;;  %6361 = vrsqrt.f32 %v3602_v27  ;;  %v3784_v59 = vmax.f32 %v8731_v35, 1e-24 }
 0x74b   : > { %5453 = vst.msk [vmem:[%s7490_s9 + $0x50] sm:$0xf] %vm2085_vm1, %v2820_v47  ;;  %v6350_v56 = vpop.eup %6349  ;;  %v5826_v47 = vpack.c.bf16 %v3858_v18, %v3858_v18  ;;  %6363 = vrsqrt.f32 %v3604_v52 }
 0x74c   : > { %4029 = vrot.lane.b32.xlu0 %v5818_v50, %s6519_s2  ;;  %v6352_v46 = vpop.eup %6351  ;;  %v3827_v36 = vmul.f32 8.0, %v6350_v56  ;;  %6365 = vrsqrt.f32 %v3784_v59 }
 0x74d   : > { %v8741_v44 = vpop.xlane.xlu1 %3745  ;;  %v3624_v60 = vmul.f32 8.0, %v6352_v46  ;;  %v6354_v49 = vpop.eup %6353  ;;  %v9597_v46 = vld [vmem:[#allocation33_spill] sm:$0xff] }
 0x74e   : > { %v2711_v10 = vpop.permute.xlu0 %2710  ;;  %v3844_v5 = vmul.f32 %v3827_v36, %v8501_v23  ;;  %v3626_v19 = vmul.f32 8.0, %v6354_v49  ;;  %v6356_v38 = vpop.eup %6355  ;;  %v3786_v35 = vmax.f32 %v8741_v44, 1e-24 }
 0x74f   : > { %5423 = vst.msk [vmem:[%s7481_s14 + $0x58] sm:$0xf] %vm2085_vm1, %v2711_v10  ;;  %v3641_v21 = vmul.f32 %v3624_v60, %v8498_v14  ;;  %v3628_v6 = vmul.f32 8.0, %v6356_v38  ;;  %v6358_v53 = vpop.eup %6357  ;;  %v9596_v10 = vld [vmem:[#allocation29_spill] sm:$0xff] }
 0x750   : > { %4033 = vrot.lane.b32.xlu0 %v5820_v54, %s6519_s2  ;;  %v3860_v17 = vmul.f32 %v3844_v5, %v8101_v51  ;;  %v3643_v50 = vmul.f32 %v3626_v19, %v8498_v14  ;;  %v3630_v15 = vmul.f32 8.0, %v6358_v53  ;;  %v6360_v56 = vpop.eup %6359  ;;  %6367 = vrsqrt.f32 %v3786_v35 }
 0x751   : > { %v8751_v40 = vpop.xlane.xlu1 %3751  ;;  %v3657_v11 = vmul.f32 %v3641_v21, %v9595_v32  ;;  %v3645_v30 = vmul.f32 %v3628_v6, %v8498_v14 }
 0x752   : > { %2728 = vrot.lane.b32.xlu1 %v5735_v43, %s6519_s2  ;;  %v2824_v41 = vpop.permute.xlu0 %2823  ;;  %v5828_v28 = vpack.c.bf16 %v3860_v17, %v3860_v17  ;;  %v3659_v54 = vmul.f32 %v3643_v50, %v9596_v10  ;;  %v3647_v39 = vmul.f32 %v3630_v15, %v8498_v14  ;;  %v3632_v43 = vmul.f32 8.0, %v6360_v56 }
 0x753   : > { %5455 = vst.msk [vmem:[%s7490_s9 + $0x58] sm:$0xf] %vm2085_vm1, %v2824_v41  ;;  %v5803_v24 = vpack.c.bf16 %v3657_v11, %v3657_v11  ;;  %v3661_v12 = vmul.f32 %v3645_v30, %v9597_v46  ;;  %v3788_v44 = vmax.f32 %v8751_v40, 1e-24  ;;  %v9599_v11 = vld [vmem:[#allocation62_spill] sm:$0xff] }
 0x754   : > { %4037 = vrot.lane.b32.xlu0 %v5822_v63, %s6519_s2  ;;  %v5805_v13 = vpack.c.bf16 %v3659_v54, %v3659_v54  ;;  %v6362_v7 = vpop.eup %6361  ;;  %v3649_v41 = vmul.f32 %v3632_v43, %v8498_v14  ;;  %v3663_v60 = vmul.f32 %v3647_v39, %v9598_v42  ;;  %v9601_v54 = vld [vmem:[#allocation105_spill] sm:$0xff] }
 0x755   : > { %v8762_v25 = vpop.xlane.xlu1 %3757  ;;  %v3634_v63 = vmul.f32 8.0, %v6362_v7  ;;  %v5807_v57 = vpack.c.bf16 %v3661_v12, %v3661_v12  ;;  %6369 = vrsqrt.f32 %v3788_v44 }
 0x756   : > { %2841 = vrot.lane.b32.xlu1 %v5751_v16, %s6519_s2  ;;  %v2715_v3 = vpop.permute.xlu0 %2714  ;;  %v6364_v16 = vpop.eup %6363  ;;  %v3790_v40 = vmax.f32 %v8762_v25, 1e-24  ;;  %v5809_v18 = vpack.c.bf16 %v3663_v60, %v3663_v60  ;;  %v3665_v5 = vmul.f32 %v3649_v41, %v9497_v0  ;;  %v9603_v41 = vld [vmem:[#allocation118_spill] sm:$0xff] }
 0x757   : > { %5425 = vst.msk [vmem:[%s7481_s14 + $0x60] sm:$0xf] %vm2085_vm1, %v2715_v3  ;;  %v3651_v49 = vmul.f32 %v3634_v63, %v8498_v14  ;;  %v3636_v34 = vmul.f32 8.0, %v6364_v16  ;;  %v6366_v3 = vpop.eup %6365 }
 0x758   : > { %4041 = vrot.lane.b32.xlu0 %v5824_v37, %s6519_s2  ;;  %6371 = vrsqrt.f32 %v3790_v40  ;;  %v3816_v19 = vmul.f32 8.0, %v6366_v3 }
 0x759   : > { %v8773_v31 = vpop.xlane.xlu1 %3763  ;;  %v3653_v21 = vmul.f32 %v3636_v34, %v8498_v14  ;;  %v3667_v0 = vmul.f32 %v3651_v49, %v9509_v26 }
 0x75a   : > { %3914 = vrot.lane.b32.xlu1 %v5801_v20, %s6519_s2  ;;  %v2828_v4 = vpop.permute.xlu0 %2827  ;;  %v3792_v25 = vmax.f32 %v8773_v31, 1e-24  ;;  %v5811_v20 = vpack.c.bf16 %v3665_v5, %v3665_v5  ;;  %v6368_v55 = vpop.eup %6367  ;;  %v3833_v31 = vmul.f32 %v3816_v19, %v8501_v23 }
 0x75b   : > { %5457 = vst.msk [vmem:[%s7490_s9 + $0x60] sm:$0xf] %vm2085_vm1, %v2828_v4  ;;  %v3818_v14 = vmul.f32 8.0, %v6368_v55  ;;  %v5813_v4 = vpack.c.bf16 %v3667_v0, %v3667_v0 }
 0x75c   : > { %4045 = vrot.lane.b32.xlu0 %v5826_v47, %s6519_s2  ;;  %6373 = vrsqrt.f32 %v3792_v25  ;;  %v3669_v47 = vmul.f32 %v3653_v21, %v9520_v22  ;;  %v3849_v53 = vmul.f32 %v3833_v31, %v9599_v11  ;;  %v9600_v22 = vld [vmem:[#allocation74_spill] sm:$0xff]  ;;  %v9608_v11 = vld [vmem:[#allocation87_spill] sm:$0xff] }
 0x75d   : > { %v8783_v51 = vpop.xlane.xlu1 %3769  ;;  %v3835_v6 = vmul.f32 %v3818_v14, %v8501_v23 }
 0x75e   : > { %3916 = vrot.lane.b32.xlu1 %v5802_v1, %s6519_s2  ;;  %v2719_v8 = vpop.permute.xlu0 %2718  ;;  %v3794_v17 = vmax.f32 %v8783_v51, 1e-24  ;;  %v5815_v32 = vpack.c.bf16 %v3669_v47, %v3669_v47  ;;  %v5817_v30 = vpack.c.bf16 %v3849_v53, %v3849_v53 }
 0x75f   : > { %5427 = vst.msk [vmem:[%s7481_s14 + $0x68] sm:$0xf] %vm2085_vm1, %v2719_v8  ;;  %v6370_v26 = vpop.eup %6369 }
 0x760   : > { %4049 = vrot.lane.b32.xlu0 %v5828_v28, %s6519_s2  ;;  %6375 = vrsqrt.f32 %v3794_v17  ;;  %v3820_v1 = vmul.f32 8.0, %v6370_v26  ;;  %v3851_v28 = vmul.f32 %v3835_v6, %v9600_v22  ;;  %v9606_v6 = vld [vmem:[#allocation57_spill] sm:$0xff] }
 0x761   : > { %v8792_v62 = vpop.xlane.xlu1 %3775 }
 0x762   : > { %3918 = vrot.lane.b32.xlu1 %v5803_v24, %s6519_s2  ;;  %v2832_v29 = vpop.permute.xlu0 %2831  ;;  %v3796_v50 = vmax.f32 %v8792_v62, 1e-24  ;;  %v6372_v51 = vpop.eup %6371  ;;  %v3837_v59 = vmul.f32 %v3820_v1, %v8501_v23  ;;  %v5819_v35 = vpack.c.bf16 %v3851_v28, %v3851_v28  ;;  %v9607_v1 = vld [vmem:[#allocation61_spill] sm:$0xff] }
 0x763   : > { %5459 = vst.msk [vmem:[%s7490_s9 + $0x68] sm:$0xf] %vm2085_vm1, %v2832_v29  ;;  %v3822_v15 = vmul.f32 8.0, %v6372_v51  ;;  %v9609_v51 = vld [vmem:[#allocation91_spill] sm:$0xff] }
 0x764   : > { %6377 = vrsqrt.f32 %v3796_v50  ;;  %v3853_v56 = vmul.f32 %v3837_v59, %v9601_v54  ;;  %v9610_v59 = vld [vmem:[#allocation93_spill] sm:$0xff] }
 0x765   : > { %v2701_v61 = vpop.permute.xlu1 %2700  ;;  %v3839_v62 = vmul.f32 %v3822_v15, %v8501_v23 }
 0x766   : > { %5418 = vst.msk [vmem:[%s7481_s14 + $0x44] sm:$0xf] %vm2085_vm1, %v2701_v61  ;;  %3922 = vrot.lane.b32.xlu1 %v5805_v13, %s6519_s2  ;;  %v2723_v36 = vpop.permute.xlu0 %2722  ;;  %v6374_v24 = vpop.eup %6373  ;;  %v9602_v13 = vld [vmem:[#allocation112_spill] sm:$0xff]  ;;  %v5821_v61 = vpack.c.bf16 %v3853_v56, %v3853_v56  ;;  %v9612_v56 = vld [vmem:[#allocation98_spill] sm:$0xff] }
 0x767   : > { %5429 = vst.msk [vmem:[%s7481_s14 + $0x70] sm:$0xf] %vm2085_vm1, %v2723_v36  ;;  %v3824_v29 = vmul.f32 8.0, %v6374_v24  ;;  %v3855_v46 = vmul.f32 %v3839_v62, %v9602_v13  ;;  %v9611_v24 = vld [vmem:[#allocation95_spill] sm:$0xff] }
 0x769   : > { %v2814_v58 = vpop.permute.xlu1 %2813  ;;  %v3841_v12 = vmul.f32 %v3824_v29, %v8501_v23  ;;  %v5823_v60 = vpack.c.bf16 %v3855_v46, %v3855_v46 }
 0x76a   : > { %5450 = vst.msk [vmem:[%s7490_s9 + $0x44] sm:$0xf] %vm2085_vm1, %v2814_v58  ;;  %3926 = vrot.lane.b32.xlu1 %v5807_v57, %s6519_s2  ;;  %v2836_v45 = vpop.permute.xlu0 %2835  ;;  %v6376_v39 = vpop.eup %6375  ;;  %v9604_v58 = vld [vmem:[#allocation77_spill] sm:$0xff] }
 0x76b   : > { %5461 = vst.msk [vmem:[%s7490_s9 + $0x70] sm:$0xf] %vm2085_vm1, %v2836_v45  ;;  %v3826_v7 = vmul.f32 8.0, %v6376_v39  ;;  %v3857_v63 = vmul.f32 %v3841_v12, %v9603_v41  ;;  %v9615_v41 = vld [vmem:[#allocation64_spill] sm:$0xff] }
 0x76d   : > { %v2703_v37 = vpop.permute.xlu1 %2702  ;;  %v3843_v57 = vmul.f32 %v3826_v7, %v8501_v23  ;;  %v5825_v49 = vpack.c.bf16 %v3857_v63, %v3857_v63 }
 0x76e   : > { %5419 = vst.msk [vmem:[%s7481_s14 + $0x48] sm:$0xf] %vm2085_vm1, %v2703_v37  ;;  %3930 = vrot.lane.b32.xlu1 %v5809_v18, %s6519_s2  ;;  %v2727_v27 = vpop.permute.xlu0 %2726  ;;  %v6378_v36 = vpop.eup %6377 }
 0x76f   : > { %5431 = vst.msk [vmem:[%s7481_s14 + $0x78] sm:$0xf] %vm2085_vm1, %v2727_v27  ;;  %v3828_v42 = vmul.f32 8.0, %v6378_v36  ;;  %v3859_v45 = vmul.f32 %v3843_v57, %v9604_v58  ;;  %v9613_v36 = vld [vmem:[#allocation55_spill] sm:$0xff]  ;;  %v9616_v57 = vld [vmem:[#allocation89_spill] sm:$0xff]  ;;  %v9618_v58 = vld [vmem:[#allocation94_spill] sm:$0xff] }
 0x771   : > { %v2705_v33 = vpop.permute.xlu1 %2704  ;;  %v3845_v40 = vmul.f32 %v3828_v42, %v8501_v23  ;;  %v5827_v5 = vpack.c.bf16 %v3859_v45, %v3859_v45 }
 0x772   : > { %5420 = vst.msk [vmem:[%s7481_s14 + $0x4c] sm:$0xf] %vm2085_vm1, %v2705_v33  ;;  %3934 = vrot.lane.b32.xlu1 %v5811_v20, %s6519_s2  ;;  %v2840_v38 = vpop.permute.xlu0 %2839 }
 0x773   : > { %5463 = vst.msk [vmem:[%s7490_s9 + $0x78] sm:$0xf] %vm2085_vm1, %v2840_v38  ;;  %v3861_v18 = vmul.f32 %v3845_v40, %v8161_v48  ;;  %v9619_v40 = vld [vmem:[#allocation97_spill] sm:$0xff] }
 0x775   : > { %v2818_v52 = vpop.permute.xlu1 %2817  ;;  %v5829_v37 = vpack.c.bf16 %v3861_v18, %v3861_v18 }
 0x776   : > { %5452 = vst.msk [vmem:[%s7490_s9 + $0x4c] sm:$0xf] %vm2085_vm1, %v2818_v52  ;;  %3938 = vrot.lane.b32.xlu1 %v5813_v4, %s6519_s2  ;;  %v9605_v52 = vld [vmem:[#allocation53_spill] sm:$0xff] }
 0x779   : > { %v2709_v8 = vpop.permute.xlu1 %2708 }
 0x77a   : > { %5422 = vst.msk [vmem:[%s7481_s14 + $0x54] sm:$0xf] %vm2085_vm1, %v2709_v8  ;;  %3942 = vrot.lane.b32.xlu1 %v5815_v32, %s6519_s2 }
 0x77d   : > { %v2822_v10 = vpop.permute.xlu1 %2821 }
 0x77e   : > { %5454 = vst.msk [vmem:[%s7490_s9 + $0x54] sm:$0xf] %vm2085_vm1, %v2822_v10  ;;  %4027 = vrot.lane.b32.xlu1 %v5817_v30, %s6519_s2 }
 0x781   : > { %v2713_v43 = vpop.permute.xlu1 %2712 }
 0x782   : > { %5424 = vst.msk [vmem:[%s7481_s14 + $0x5c] sm:$0xf] %vm2085_vm1, %v2713_v43  ;;  %4031 = vrot.lane.b32.xlu1 %v5819_v35, %s6519_s2 }
 0x785   : > { %v2826_v44 = vpop.permute.xlu1 %2825 }
 0x786   : > { %5456 = vst.msk [vmem:[%s7490_s9 + $0x5c] sm:$0xf] %vm2085_vm1, %v2826_v44  ;;  %4035 = vrot.lane.b32.xlu1 %v5821_v61, %s6519_s2 }
 0x789   : > { %v2717_v16 = vpop.permute.xlu1 %2716 }
 0x78a   : > { %5426 = vst.msk [vmem:[%s7481_s14 + $0x64] sm:$0xf] %vm2085_vm1, %v2717_v16  ;;  %4039 = vrot.lane.b32.xlu1 %v5823_v60, %s6519_s2  ;;  %v9617_v60 = vld [vmem:[#allocation92_spill] sm:$0xff] }
 0x78d   : > { %v2830_v34 = vpop.permute.xlu1 %2829 }
 0x78e   : > { %5458 = vst.msk [vmem:[%s7490_s9 + $0x64] sm:$0xf] %vm2085_vm1, %v2830_v34  ;;  %4043 = vrot.lane.b32.xlu1 %v5825_v49, %s6519_s2  ;;  %v9620_v34 = vld [vmem:[#allocation100_spill] sm:$0xff] }
 0x791   : > { %v2721_v3 = vpop.permute.xlu1 %2720 }
 0x792   : > { %5428 = vst.msk [vmem:[%s7481_s14 + $0x6c] sm:$0xf] %vm2085_vm1, %v2721_v3  ;;  %4047 = vrot.lane.b32.xlu1 %v5827_v5, %s6519_s2 }
 0x795   : > { %v2834_v27 = vpop.permute.xlu1 %2833 }
 0x796   : > { %5460 = vst.msk [vmem:[%s7490_s9 + $0x6c] sm:$0xf] %vm2085_vm1, %v2834_v27  ;;  %4051 = vrot.lane.b32.xlu1 %v5829_v37, %s6519_s2 }
 0x799   : > { %v2725_v25 = vpop.permute.xlu1 %2724 }
 0x79a   : > { %5430 = vst.msk [vmem:[%s7481_s14 + $0x74] sm:$0xf] %vm2085_vm1, %v2725_v25 }
 0x79d   : > { %v2838_v48 = vpop.permute.xlu1 %2837 }
 0x79e   : > { %5462 = vst.msk [vmem:[%s7490_s9 + $0x74] sm:$0xf] %vm2085_vm1, %v2838_v48 }
 0x7a3   : > { %v3779_v21 = vpop.xlane.xlu0 %3778 }
 0x7a4   : > { %v3797_v19 = vmax.f32 %v3779_v21, 1e-24 }
 0x7a6   : > { %6379 = vrsqrt.f32 %v3797_v19 }
 0x7a7   : > { %v3913_v20 = vpop.permute.xlu0 %3912 }
 0x7a8   : > { %5593 = vst.msk [vmem:[%s7481_s14 + $0xc0] sm:$0xf] %vm2085_vm1, %v3913_v20 }
 0x7ab   : > { %v3921_v0 = vpop.permute.xlu0 %3920 }
 0x7ac   : > { %5597 = vst.msk [vmem:[%s7481_s14 + $0xd0] sm:$0xf] %vm2085_vm1, %v3921_v0 }
 0x7af   : > { %v3925_v55 = vpop.permute.xlu0 %3924 }
 0x7b0   : > { %v6380_v33 = vpop.eup %6379  ;;  %5599 = vst.msk [vmem:[%s7481_s14 + $0xd8] sm:$0xf] %vm2085_vm1, %v3925_v55 }
 0x7b1   : > { %v3829_v38 = vmul.f32 8.0, %v6380_v33 }
 0x7b3   : > { %v3846_v17 = vmul.f32 %v3829_v38, %v8501_v23  ;;  %v3929_v31 = vpop.permute.xlu0 %3928 }
 0x7b4   : > { %5601 = vst.msk [vmem:[%s7481_s14 + $0xe0] sm:$0xf] %vm2085_vm1, %v3929_v31 }
 0x7b5   : > { %v3862_v14 = vmul.f32 %v3846_v17, %v8199_v2 }
 0x7b7   : > { %v3933_v4 = vpop.permute.xlu0 %3932  ;;  %v5830_v47 = vpack.c.bf16 %v3862_v14, %v3862_v14 }
 0x7b8   : > { %5603 = vst.msk [vmem:[%s7481_s14 + $0xe8] sm:$0xf] %vm2085_vm1, %v3933_v4 }
 0x7b9   : > { %4053 = vrot.lane.b32.xlu0 %v5830_v47, %s6519_s2 }
 0x7bb   : > { %v3937_v26 = vpop.permute.xlu0 %3936 }
 0x7bc   : > { %5605 = vst.msk [vmem:[%s7481_s14 + $0xf0] sm:$0xf] %vm2085_vm1, %v3937_v26 }
 0x7bd   : > { %4090 = vrot.lane.b32.xlu0 %v9605_v52, %s6519_s2 }
 0x7bf   : > { %v3941_v50 = vpop.permute.xlu0 %3940 }
 0x7c0   : > { %5607 = vst.msk [vmem:[%s7481_s14 + $0xf8] sm:$0xf] %vm2085_vm1, %v3941_v50 }
 0x7c1   : > { %4094 = vrot.lane.b32.xlu0 %v9606_v6, %s6519_s2 }
 0x7c3   : > { %v4026_v2 = vpop.permute.xlu0 %4025 }
 0x7c4   : > { %5625 = vst.msk [vmem:[%s7490_s9 + $0xc0] sm:$0xf] %vm2085_vm1, %v4026_v2  ;;  %v4190_v2 = vld [vmem:[%s7481_s14] sm:$0xff] (%p6685_p10)  }
 0x7c5   : > { %4098 = vrot.lane.b32.xlu0 %v9607_v1, %s6519_s2  ;;  %v4194_v1 = vld [vmem:[%s7481_s14 + $0x8] sm:$0xff] (%p6685_p10)   ;;  %4191 = vst [vmem:[%s9031_s18] sm:$0xff] (%p6685_p10), %v4190_v2  }
 0x7c6   : > { %4195 = vst [vmem:[%s9031_s18 + $0x8] sm:$0xff] (%p6685_p10), %v4194_v1  }
 0x7c7   : > { %v4030_v32 = vpop.permute.xlu0 %4029 }
 0x7c8   : > { %5627 = vst.msk [vmem:[%s7490_s9 + $0xc8] sm:$0xf] %vm2085_vm1, %v4030_v32  ;;  %v4198_v32 = vld [vmem:[%s7481_s14 + $0x10] sm:$0xff] (%p6685_p10)  }
 0x7c9   : > { %4102 = vrot.lane.b32.xlu0 %v9608_v11, %s6519_s2  ;;  %v4202_v11 = vld [vmem:[%s7481_s14 + $0x18] sm:$0xff] (%p6685_p10)   ;;  %4199 = vst [vmem:[%s9031_s18 + $0x10] sm:$0xff] (%p6685_p10), %v4198_v32  }
 0x7ca   : > { %4203 = vst [vmem:[%s9031_s18 + $0x18] sm:$0xff] (%p6685_p10), %v4202_v11  }
 0x7cb   : > { %v4034_v53 = vpop.permute.xlu0 %4033 }
 0x7cc   : > { %5629 = vst.msk [vmem:[%s7490_s9 + $0xd0] sm:$0xf] %vm2085_vm1, %v4034_v53  ;;  %v4206_v53 = vld [vmem:[%s7481_s14 + $0x20] sm:$0xff] (%p6685_p10)  }
 0x7cd   : > { %4106 = vrot.lane.b32.xlu0 %v9609_v51, %s6519_s2  ;;  %v4210_v51 = vld [vmem:[%s7481_s14 + $0x28] sm:$0xff] (%p6685_p10)   ;;  %4207 = vst [vmem:[%s9031_s18 + $0x20] sm:$0xff] (%p6685_p10), %v4206_v53  }
 0x7ce   : > { %v3782_v8 = vpop.xlane.xlu1 %3781  ;;  %4211 = vst [vmem:[%s9031_s18 + $0x28] sm:$0xff] (%p6685_p10), %v4210_v51  }
 0x7cf   : > { %v3798_v22 = vmax.f32 %v3782_v8, 1e-24  ;;  %v4038_v28 = vpop.permute.xlu0 %4037  ;;  %v4214_v8 = vld [vmem:[%s7481_s14 + $0x30] sm:$0xff] (%p6685_p10)  }
 0x7d0   : > { %5631 = vst.msk [vmem:[%s7490_s9 + $0xd8] sm:$0xf] %vm2085_vm1, %v4038_v28  ;;  %v4222_v28 = vld [vmem:[%s7481_s14 + $0x40] sm:$0xff] (%p6685_p10)   ;;  %4215 = vst [vmem:[%s9031_s18 + $0x30] sm:$0xff] (%p6685_p10), %v4214_v8  }
 0x7d1   : > { %6381 = vrsqrt.f32 %v3798_v22  ;;  %4110 = vrot.lane.b32.xlu0 %v9610_v59, %s6519_s2  ;;  %v4218_v22 = vld [vmem:[%s7481_s14 + $0x38] sm:$0xff] (%p6685_p10)   ;;  %v4226_v59 = vld [vmem:[%s7481_s14 + $0x48] sm:$0xff] (%p6685_p10)   ;;  %4223 = vst [vmem:[%s9031_s18 + $0x80] sm:$0xff] (%p6685_p10), %v4222_v28  }
 0x7d2   : > { %v2729_v15 = vpop.permute.xlu1 %2728  ;;  %4219 = vst [vmem:[%s9031_s18 + $0x38] sm:$0xff] (%p6685_p10), %v4218_v22   ;;  %4227 = vst [vmem:[%s9031_s18 + $0x88] sm:$0xff] (%p6685_p10), %v4226_v59  }
 0x7d3   : > { %5432 = vst.msk [vmem:[%s7481_s14 + $0x7c] sm:$0xf] %vm2085_vm1, %v2729_v15  ;;  %v4042_v30 = vpop.permute.xlu0 %4041  ;;  %v4230_v15 = vld [vmem:[%s7481_s14 + $0x50] sm:$0xff] (%p6685_p10)  }
 0x7d4   : > { %5633 = vst.msk [vmem:[%s7490_s9 + $0xe0] sm:$0xf] %vm2085_vm1, %v4042_v30  ;;  %v4234_v30 = vld [vmem:[%s7481_s14 + $0x58] sm:$0xff] (%p6685_p10)   ;;  %4231 = vst [vmem:[%s9031_s18 + $0x90] sm:$0xff] (%p6685_p10), %v4230_v15  }
 0x7d5   : > { %4114 = vrot.lane.b32.xlu0 %v9611_v24, %s6519_s2  ;;  %4235 = vst [vmem:[%s9031_s18 + $0x98] sm:$0xff] (%p6685_p10), %v4234_v30   ;;  %v4238_v24 = vld [vmem:[%s7481_s14 + $0x60] sm:$0xff] (%p6685_p10)  }
 0x7d6   : > { %v2842_v10 = vpop.permute.xlu1 %2841  ;;  %4239 = vst [vmem:[%s9031_s18 + $0xa0] sm:$0xff] (%p6685_p10), %v4238_v24  }
 0x7d7   : > { %5464 = vst.msk [vmem:[%s7490_s9 + $0x7c] sm:$0xf] %vm2085_vm1, %v2842_v10  ;;  %v4046_v54 = vpop.permute.xlu0 %4045  ;;  %v4242_v10 = vld [vmem:[%s7481_s14 + $0x68] sm:$0xff] (%p6685_p10)  }
 0x7d8   : > { %5635 = vst.msk [vmem:[%s7490_s9 + $0xe8] sm:$0xf] %vm2085_vm1, %v4046_v54  ;;  %v4246_v54 = vld [vmem:[%s7481_s14 + $0x70] sm:$0xff] (%p6685_p10)   ;;  %4243 = vst [vmem:[%s9031_s18 + $0xa8] sm:$0xff] (%p6685_p10), %v4242_v10  }
 0x7d9   : > { %4118 = vrot.lane.b32.xlu0 %v9612_v56, %s6519_s2  ;;  %4247 = vst [vmem:[%s9031_s18 + $0xb0] sm:$0xff] (%p6685_p10), %v4246_v54  }
 0x7da   : > { %v3915_v62 = vpop.permute.xlu1 %3914  ;;  %v4250_v56 = vld [vmem:[%s7481_s14 + $0x78] sm:$0xff] (%p6685_p10)  }
 0x7db   : > { %v6382_v29 = vpop.eup %6381  ;;  %5594 = vst.msk [vmem:[%s7481_s14 + $0xc4] sm:$0xf] %vm2085_vm1, %v3915_v62  ;;  %v4050_v35 = vpop.permute.xlu0 %4049  ;;  %v4254_v62 = vld [vmem:[%s7481_s14 + $0x80] sm:$0xff] (%p6685_p10)   ;;  %4251 = vst [vmem:[%s9031_s18 + $0xb8] sm:$0xff] (%p6685_p10), %v4250_v56  }
 0x7dc   : > { %v3830_v39 = vmul.f32 8.0, %v6382_v29  ;;  %5637 = vst.msk [vmem:[%s7490_s9 + $0xf0] sm:$0xf] %vm2085_vm1, %v4050_v35  ;;  %v4258_v29 = vld [vmem:[%s7481_s14 + $0x88] sm:$0xff] (%p6685_p10)   ;;  %4255 = vst [vmem:[%s9031_s18 + $0x100] sm:$0xff] (%p6685_p10), %v4254_v62   ;;  %v4262_v35 = vld [vmem:[%s7481_s14 + $0x90] sm:$0xff] (%p6685_p10)  }
 0x7dd   : > { %4259 = vst [vmem:[%s9031_s18 + $0x108] sm:$0xff] (%p6685_p10), %v4258_v29   ;;  %4263 = vst [vmem:[%s9031_s18 + $0x110] sm:$0xff] (%p6685_p10), %v4262_v35  }
 0x7de   : > { %v3847_v43 = vmul.f32 %v3830_v39, %v8501_v23  ;;  %v3917_v13 = vpop.permute.xlu1 %3916  ;;  %v4266_v39 = vld [vmem:[%s7481_s14 + $0x98] sm:$0xff] (%p6685_p10)  }
 0x7df   : > { %5595 = vst.msk [vmem:[%s7481_s14 + $0xc8] sm:$0xf] %vm2085_vm1, %v3917_v13  ;;  %4267 = vst [vmem:[%s9031_s18 + $0x118] sm:$0xff] (%p6685_p10), %v4266_v39   ;;  %v4274_v13 = vld [vmem:[%s7481_s14 + $0xa8] sm:$0xff] (%p6685_p10)  }
 0x7e0   : > { %v3863_v46 = vmul.f32 %v3847_v43, %v8261_v9  ;;  %v9614_v9 = vld [vmem:[#allocation59_spill] sm:$0xff]  ;;  %v4270_v43 = vld [vmem:[%s7481_s14 + $0xa0] sm:$0xff] (%p6685_p10)   ;;  %4275 = vst [vmem:[%s9031_s18 + $0x128] sm:$0xff] (%p6685_p10), %v4274_v13  }
 0x7e1   : > { %4271 = vst [vmem:[%s9031_s18 + $0x120] sm:$0xff] (%p6685_p10), %v4270_v43  }
 0x7e2   : > { %v3919_v12 = vpop.permute.xlu1 %3918  ;;  %v5831_v7 = vpack.c.bf16 %v3863_v46, %v3863_v46  ;;  %v4278_v46 = vld [vmem:[%s7481_s14 + $0xb0] sm:$0xff] (%p6685_p10)  }
 0x7e3   : > { %5596 = vst.msk [vmem:[%s7481_s14 + $0xcc] sm:$0xf] %vm2085_vm1, %v3919_v12  ;;  %v4282_v12 = vld [vmem:[%s7481_s14 + $0xb8] sm:$0xff] (%p6685_p10)   ;;  %4279 = vst [vmem:[%s9031_s18 + $0x130] sm:$0xff] (%p6685_p10), %v4278_v46  }
 0x7e4   : > { %4055 = vrot.lane.b32.xlu1 %v5831_v7, %s6519_s2  ;;  %4283 = vst [vmem:[%s9031_s18 + $0x138] sm:$0xff] (%p6685_p10), %v4282_v12   ;;  %v4286_v7 = vld [vmem:[%s7481_s14 + $0xc0] sm:$0xff] (%p6685_p10)  }
 0x7e5   : > { %4287 = vst [vmem:[%s9031_s18 + $0x180] sm:$0xff] (%p6685_p10), %v4286_v7  }
 0x7e6   : > { %v3923_v61 = vpop.permute.xlu1 %3922 }
 0x7e7   : > { %5598 = vst.msk [vmem:[%s7481_s14 + $0xd4] sm:$0xf] %vm2085_vm1, %v3923_v61 }
 0x7e8   : > { %4092 = vrot.lane.b32.xlu1 %v9613_v36, %s6519_s2 }
 0x7ea   : > { %v3927_v23 = vpop.permute.xlu1 %3926  ;;  %v4290_v61 = vld [vmem:[%s7481_s14 + $0xc8] sm:$0xff] (%p6685_p10)  }
 0x7eb   : > { %5600 = vst.msk [vmem:[%s7481_s14 + $0xdc] sm:$0xf] %vm2085_vm1, %v3927_v23  ;;  %4291 = vst [vmem:[%s9031_s18 + $0x188] sm:$0xff] (%p6685_p10), %v4290_v61  }
 0x7ec   : > { %4096 = vrot.lane.b32.xlu1 %v9614_v9, %s6519_s2 }
 0x7ee   : > { %v3931_v44 = vpop.permute.xlu1 %3930  ;;  %v4294_v36 = vld [vmem:[%s7481_s14 + $0xd0] sm:$0xff] (%p6685_p10)  }
 0x7ef   : > { %5602 = vst.msk [vmem:[%s7481_s14 + $0xe4] sm:$0xf] %vm2085_vm1, %v3931_v44  ;;  %4295 = vst [vmem:[%s9031_s18 + $0x190] sm:$0xff] (%p6685_p10), %v4294_v36  }
 0x7f0   : > { %4100 = vrot.lane.b32.xlu1 %v9615_v41, %s6519_s2 }
 0x7f2   : > { %v3935_v63 = vpop.permute.xlu1 %3934  ;;  %v4298_v23 = vld [vmem:[%s7481_s14 + $0xd8] sm:$0xff] (%p6685_p10)  }
 0x7f3   : > { %5604 = vst.msk [vmem:[%s7481_s14 + $0xec] sm:$0xf] %vm2085_vm1, %v3935_v63  ;;  %4299 = vst [vmem:[%s9031_s18 + $0x198] sm:$0xff] (%p6685_p10), %v4298_v23  }
 0x7f4   : > { %4104 = vrot.lane.b32.xlu1 %v9616_v57, %s6519_s2 }
 0x7f6   : > { %v3939_v42 = vpop.permute.xlu1 %3938  ;;  %v4302_v9 = vld [vmem:[%s7481_s14 + $0xe0] sm:$0xff] (%p6685_p10)  }
 0x7f7   : > { %5606 = vst.msk [vmem:[%s7481_s14 + $0xf4] sm:$0xf] %vm2085_vm1, %v3939_v42  ;;  %4303 = vst [vmem:[%s9031_s18 + $0x1a0] sm:$0xff] (%p6685_p10), %v4302_v9  }
 0x7f8   : > { %4108 = vrot.lane.b32.xlu1 %v9617_v60, %s6519_s2 }
 0x7fa   : > { %v3943_v16 = vpop.permute.xlu1 %3942  ;;  %v4306_v44 = vld [vmem:[%s7481_s14 + $0xe8] sm:$0xff] (%p6685_p10)  }
 0x7fb   : > { %5608 = vst.msk [vmem:[%s7481_s14 + $0xfc] sm:$0xf] %vm2085_vm1, %v3943_v16  ;;  %4307 = vst [vmem:[%s9031_s18 + $0x1a8] sm:$0xff] (%p6685_p10), %v4306_v44  }
 0x7fc   : > { %4112 = vrot.lane.b32.xlu1 %v9618_v58, %s6519_s2 }
 0x7fe   : > { %v4028_v45 = vpop.permute.xlu1 %4027  ;;  %v4310_v41 = vld [vmem:[%s7481_s14 + $0xf0] sm:$0xff] (%p6685_p10)  }
 0x7ff   : > { %5626 = vst.msk [vmem:[%s7490_s9 + $0xc4] sm:$0xf] %vm2085_vm1, %v4028_v45  ;;  %4311 = vst [vmem:[%s9031_s18 + $0x1b0] sm:$0xff] (%p6685_p10), %v4310_v41  }
 0x800   : > { %4116 = vrot.lane.b32.xlu1 %v9619_v40, %s6519_s2 }
 0x802   : > { %v4032_v49 = vpop.permute.xlu1 %4031  ;;  %v4314_v63 = vld [vmem:[%s7481_s14 + $0xf8] sm:$0xff] (%p6685_p10)  }
 0x803   : > { %5628 = vst.msk [vmem:[%s7490_s9 + $0xcc] sm:$0xf] %vm2085_vm1, %v4032_v49  ;;  %4315 = vst [vmem:[%s9031_s18 + $0x1b8] sm:$0xff] (%p6685_p10), %v4314_v63  }
 0x804   : > { %4120 = vrot.lane.b32.xlu1 %v9620_v34, %s6519_s2 }
 0x806   : > { %v4036_v18 = vpop.permute.xlu1 %4035 }
 0x807   : > { %5630 = vst.msk [vmem:[%s7490_s9 + $0xd4] sm:$0xf] %vm2085_vm1, %v4036_v18 }
 0x80a   : > { %v4040_v5 = vpop.permute.xlu1 %4039 }
 0x80b   : > { %5632 = vst.msk [vmem:[%s7490_s9 + $0xdc] sm:$0xf] %vm2085_vm1, %v4040_v5 }
 0x80e   : > { %v4044_v3 = vpop.permute.xlu1 %4043 }
 0x80f   : > { %5634 = vst.msk [vmem:[%s7490_s9 + $0xe4] sm:$0xf] %vm2085_vm1, %v4044_v3 }
 0x812   : > { %v4048_v37 = vpop.permute.xlu1 %4047 }
 0x813   : > { %5636 = vst.msk [vmem:[%s7490_s9 + $0xec] sm:$0xf] %vm2085_vm1, %v4048_v37 }
 0x816   : > { %v4052_v27 = vpop.permute.xlu1 %4051 }
 0x817   : > { %5638 = vst.msk [vmem:[%s7490_s9 + $0xf4] sm:$0xf] %vm2085_vm1, %v4052_v27 }
 0x82b   : > { %v4054_v25 = vpop.permute.xlu0 %4053 }
 0x82c   : > { %5639 = vst.msk [vmem:[%s7490_s9 + $0xf8] sm:$0xf] %vm2085_vm1, %v4054_v25 }
 0x82f   : > { %v4091_v48 = vpop.permute.xlu0 %4090 }
 0x830   : > { %5641 = vst.msk [vmem:[%s7315_s29 + $0xc0] sm:$0xf] %vm2085_vm1, %v4091_v48 }
 0x833   : > { %v4095_v21 = vpop.permute.xlu0 %4094 }
 0x834   : > { %5643 = vst.msk [vmem:[%s7315_s29 + $0xc8] sm:$0xf] %vm2085_vm1, %v4095_v21 }
 0x837   : > { %v4099_v19 = vpop.permute.xlu0 %4098 }
 0x838   : > { %5645 = vst.msk [vmem:[%s7315_s29 + $0xd0] sm:$0xf] %vm2085_vm1, %v4099_v19 }
 0x83b   : > { %v4103_v20 = vpop.permute.xlu0 %4102 }
 0x83c   : > { %5647 = vst.msk [vmem:[%s7315_s29 + $0xd8] sm:$0xf] %vm2085_vm1, %v4103_v20 }
 0x83f   : > { %v4107_v0 = vpop.permute.xlu0 %4106 }
 0x840   : > { %5649 = vst.msk [vmem:[%s7315_s29 + $0xe0] sm:$0xf] %vm2085_vm1, %v4107_v0 }
 0x843   : > { %v4111_v55 = vpop.permute.xlu0 %4110 }
 0x844   : > { %5651 = vst.msk [vmem:[%s7315_s29 + $0xe8] sm:$0xf] %vm2085_vm1, %v4111_v55 }
 0x847   : > { %v4115_v33 = vpop.permute.xlu0 %4114 }
 0x848   : > { %5653 = vst.msk [vmem:[%s7315_s29 + $0xf0] sm:$0xf] %vm2085_vm1, %v4115_v33 }
 0x84b   : > { %v4119_v38 = vpop.permute.xlu0 %4118 }
 0x84c   : > { %5655 = vst.msk [vmem:[%s7315_s29 + $0xf8] sm:$0xf] %vm2085_vm1, %v4119_v38 }
 0x856   : > { %v4056_v17 = vpop.permute.xlu1 %4055 }
 0x857   : > { %5640 = vst.msk [vmem:[%s7490_s9 + $0xfc] sm:$0xf] %vm2085_vm1, %v4056_v17 }
 0x85a   : > { %v4093_v31 = vpop.permute.xlu1 %4092 }
 0x85b   : > { %5642 = vst.msk [vmem:[%s7315_s29 + $0xc4] sm:$0xf] %vm2085_vm1, %v4093_v31 }
 0x85e   : > { %v4097_v14 = vpop.permute.xlu1 %4096 }
 0x85f   : > { %5644 = vst.msk [vmem:[%s7315_s29 + $0xcc] sm:$0xf] %vm2085_vm1, %v4097_v14 }
 0x862   : > { %v4101_v4 = vpop.permute.xlu1 %4100 }
 0x863   : > { %5646 = vst.msk [vmem:[%s7315_s29 + $0xd4] sm:$0xf] %vm2085_vm1, %v4101_v4 }
 0x866   : > { %v4105_v47 = vpop.permute.xlu1 %4104 }
 0x867   : > { %5648 = vst.msk [vmem:[%s7315_s29 + $0xdc] sm:$0xf] %vm2085_vm1, %v4105_v47 }
 0x86a   : > { %v4109_v26 = vpop.permute.xlu1 %4108 }
 0x86b   : > { %5650 = vst.msk [vmem:[%s7315_s29 + $0xe4] sm:$0xf] %vm2085_vm1, %v4109_v26 }
 0x86e   : > { %v4113_v52 = vpop.permute.xlu1 %4112 }
 0x86f   : > { %5652 = vst.msk [vmem:[%s7315_s29 + $0xec] sm:$0xf] %vm2085_vm1, %v4113_v52 }
 0x871   : > { %4169 = sbr.rel (!%p6685_p10) target bundleno = 2168 (0x878), region = 64 }
 0x872   : > { %v4117_v50 = vpop.permute.xlu1 %4116 }
 0x873   : > { %5654 = vst.msk [vmem:[%s7315_s29 + $0xf4] sm:$0xf] %vm2085_vm1, %v4117_v50 }
 0x876   : > { %v4121_v6 = vpop.permute.xlu1 %4120 }
 0x877   : > { %5656 = vst.msk [vmem:[%s7315_s29 + $0xfc] sm:$0xf] %vm2085_vm1, %v4121_v6 }
 0x878 PF: > { %4468 = sbr.rel (!%p6685_p10) target bundleno = 2194 (0x892), region = 105  ;;  %s9625_s2 = sld [smem:[#allocation14_spill]] (%p6685_p10)  ;;  %v4489_v57 = vld [vmem:[%s7490_s9] sm:$0xff] (%p6685_p10)   ;;  %v4493_v42 = vld [vmem:[%s7490_s9 + $0x8] sm:$0xff] (%p6685_p10)   ;;  %v4497_v60 = vld [vmem:[%s7490_s9 + $0x10] sm:$0xff] (%p6685_p10)  }
 0x879   : > { %s5664_s13 = sshll.u32 (%p6685_p10), %s6499_s0, 7  ;;  %v4501_v16 = vld [vmem:[%s7490_s9 + $0x18] sm:$0xff] (%p6685_p10)   ;;  %v4505_v58 = vld [vmem:[%s7490_s9 + $0x20] sm:$0xff] (%p6685_p10)   ;;  %v4509_v45 = vld [vmem:[%s7490_s9 + $0x28] sm:$0xff] (%p6685_p10)   ;;  %s9626_s27 = sld [smem:[#allocation127_spill]] (%p6685_p10) }
 0x87a   : > { %v4513_v40 = vld [vmem:[%s7490_s9 + $0x30] sm:$0xff] (%p6685_p10)   ;;  %v4517_v49 = vld [vmem:[%s7490_s9 + $0x38] sm:$0xff] (%p6685_p10)   ;;  %v4521_v34 = vld [vmem:[%s7490_s9 + $0x40] sm:$0xff] (%p6685_p10)  }
 0x87b   : > { %v4525_v18 = vld [vmem:[%s7490_s9 + $0x48] sm:$0xff] (%p6685_p10)   ;;  %v4529_v5 = vld [vmem:[%s7490_s9 + $0x50] sm:$0xff] (%p6685_p10)   ;;  %v4533_v3 = vld [vmem:[%s7490_s9 + $0x58] sm:$0xff] (%p6685_p10)  }
 0x87c   : > { %v4537_v37 = vld [vmem:[%s7490_s9 + $0x60] sm:$0xff] (%p6685_p10)   ;;  %v4541_v27 = vld [vmem:[%s7490_s9 + $0x68] sm:$0xff] (%p6685_p10)   ;;  %v4545_v25 = vld [vmem:[%s7490_s9 + $0x70] sm:$0xff] (%p6685_p10)  }
 0x87d   : > { %v4549_v48 = vld [vmem:[%s7490_s9 + $0x78] sm:$0xff] (%p6685_p10)   ;;  %v4553_v21 = vld [vmem:[%s7490_s9 + $0x80] sm:$0xff] (%p6685_p10)   ;;  %v4557_v19 = vld [vmem:[%s7490_s9 + $0x88] sm:$0xff] (%p6685_p10)  }
 0x87e   : > { %s5663_s12 = sshll.u32 (%p6685_p10), %s9625_s2, 4  ;;  %v4561_v20 = vld [vmem:[%s7490_s9 + $0x90] sm:$0xff] (%p6685_p10)   ;;  %v4565_v0 = vld [vmem:[%s7490_s9 + $0x98] sm:$0xff] (%p6685_p10)   ;;  %v4569_v55 = vld [vmem:[%s7490_s9 + $0xa0] sm:$0xff] (%p6685_p10)  }
 0x87f   : > { %s4471_s14 = sadd.s32 %s5664_s13, %s5663_s12  ;;  %v4573_v33 = vld [vmem:[%s7490_s9 + $0xa8] sm:$0xff]   ;;  %v4577_v38 = vld [vmem:[%s7490_s9 + $0xb0] sm:$0xff]   ;;  %v4581_v17 = vld [vmem:[%s7490_s9 + $0xb8] sm:$0xff]  }
 0x880   : > { %s5665_s8 = sshll.u32 %s4471_s14, 2  ;;  %v4585_v31 = vld [vmem:[%s7490_s9 + $0xc0] sm:$0xff]   ;;  %v4589_v14 = vld [vmem:[%s7490_s9 + $0xc8] sm:$0xff]   ;;  %v4593_v4 = vld [vmem:[%s7490_s9 + $0xd0] sm:$0xff]  }
 0x881   : > { %s9104_s28 = scalar_lea.vmem %s9626_s27, %s5665_s8  ;;  %v4597_v47 = vld [vmem:[%s7490_s9 + $0xd8] sm:$0xff]   ;;  %v4601_v26 = vld [vmem:[%s7490_s9 + $0xe0] sm:$0xff]   ;;  %v4605_v52 = vld [vmem:[%s7490_s9 + $0xe8] sm:$0xff]  }
 0x882   : > { %4490 = vst [vmem:[%s9104_s28] sm:$0xff] %v4489_v57   ;;  %4494 = vst [vmem:[%s9104_s28 + $0x8] sm:$0xff] %v4493_v42   ;;  %v4609_v50 = vld [vmem:[%s7490_s9 + $0xf0] sm:$0xff]   ;;  %v4613_v6 = vld [vmem:[%s7490_s9 + $0xf8] sm:$0xff]  }
 0x883   : > { %4498 = vst [vmem:[%s9104_s28 + $0x10] sm:$0xff] %v4497_v60   ;;  %4502 = vst [vmem:[%s9104_s28 + $0x18] sm:$0xff] %v4501_v16  }
 0x884   : > { %4506 = vst [vmem:[%s9104_s28 + $0x20] sm:$0xff] %v4505_v58   ;;  %4510 = vst [vmem:[%s9104_s28 + $0x28] sm:$0xff] %v4509_v45  }
 0x885   : > { %4514 = vst [vmem:[%s9104_s28 + $0x30] sm:$0xff] %v4513_v40   ;;  %4518 = vst [vmem:[%s9104_s28 + $0x38] sm:$0xff] %v4517_v49  }
 0x886   : > { %4522 = vst [vmem:[%s9104_s28 + $0x80] sm:$0xff] %v4521_v34   ;;  %4526 = vst [vmem:[%s9104_s28 + $0x88] sm:$0xff] %v4525_v18  }
 0x887   : > { %4530 = vst [vmem:[%s9104_s28 + $0x90] sm:$0xff] %v4529_v5   ;;  %4534 = vst [vmem:[%s9104_s28 + $0x98] sm:$0xff] %v4533_v3  }
 0x888   : > { %4538 = vst [vmem:[%s9104_s28 + $0xa0] sm:$0xff] %v4537_v37   ;;  %4542 = vst [vmem:[%s9104_s28 + $0xa8] sm:$0xff] %v4541_v27  }
 0x889   : > { %4546 = vst [vmem:[%s9104_s28 + $0xb0] sm:$0xff] %v4545_v25   ;;  %4550 = vst [vmem:[%s9104_s28 + $0xb8] sm:$0xff] %v4549_v48  }
 0x88a   : > { %4554 = vst [vmem:[%s9104_s28 + $0x100] sm:$0xff] %v4553_v21   ;;  %4558 = vst [vmem:[%s9104_s28 + $0x108] sm:$0xff] %v4557_v19  }
 0x88b   : > { %4562 = vst [vmem:[%s9104_s28 + $0x110] sm:$0xff] %v4561_v20   ;;  %4566 = vst [vmem:[%s9104_s28 + $0x118] sm:$0xff] %v4565_v0  }
 0x88c   : > { %4570 = vst [vmem:[%s9104_s28 + $0x120] sm:$0xff] %v4569_v55   ;;  %4574 = vst [vmem:[%s9104_s28 + $0x128] sm:$0xff] %v4573_v33  }
 0x88d   : > { %4578 = vst [vmem:[%s9104_s28 + $0x130] sm:$0xff] %v4577_v38   ;;  %4582 = vst [vmem:[%s9104_s28 + $0x138] sm:$0xff] %v4581_v17  }
 0x88e   : > { %4586 = vst [vmem:[%s9104_s28 + $0x180] sm:$0xff] %v4585_v31   ;;  %4590 = vst [vmem:[%s9104_s28 + $0x188] sm:$0xff] %v4589_v14  }
 0x88f   : > { %4594 = vst [vmem:[%s9104_s28 + $0x190] sm:$0xff] %v4593_v4   ;;  %4598 = vst [vmem:[%s9104_s28 + $0x198] sm:$0xff] %v4597_v47  }
 0x890   : > { %4602 = vst [vmem:[%s9104_s28 + $0x1a0] sm:$0xff] %v4601_v26   ;;  %4606 = vst [vmem:[%s9104_s28 + $0x1a8] sm:$0xff] %v4605_v52  }
 0x891   : > { %4610 = vst [vmem:[%s9104_s28 + $0x1b0] sm:$0xff] %v4609_v50   ;;  %4614 = vst [vmem:[%s9104_s28 + $0x1b8] sm:$0xff] %v4613_v6  }
 0x892 PF: > { %4767 = sbr.rel (!%p6685_p10) target bundleno = 2220 (0x8ac), region = 146  ;;  %s9628_s26 = sld [smem:[#allocation14_spill]] (%p6685_p10)  ;;  %v4788_v2 = vld [vmem:[%s7315_s29] sm:$0xff] (%p6685_p10)   ;;  %v4792_v1 = vld [vmem:[%s7315_s29 + $0x8] sm:$0xff] (%p6685_p10)   ;;  %v4796_v32 = vld [vmem:[%s7315_s29 + $0x10] sm:$0xff] (%p6685_p10)  }
 0x893   : > { %s5667_s17 = sshll.u32 (%p6685_p10), %s6499_s0, 7  ;;  %v4800_v11 = vld [vmem:[%s7315_s29 + $0x18] sm:$0xff] (%p6685_p10)   ;;  %v4804_v53 = vld [vmem:[%s7315_s29 + $0x20] sm:$0xff] (%p6685_p10)   ;;  %v4808_v51 = vld [vmem:[%s7315_s29 + $0x28] sm:$0xff] (%p6685_p10)   ;;  %s9629_s19 = sld [smem:[#allocation128_spill]] (%p6685_p10) }
 0x894   : > { %v4812_v8 = vld [vmem:[%s7315_s29 + $0x30] sm:$0xff] (%p6685_p10)   ;;  %v4816_v22 = vld [vmem:[%s7315_s29 + $0x38] sm:$0xff] (%p6685_p10)   ;;  %v4820_v28 = vld [vmem:[%s7315_s29 + $0x40] sm:$0xff] (%p6685_p10)  }
 0x895   : > { %v4824_v59 = vld [vmem:[%s7315_s29 + $0x48] sm:$0xff] (%p6685_p10)   ;;  %v4828_v15 = vld [vmem:[%s7315_s29 + $0x50] sm:$0xff] (%p6685_p10)   ;;  %v4832_v30 = vld [vmem:[%s7315_s29 + $0x58] sm:$0xff] (%p6685_p10)  }
 0x896   : > { %v4836_v24 = vld [vmem:[%s7315_s29 + $0x60] sm:$0xff] (%p6685_p10)   ;;  %v4840_v10 = vld [vmem:[%s7315_s29 + $0x68] sm:$0xff] (%p6685_p10)   ;;  %v4844_v54 = vld [vmem:[%s7315_s29 + $0x70] sm:$0xff] (%p6685_p10)  }
 0x897   : > { %v4848_v56 = vld [vmem:[%s7315_s29 + $0x78] sm:$0xff] (%p6685_p10)   ;;  %v4852_v62 = vld [vmem:[%s7315_s29 + $0x80] sm:$0xff] (%p6685_p10)   ;;  %v4856_v29 = vld [vmem:[%s7315_s29 + $0x88] sm:$0xff] (%p6685_p10)  }
 0x898   : > { %s5666_s9 = sshll.u32 (%p6685_p10), %s9628_s26, 4  ;;  %v4860_v35 = vld [vmem:[%s7315_s29 + $0x90] sm:$0xff] (%p6685_p10)   ;;  %v4864_v39 = vld [vmem:[%s7315_s29 + $0x98] sm:$0xff] (%p6685_p10)   ;;  %v4868_v43 = vld [vmem:[%s7315_s29 + $0xa0] sm:$0xff] (%p6685_p10)  }
 0x899   : > { %s4770_s6 = sadd.s32 %s5667_s17, %s5666_s9  ;;  %v4872_v13 = vld [vmem:[%s7315_s29 + $0xa8] sm:$0xff]   ;;  %v4876_v46 = vld [vmem:[%s7315_s29 + $0xb0] sm:$0xff]   ;;  %v4880_v12 = vld [vmem:[%s7315_s29 + $0xb8] sm:$0xff]  }
 0x89a   : > { %s5668_s16 = sshll.u32 %s4770_s6, 2  ;;  %v4884_v7 = vld [vmem:[%s7315_s29 + $0xc0] sm:$0xff]   ;;  %v4888_v61 = vld [vmem:[%s7315_s29 + $0xc8] sm:$0xff]   ;;  %v4892_v36 = vld [vmem:[%s7315_s29 + $0xd0] sm:$0xff]  }
 0x89b   : > { %s9177_s2 = scalar_lea.vmem %s9629_s19, %s5668_s16  ;;  %v4896_v23 = vld [vmem:[%s7315_s29 + $0xd8] sm:$0xff]   ;;  %v4900_v9 = vld [vmem:[%s7315_s29 + $0xe0] sm:$0xff]   ;;  %v4904_v44 = vld [vmem:[%s7315_s29 + $0xe8] sm:$0xff]  }
 0x89c   : > { %4789 = vst [vmem:[%s9177_s2] sm:$0xff] %v4788_v2   ;;  %4793 = vst [vmem:[%s9177_s2 + $0x8] sm:$0xff] %v4792_v1   ;;  %v4908_v41 = vld [vmem:[%s7315_s29 + $0xf0] sm:$0xff]   ;;  %v4912_v63 = vld [vmem:[%s7315_s29 + $0xf8] sm:$0xff]  }
 0x89d   : > { %4797 = vst [vmem:[%s9177_s2 + $0x10] sm:$0xff] %v4796_v32   ;;  %4801 = vst [vmem:[%s9177_s2 + $0x18] sm:$0xff] %v4800_v11  }
 0x89e   : > { %4805 = vst [vmem:[%s9177_s2 + $0x20] sm:$0xff] %v4804_v53   ;;  %4809 = vst [vmem:[%s9177_s2 + $0x28] sm:$0xff] %v4808_v51  }
 0x89f   : > { %4813 = vst [vmem:[%s9177_s2 + $0x30] sm:$0xff] %v4812_v8   ;;  %4817 = vst [vmem:[%s9177_s2 + $0x38] sm:$0xff] %v4816_v22  }
 0x8a0   : > { %4821 = vst [vmem:[%s9177_s2 + $0x80] sm:$0xff] %v4820_v28   ;;  %4825 = vst [vmem:[%s9177_s2 + $0x88] sm:$0xff] %v4824_v59  }
 0x8a1   : > { %4829 = vst [vmem:[%s9177_s2 + $0x90] sm:$0xff] %v4828_v15   ;;  %4833 = vst [vmem:[%s9177_s2 + $0x98] sm:$0xff] %v4832_v30  }
 0x8a2   : > { %4837 = vst [vmem:[%s9177_s2 + $0xa0] sm:$0xff] %v4836_v24   ;;  %4841 = vst [vmem:[%s9177_s2 + $0xa8] sm:$0xff] %v4840_v10  }
 0x8a3   : > { %4845 = vst [vmem:[%s9177_s2 + $0xb0] sm:$0xff] %v4844_v54   ;;  %4849 = vst [vmem:[%s9177_s2 + $0xb8] sm:$0xff] %v4848_v56  }
 0x8a4   : > { %4853 = vst [vmem:[%s9177_s2 + $0x100] sm:$0xff] %v4852_v62   ;;  %4857 = vst [vmem:[%s9177_s2 + $0x108] sm:$0xff] %v4856_v29  }
 0x8a5   : > { %4861 = vst [vmem:[%s9177_s2 + $0x110] sm:$0xff] %v4860_v35   ;;  %4865 = vst [vmem:[%s9177_s2 + $0x118] sm:$0xff] %v4864_v39  }
 0x8a6   : > { %4869 = vst [vmem:[%s9177_s2 + $0x120] sm:$0xff] %v4868_v43   ;;  %4873 = vst [vmem:[%s9177_s2 + $0x128] sm:$0xff] %v4872_v13  }
 0x8a7   : > { %4877 = vst [vmem:[%s9177_s2 + $0x130] sm:$0xff] %v4876_v46   ;;  %4881 = vst [vmem:[%s9177_s2 + $0x138] sm:$0xff] %v4880_v12  }
 0x8a8   : > { %4885 = vst [vmem:[%s9177_s2 + $0x180] sm:$0xff] %v4884_v7   ;;  %4889 = vst [vmem:[%s9177_s2 + $0x188] sm:$0xff] %v4888_v61  }
 0x8a9   : > { %4893 = vst [vmem:[%s9177_s2 + $0x190] sm:$0xff] %v4892_v36   ;;  %4897 = vst [vmem:[%s9177_s2 + $0x198] sm:$0xff] %v4896_v23  }
 0x8aa   : > { %4901 = vst [vmem:[%s9177_s2 + $0x1a0] sm:$0xff] %v4900_v9   ;;  %4905 = vst [vmem:[%s9177_s2 + $0x1a8] sm:$0xff] %v4904_v44  }
 0x8ab   : > { %4909 = vst [vmem:[%s9177_s2 + $0x1b0] sm:$0xff] %v4908_v41   ;;  %4913 = vst [vmem:[%s9177_s2 + $0x1b8] sm:$0xff] %v4912_v63  }
 0x8ac PF: > { %s28_s24 = sadd.s32 1, %s6511_s24   ;;  %s9630_s12 = sld [smem:[#allocation15_spill]] }
 0x8ad   : > { %p25_p10 = scmp.ge.s32.totalorder %s28_s24, 6   ;;  %s9631_s19 = smov %s6487_s20 }
 0x8ae   : > { %s9632_s20 = smov %s6491_s21  ;;  %s9633_s21 = smov %s6698_s10 }
 0x8af   : > { %s9634_s22 = smov %s6503_s23  ;;  %s9635_s0 = smov %s6507_s1 }
 0x8b0   : > { %s9637_s1 = smov %s9643_s15  ;;  %27 = sbr.rel (!%p25_p10) target bundleno = 14 (0xe), region = 258 }
 0x8b2   : > { %s9636_s23 = smov %s9630_s12 }
 0x8b7   :  { %5090 = vsyncpa [#allocation6], 1 }
 0x8b8   :  { %5092 = vsyncpa [#allocation6 + $0x1], 1 }
 0x8b9   :  { %5093 = vsyncpa [#allocation8], 1 }

</bundles_post_ra>
